<compile_context>
chip_gen: v7x
topology: tpu7x:2x2x1
jax: 0.10.0
libtpu: 0.0.40
codegen_flags: <defaults>
</compile_context>

<pallas_src>
import functools

import numpy as np

import jax
import jax.numpy as jnp
from jax import lax
from jax.experimental import pallas as pl
from jax.experimental.pallas import tpu as pltpu

EPS = 1e-5


# ---------------------------------------------------------------------------
# Fused conv (+ bias + norm + activation + residual) kernel.
# One grid step == one sample: the full (HW, K) patch block and the full
# (HW, Cout) output live in VMEM, so norm statistics are computed in the same
# kernel right after the MXU matmul and only the bf16 result goes back to HBM.
# ---------------------------------------------------------------------------
def _fused_conv_kernel(*refs, norm, activation, has_residual):
    it = iter(refs)
    p_ref = next(it)          # (1, M, K)   bf16 patches for this sample
    w_ref = next(it)          # (K, C)      bf16 weights
    b_ref = next(it)          # (1, C)      f32 bias (zeros when conv has no bias)
    if norm == "ln":
        g_ref = next(it)      # (1, C)      f32 per-channel gamma
        bt_ref = next(it)     # (1, C)      f32 per-channel beta
    elif norm == "adailn":
        g_ref = next(it)      # (1, 1, C)   f32 per-sample style gamma
        bt_ref = next(it)     # (1, 1, C)   f32 per-sample style beta
        om_ref = next(it)     # (1, 1, C)   f32 per-sample style omega
    r_ref = next(it) if has_residual else None   # (1, M, C) bf16 residual input
    o_ref = next(it)          # (1, M, C)   bf16 output

    # Conv as one MXU matmul over the full K reduction, f32 accumulation.
    x = jnp.dot(p_ref[0], w_ref[...], preferred_element_type=jnp.float32)
    x = x + b_ref[...]                                        # (M, C)
    m, c = x.shape

    if norm == "ln":
        # TODO(synk): Conv2dBlock source not given; MUNIT LayerNorm assumed
        # (per-sample stats over (C,H,W), unbiased std, eps added to the std).
        n = m * c
        mean = jnp.sum(x) / n
        xc = x - mean
        var = jnp.sum(xc * xc) / (n - 1)
        y = xc / (jnp.sqrt(var) + EPS)
        y = y * g_ref[...] + bt_ref[...]
    elif norm == "adailn":
        # TODO(synk): AdaILN source not given; UGATIT-style IN/LN mix with
        # rho = sigmoid(omega) per (sample, channel) assumed.
        in_mean = jnp.sum(x, axis=0, keepdims=True) / m       # (1, C)
        xin = x - in_mean
        in_var = jnp.sum(xin * xin, axis=0, keepdims=True) / m
        x_in = xin * lax.rsqrt(in_var + EPS)
        ln_mean = jnp.sum(x) / (m * c)
        xln = x - ln_mean
        ln_var = jnp.sum(xln * xln) / (m * c)
        x_ln = xln * lax.rsqrt(ln_var + EPS)
        rho = jax.nn.sigmoid(om_ref[0])                        # (1, C)
        y = rho * x_in + (1.0 - rho) * x_ln
        y = y * g_ref[0] + bt_ref[0]
    else:
        y = x

    if activation == "relu":
        y = jnp.maximum(y, 0.0)
    elif activation == "tanh":
        y = jnp.tanh(y)

    if has_residual:                                           # use_res_connect
        y = y + r_ref[0].astype(jnp.float32)

    o_ref[0] = y.astype(o_ref.dtype)


# ---------------------------------------------------------------------------
# Patch construction: reflection pad + optional 2x nearest upsample + im2col
# fused into ONE static-index gather from the source feature map (no padded or
# upsampled activation tensor is ever materialised; patches gathered in bf16).
# ---------------------------------------------------------------------------
def _reflect_index(idx, n):
    idx = np.abs(idx)
    return np.where(idx >= n, 2 * (n - 1) - idx, idx)


def conv_patches(x_nhwc, k, stride, pad, upsample2x=False):
    B, H, W, C = x_nhwc.shape
    Hu, Wu = (2 * H, 2 * W) if upsample2x else (H, W)
    Ho = (Hu + 2 * pad - k) // stride + 1
    Wo = (Wu + 2 * pad - k) // stride + 1
    # Static index maps (numpy, trace time).
    ih = np.arange(Ho)[:, None] * stride + np.arange(k)[None, :] - pad
    iw = np.arange(Wo)[:, None] * stride + np.arange(k)[None, :] - pad
    ih = _reflect_index(ih, Hu)
    iw = _reflect_index(iw, Wu)
    if upsample2x:                       # nearest-neighbour upsample, fused
        ih = ih // 2
        iw = iw // 2
    flat = (ih[:, None, :, None] * W + iw[None, :, None, :]).reshape(-1)
    x_flat = x_nhwc.astype(jnp.bfloat16).reshape(B, H * W, C)
    patches = jnp.take(x_flat, jnp.asarray(flat, jnp.int32), axis=1)
    return patches.reshape(B, Ho * Wo, k * k * C), (Ho, Wo)


# ---------------------------------------------------------------------------
# One fused conv layer = one pallas_call, grid over the batch.
# ---------------------------------------------------------------------------
def fused_conv(x_nhwc, spec, p, *, norm="none", activation="none",
               style=None, residual=None, upsample2x=False):
    B = x_nhwc.shape[0]
    k, stride, pad, cout = spec["k"], spec["stride"], spec["pad"], spec["cout"]
    patches, (Ho, Wo) = conv_patches(x_nhwc, k, stride, pad, upsample2x)
    M = Ho * Wo
    K = patches.shape[-1]

    inputs = [patches, p["w2d"], p["bias"]]
    in_specs = [
        pl.BlockSpec((1, M, K), lambda b: (b, 0, 0)),
        pl.BlockSpec((K, cout), lambda b: (0, 0)),
        pl.BlockSpec((1, cout), lambda b: (0, 0)),
    ]
    if norm == "ln":
        inputs += [p["ln_g"], p["ln_b"]]
        in_specs += [pl.BlockSpec((1, cout), lambda b: (0, 0)),
                     pl.BlockSpec((1, cout), lambda b: (0, 0))]
    elif norm == "adailn":
        g, bt, om = style                       # each (B, 1, C) f32
        inputs += [g, bt, om]
        in_specs += [pl.BlockSpec((1, 1, cout), lambda b: (b, 0, 0))] * 3
    has_residual = residual is not None
    if has_residual:
        inputs.append(residual.reshape(B, M, cout).astype(jnp.bfloat16))
        in_specs.append(pl.BlockSpec((1, M, cout), lambda b: (b, 0, 0)))

    out = pl.pallas_call(
        functools.partial(_fused_conv_kernel, norm=norm, activation=activation,
                          has_residual=has_residual),
        out_shape=jax.ShapeDtypeStruct((B, M, cout), jnp.bfloat16),
        grid=(B,),
        in_specs=in_specs,
        out_specs=pl.BlockSpec((1, M, cout), lambda b: (b, 0, 0)),
        compiler_params=pltpu.CompilerParams(
            dimension_semantics=("parallel",),
            vmem_limit_bytes=32 * 1024 * 1024),
    )(*inputs)
    return out.reshape(B, Ho, Wo, cout)


# ---------------------------------------------------------------------------
# Network config / parameters (weights reshaped to (k*k*cin, cout), bf16,
# NO K or N padding).
# ---------------------------------------------------------------------------
def make_config(enc_out_ch, gamma_dim, db_number):
    cfg = {"encoder": [], "res": [], "decoder": []}
    cin = 3
    for cout in (32, enc_out_ch):
        cfg["encoder"].append(dict(k=3, stride=2, pad=1, cin=cin, cout=cout))
        cin = cout
    for _ in range(db_number):
        cfg["res"].append({
            "conv1": dict(k=3, stride=1, pad=1, cin=enc_out_ch, cout=gamma_dim),
            "conv2": dict(k=3, stride=1, pad=1, cin=gamma_dim, cout=enc_out_ch),
        })
    # TODO(synk): Decoder source not provided; MUNIT-style upsample decoder.
    c0, c1, c2 = enc_out_ch, enc_out_ch // 2, enc_out_ch // 4
    cfg["decoder"] = [
        dict(k=5, stride=1, pad=2, cin=c0, cout=c1),
        dict(k=5, stride=1, pad=2, cin=c1, cout=c2),
        dict(k=7, stride=1, pad=3, cin=c2, cout=3),
    ]
    return cfg


def _conv_param(key, cin, cout, k):
    scale = 1.0 / float(cin * k * k) ** 0.5
    w = jax.random.normal(key, (cout, cin, k, k), jnp.float32) * scale
    w2d = jnp.transpose(w, (2, 3, 1, 0)).reshape(k * k * cin, cout)
    return {"w2d": w2d.astype(jnp.bfloat16),
            "bias": jnp.zeros((1, cout), jnp.float32)}   # zeros == bias-free convs too


def init_params(key, cfg):
    keys = iter(jax.random.split(key, 64))
    params = {"encoder": [], "res": [], "decoder": []}
    for spec in cfg["encoder"]:
        p = _conv_param(next(keys), spec["cin"], spec["cout"], spec["k"])
        p["ln_g"] = jnp.ones((1, spec["cout"]), jnp.float32)
        p["ln_b"] = jnp.zeros((1, spec["cout"]), jnp.float32)
        params["encoder"].append(p)
    for blk in cfg["res"]:
        params["res"].append({
            "conv1": _conv_param(next(keys), blk["conv1"]["cin"], blk["conv1"]["cout"], 3),
            "conv2": _conv_param(next(keys), blk["conv2"]["cin"], blk["conv2"]["cout"], 3),
        })
    for i, spec in enumerate(cfg["decoder"]):
        p = _conv_param(next(keys), spec["cin"], spec["cout"], spec["k"])
        if i < 2:
            p["ln_g"] = jnp.ones((1, spec["cout"]), jnp.float32)
            p["ln_b"] = jnp.zeros((1, spec["cout"]), jnp.float32)
        params["decoder"].append(p)
    return params


# ---------------------------------------------------------------------------
# Forward pass
# ---------------------------------------------------------------------------
def style_transfer_forward(cfg, params, x_nchw, style_gamma, style_beta, style_omega):
    B = x_nchw.shape[0]
    x = jnp.transpose(x_nchw, (0, 2, 3, 1))              # NCHW -> NHWC
    # ContentEncoder: Conv2dBlock(k3, s2, reflect, ln, relu) x 2, fully fused.
    for spec, p in zip(cfg["encoder"], params["encoder"]):
        x = fused_conv(x, spec, p, norm="ln", activation="relu")
    # Dynamic residual blocks (bias-free convs, AdaILN with style codes).
    style = tuple(s.reshape(B, 1, -1).astype(jnp.float32)
                  for s in (style_gamma, style_beta, style_omega))
    for spec, p in zip(cfg["res"], params["res"]):
        h = fused_conv(x, spec["conv1"], p["conv1"],
                       norm="adailn", activation="relu", style=style)
        x = fused_conv(h, spec["conv2"], p["conv2"],
                       norm="adailn", activation="none", style=style,
                       residual=x)                        # fused use_res_connect add
    # Decoder (TODO(synk): assumed MUNIT-style; 2x upsample fused into gather).
    d, q = cfg["decoder"], params["decoder"]
    x = fused_conv(x, d[0], q[0], norm="ln", activation="relu", upsample2x=True)
    x = fused_conv(x, d[1], q[1], norm="ln", activation="relu", upsample2x=True)
    x = fused_conv(x, d[2], q[2], norm="none", activation="tanh")
    return jnp.transpose(x, (0, 3, 1, 2)).astype(jnp.float32)   # NHWC -> NCHW


# ---------------------------------------------------------------------------
if __name__ == "__main__":
    B = 2
    H = W = 16
    ENC_OUT_CH = 32
    GAMMA_DIM = BETA_DIM = OMEGA_DIM = 32
    DB_NUMBER = 2

    cfg = make_config(ENC_OUT_CH, GAMMA_DIM, DB_NUMBER)

    key = jax.random.PRNGKey(0)
    kx, kg, kb, ko, kp = jax.random.split(key, 5)
    x = jax.random.normal(kx, (B, 3, H, W), jnp.float32)
    style_gamma = jax.random.normal(kg, (B, GAMMA_DIM), jnp.float32)
    style_beta = jax.random.normal(kb, (B, BETA_DIM), jnp.float32)
    style_omega = jax.random.normal(ko, (B, OMEGA_DIM), jnp.float32)

    params = init_params(kp, cfg)

    fwd = jax.jit(functools.partial(style_transfer_forward, cfg))
    out = jax.block_until_ready(fwd(params, x, style_gamma, style_beta, style_omega))

    assert out.shape == (B, 3, H, W), out.shape
    assert bool(jnp.all(jnp.isfinite(out)))
    print("KERNEL_OK")
</pallas_src>

<mosaic_0001>
module attributes {stable_mosaic.version = 11 : i64} {
  func.func @_fused_conv_kernel(%arg0: i32, %arg1: memref<1x64x27xbf16, #tpu.memory_space<vmem>>, %arg2: memref<27x32xbf16, #tpu.memory_space<vmem>>, %arg3: memref<1x32xf32, #tpu.memory_space<vmem>>, %arg4: memref<1x32xf32, #tpu.memory_space<vmem>>, %arg5: memref<1x32xf32, #tpu.memory_space<vmem>>, %arg6: memref<1x64x32xbf16, #tpu.memory_space<vmem>>) attributes {dimension_semantics = [#tpu.dimension_semantics<parallel>], iteration_bounds = array<i64: 2>, scalar_prefetch = 0 : i64, scratch_operands = 0 : i64, tpu.core_type = #tpu.core_type<tc>, window_params = [{transform_indices = @transform_0, window_bounds = array<i64: 1, 64, 27>}, {pipeline_mode = #tpu.pipeline_mode<synchronous>, transform_indices = @transform_1, window_bounds = array<i64: 27, 32>}, {pipeline_mode = #tpu.pipeline_mode<synchronous>, transform_indices = @transform_2, window_bounds = array<i64: 1, 32>}, {pipeline_mode = #tpu.pipeline_mode<synchronous>, transform_indices = @transform_3, window_bounds = array<i64: 1, 32>}, {pipeline_mode = #tpu.pipeline_mode<synchronous>, transform_indices = @transform_4, window_bounds = array<i64: 1, 32>}, {transform_indices = @transform_5, window_bounds = array<i64: 1, 64, 32>}]} {
    %c0 = arith.constant 0 : index
    %c0_0 = arith.constant 0 : index
    %c0_1 = arith.constant 0 : index
    %0 = vector.load %arg1[%c0, %c0_0, %c0_1] : memref<1x64x27xbf16, #tpu.memory_space<vmem>>, vector<1x64x27xbf16>
    %1 = vector.shape_cast %0 : vector<1x64x27xbf16> to vector<64x27xbf16>
    %c0_2 = arith.constant 0 : index
    %c0_3 = arith.constant 0 : index
    %2 = vector.load %arg2[%c0_2, %c0_3] : memref<27x32xbf16, #tpu.memory_space<vmem>>, vector<27x32xbf16>
    %cst = arith.constant dense<0.000000e+00> : vector<64x32xf32>
    %3 = tpu.matmul %1, %2, %cst {dimension_numbers = #tpu.dot_dimension_numbers<[1], [0], [0], [1], [0, 0, 1, 1], [], []>} : vector<64x27xbf16>, vector<27x32xbf16>, vector<64x32xf32> -> vector<64x32xf32>
    %c0_4 = arith.constant 0 : index
    %c0_5 = arith.constant 0 : index
    %4 = vector.load %arg3[%c0_4, %c0_5] : memref<1x32xf32, #tpu.memory_space<vmem>>, vector<1x32xf32>
    %5 = vector.broadcast %4 : vector<1x32xf32> to vector<64x32xf32>
    %6 = arith.addf %3, %5 : vector<64x32xf32>
    %7 = vector.shape_cast %6 : vector<64x32xf32> to vector<1x64x32xf32>
    %cst_6 = arith.constant dense<0.000000e+00> : vector<1xf32>
    %8 = vector.multi_reduction <add>, %7, %cst_6 [1, 2] : vector<1x64x32xf32> to vector<1xf32>
    %9 = vector.shape_cast %8 : vector<1xf32> to vector<1x1x1xf32>
    %10 = vector.extract %9[0, 0, 0] : f32 from vector<1x1x1xf32>
    %cst_7 = arith.constant 2.048000e+03 : f32
    %11 = arith.divf %10, %cst_7 : f32
    %12 = vector.broadcast %11 : f32 to vector<64x32xf32>
    %13 = arith.subf %6, %12 : vector<64x32xf32>
    %14 = arith.mulf %13, %13 : vector<64x32xf32>
    %15 = vector.shape_cast %14 : vector<64x32xf32> to vector<1x64x32xf32>
    %cst_8 = arith.constant dense<0.000000e+00> : vector<1xf32>
    %16 = vector.multi_reduction <add>, %15, %cst_8 [1, 2] : vector<1x64x32xf32> to vector<1xf32>
    %17 = vector.shape_cast %16 : vector<1xf32> to vector<1x1x1xf32>
    %18 = vector.extract %17[0, 0, 0] : f32 from vector<1x1x1xf32>
    %cst_9 = arith.constant 2.047000e+03 : f32
    %19 = arith.divf %18, %cst_9 : f32
    %20 = math.sqrt %19 : f32
    %cst_10 = arith.constant 9.99999974E-6 : f32
    %21 = arith.addf %20, %cst_10 : f32
    %22 = vector.broadcast %21 : f32 to vector<64x32xf32>
    %23 = arith.divf %13, %22 : vector<64x32xf32>
    %c0_11 = arith.constant 0 : index
    %c0_12 = arith.constant 0 : index
    %24 = vector.load %arg4[%c0_11, %c0_12] : memref<1x32xf32, #tpu.memory_space<vmem>>, vector<1x32xf32>
    %25 = vector.broadcast %24 : vector<1x32xf32> to vector<64x32xf32>
    %26 = arith.mulf %23, %25 : vector<64x32xf32>
    %c0_13 = arith.constant 0 : index
    %c0_14 = arith.constant 0 : index
    %27 = vector.load %arg5[%c0_13, %c0_14] : memref<1x32xf32, #tpu.memory_space<vmem>>, vector<1x32xf32>
    %28 = vector.broadcast %27 : vector<1x32xf32> to vector<64x32xf32>
    %29 = arith.addf %26, %28 : vector<64x32xf32>
    %cst_15 = arith.constant 0.000000e+00 : f32
    %30 = vector.broadcast %cst_15 : f32 to vector<64x32xf32>
    %31 = arith.maximumf %29, %30 : vector<64x32xf32>
    %32 = arith.truncf %31 : vector<64x32xf32> to vector<64x32xbf16>
    %c0_16 = arith.constant 0 : index
    %c0_17 = arith.constant 0 : index
    %c0_18 = arith.constant 0 : index
    %33 = vector.load %arg6[%c0_16, %c0_17, %c0_18] : memref<1x64x32xbf16, #tpu.memory_space<vmem>>, vector<1x64x32xbf16>
    %34 = vector.shape_cast %33 : vector<1x64x32xbf16> to vector<64x32xbf16>
    %35 = vector.shape_cast %32 : vector<64x32xbf16> to vector<1x64x32xbf16>
    tpu.vector_store %arg6[%c0_16, %c0_17, %c0_18], %35 {strides = array<i32>} : memref<1x64x32xbf16, #tpu.memory_space<vmem>>, vector<1x64x32xbf16>,
    return
  }
  func.func @transform_0(%arg0: i32) -> (i32, i32, i32) {
    %c0_i32 = arith.constant 0 : i32
    %c0_i32_0 = arith.constant 0 : i32
    %c0_i32_1 = arith.constant 0 : i32
    return %arg0, %c0_i32, %c0_i32_0 : i32, i32, i32
  }
  func.func @transform_1(%arg0: i32) -> (i32, i32) {
    %c0_i32 = arith.constant 0 : i32
    %c0_i32_0 = arith.constant 0 : i32
    %c0_i32_1 = arith.constant 0 : i32
    return %c0_i32, %c0_i32_0 : i32, i32
  }
  func.func @transform_2(%arg0: i32) -> (i32, i32) {
    %c0_i32 = arith.constant 0 : i32
    %c0_i32_0 = arith.constant 0 : i32
    %c0_i32_1 = arith.constant 0 : i32
    return %c0_i32, %c0_i32_0 : i32, i32
  }
  func.func @transform_3(%arg0: i32) -> (i32, i32) {
    %c0_i32 = arith.constant 0 : i32
    %c0_i32_0 = arith.constant 0 : i32
    %c0_i32_1 = arith.constant 0 : i32
    return %c0_i32, %c0_i32_0 : i32, i32
  }
  func.func @transform_4(%arg0: i32) -> (i32, i32) {
    %c0_i32 = arith.constant 0 : i32
    %c0_i32_0 = arith.constant 0 : i32
    %c0_i32_1 = arith.constant 0 : i32
    return %c0_i32, %c0_i32_0 : i32, i32
  }
  func.func @transform_5(%arg0: i32) -> (i32, i32, i32) {
    %c0_i32 = arith.constant 0 : i32
    %c0_i32_0 = arith.constant 0 : i32
    %c0_i32_1 = arith.constant 0 : i32
    return %arg0, %c0_i32, %c0_i32_0 : i32, i32, i32
  }
}

module attributes {stable_mosaic.version = 11 : i64} {
  func.func @_fused_conv_kernel(%arg0: i32, %arg1: memref<1x16x288xbf16, #tpu.memory_space<vmem>>, %arg2: memref<288x32xbf16, #tpu.memory_space<vmem>>, %arg3: memref<1x32xf32, #tpu.memory_space<vmem>>, %arg4: memref<1x32xf32, #tpu.memory_space<vmem>>, %arg5: memref<1x32xf32, #tpu.memory_space<vmem>>, %arg6: memref<1x16x32xbf16, #tpu.memory_space<vmem>>) attributes {dimension_semantics = [#tpu.dimension_semantics<parallel>], iteration_bounds = array<i64: 2>, scalar_prefetch = 0 : i64, scratch_operands = 0 : i64, tpu.core_type = #tpu.core_type<tc>, window_params = [{transform_indices = @transform_0, window_bounds = array<i64: 1, 16, 288>}, {pipeline_mode = #tpu.pipeline_mode<synchronous>, transform_indices = @transform_1, window_bounds = array<i64: 288, 32>}, {pipeline_mode = #tpu.pipeline_mode<synchronous>, transform_indices = @transform_2, window_bounds = array<i64: 1, 32>}, {pipeline_mode = #tpu.pipeline_mode<synchronous>, transform_indices = @transform_3, window_bounds = array<i64: 1, 32>}, {pipeline_mode = #tpu.pipeline_mode<synchronous>, transform_indices = @transform_4, window_bounds = array<i64: 1, 32>}, {transform_indices = @transform_5, window_bounds = array<i64: 1, 16, 32>}]} {
    %c0 = arith.constant 0 : index
    %c0_0 = arith.constant 0 : index
    %c0_1 = arith.constant 0 : index
    %0 = vector.load %arg1[%c0, %c0_0, %c0_1] : memref<1x16x288xbf16, #tpu.memory_space<vmem>>, vector<1x16x288xbf16>
    %1 = vector.shape_cast %0 : vector<1x16x288xbf16> to vector<16x288xbf16>
    %c0_2 = arith.constant 0 : index
    %c0_3 = arith.constant 0 : index
    %2 = vector.load %arg2[%c0_2, %c0_3] : memref<288x32xbf16, #tpu.memory_space<vmem>>, vector<288x32xbf16>
    %cst = arith.constant dense<0.000000e+00> : vector<16x32xf32>
    %3 = tpu.matmul %1, %2, %cst {dimension_numbers = #tpu.dot_dimension_numbers<[1], [0], [0], [1], [0, 0, 1, 1], [], []>} : vector<16x288xbf16>, vector<288x32xbf16>, vector<16x32xf32> -> vector<16x32xf32>
    %c0_4 = arith.constant 0 : index
    %c0_5 = arith.constant 0 : index
    %4 = vector.load %arg3[%c0_4, %c0_5] : memref<1x32xf32, #tpu.memory_space<vmem>>, vector<1x32xf32>
    %5 = vector.broadcast %4 : vector<1x32xf32> to vector<16x32xf32>
    %6 = arith.addf %3, %5 : vector<16x32xf32>
    %7 = vector.shape_cast %6 : vector<16x32xf32> to vector<1x16x32xf32>
    %cst_6 = arith.constant dense<0.000000e+00> : vector<1xf32>
    %8 = vector.multi_reduction <add>, %7, %cst_6 [1, 2] : vector<1x16x32xf32> to vector<1xf32>
    %9 = vector.shape_cast %8 : vector<1xf32> to vector<1x1x1xf32>
    %10 = vector.extract %9[0, 0, 0] : f32 from vector<1x1x1xf32>
    %cst_7 = arith.constant 5.120000e+02 : f32
    %11 = arith.divf %10, %cst_7 : f32
    %12 = vector.broadcast %11 : f32 to vector<16x32xf32>
    %13 = arith.subf %6, %12 : vector<16x32xf32>
    %14 = arith.mulf %13, %13 : vector<16x32xf32>
    %15 = vector.shape_cast %14 : vector<16x32xf32> to vector<1x16x32xf32>
    %cst_8 = arith.constant dense<0.000000e+00> : vector<1xf32>
    %16 = vector.multi_reduction <add>, %15, %cst_8 [1, 2] : vector<1x16x32xf32> to vector<1xf32>
    %17 = vector.shape_cast %16 : vector<1xf32> to vector<1x1x1xf32>
    %18 = vector.extract %17[0, 0, 0] : f32 from vector<1x1x1xf32>
    %cst_9 = arith.constant 5.110000e+02 : f32
    %19 = arith.divf %18, %cst_9 : f32
    %20 = math.sqrt %19 : f32
    %cst_10 = arith.constant 9.99999974E-6 : f32
    %21 = arith.addf %20, %cst_10 : f32
    %22 = vector.broadcast %21 : f32 to vector<16x32xf32>
    %23 = arith.divf %13, %22 : vector<16x32xf32>
    %c0_11 = arith.constant 0 : index
    %c0_12 = arith.constant 0 : index
    %24 = vector.load %arg4[%c0_11, %c0_12] : memref<1x32xf32, #tpu.memory_space<vmem>>, vector<1x32xf32>
    %25 = vector.broadcast %24 : vector<1x32xf32> to vector<16x32xf32>
    %26 = arith.mulf %23, %25 : vector<16x32xf32>
    %c0_13 = arith.constant 0 : index
    %c0_14 = arith.constant 0 : index
    %27 = vector.load %arg5[%c0_13, %c0_14] : memref<1x32xf32, #tpu.memory_space<vmem>>, vector<1x32xf32>
    %28 = vector.broadcast %27 : vector<1x32xf32> to vector<16x32xf32>
    %29 = arith.addf %26, %28 : vector<16x32xf32>
    %cst_15 = arith.constant 0.000000e+00 : f32
    %30 = vector.broadcast %cst_15 : f32 to vector<16x32xf32>
    %31 = arith.maximumf %29, %30 : vector<16x32xf32>
    %32 = arith.truncf %31 : vector<16x32xf32> to vector<16x32xbf16>
    %c0_16 = arith.constant 0 : index
    %c0_17 = arith.constant 0 : index
    %c0_18 = arith.constant 0 : index
    %33 = vector.load %arg6[%c0_16, %c0_17, %c0_18] : memref<1x16x32xbf16, #tpu.memory_space<vmem>>, vector<1x16x32xbf16>
    %34 = vector.shape_cast %33 : vector<1x16x32xbf16> to vector<16x32xbf16>
    %35 = vector.shape_cast %32 : vector<16x32xbf16> to vector<1x16x32xbf16>
    tpu.vector_store %arg6[%c0_16, %c0_17, %c0_18], %35 {strides = array<i32>} : memref<1x16x32xbf16, #tpu.memory_space<vmem>>, vector<1x16x32xbf16>,
    return
  }
  func.func @transform_0(%arg0: i32) -> (i32, i32, i32) {
    %c0_i32 = arith.constant 0 : i32
    %c0_i32_0 = arith.constant 0 : i32
    %c0_i32_1 = arith.constant 0 : i32
    return %arg0, %c0_i32, %c0_i32_0 : i32, i32, i32
  }
  func.func @transform_1(%arg0: i32) -> (i32, i32) {
    %c0_i32 = arith.constant 0 : i32
    %c0_i32_0 = arith.constant 0 : i32
    %c0_i32_1 = arith.constant 0 : i32
    return %c0_i32, %c0_i32_0 : i32, i32
  }
  func.func @transform_2(%arg0: i32) -> (i32, i32) {
    %c0_i32 = arith.constant 0 : i32
    %c0_i32_0 = arith.constant 0 : i32
    %c0_i32_1 = arith.constant 0 : i32
    return %c0_i32, %c0_i32_0 : i32, i32
  }
  func.func @transform_3(%arg0: i32) -> (i32, i32) {
    %c0_i32 = arith.constant 0 : i32
    %c0_i32_0 = arith.constant 0 : i32
    %c0_i32_1 = arith.constant 0 : i32
    return %c0_i32, %c0_i32_0 : i32, i32
  }
  func.func @transform_4(%arg0: i32) -> (i32, i32) {
    %c0_i32 = arith.constant 0 : i32
    %c0_i32_0 = arith.constant 0 : i32
    %c0_i32_1 = arith.constant 0 : i32
    return %c0_i32, %c0_i32_0 : i32, i32
  }
  func.func @transform_5(%arg0: i32) -> (i32, i32, i32) {
    %c0_i32 = arith.constant 0 : i32
    %c0_i32_0 = arith.constant 0 : i32
    %c0_i32_1 = arith.constant 0 : i32
    return %arg0, %c0_i32, %c0_i32_0 : i32, i32, i32
  }
}

module attributes {stable_mosaic.version = 11 : i64} {
  func.func @_fused_conv_kernel(%arg0: i32, %arg1: memref<1x16x288xbf16, #tpu.memory_space<vmem>>, %arg2: memref<288x32xbf16, #tpu.memory_space<vmem>>, %arg3: memref<1x32xf32, #tpu.memory_space<vmem>>, %arg4: memref<1x1x32xf32, #tpu.memory_space<vmem>>, %arg5: memref<1x1x32xf32, #tpu.memory_space<vmem>>, %arg6: memref<1x1x32xf32, #tpu.memory_space<vmem>>, %arg7: memref<1x16x32xbf16, #tpu.memory_space<vmem>>) attributes {dimension_semantics = [#tpu.dimension_semantics<parallel>], iteration_bounds = array<i64: 2>, scalar_prefetch = 0 : i64, scratch_operands = 0 : i64, tpu.core_type = #tpu.core_type<tc>, window_params = [{transform_indices = @transform_0, window_bounds = array<i64: 1, 16, 288>}, {pipeline_mode = #tpu.pipeline_mode<synchronous>, transform_indices = @transform_1, window_bounds = array<i64: 288, 32>}, {pipeline_mode = #tpu.pipeline_mode<synchronous>, transform_indices = @transform_2, window_bounds = array<i64: 1, 32>}, {transform_indices = @transform_3, window_bounds = array<i64: 1, 1, 32>}, {transform_indices = @transform_4, window_bounds = array<i64: 1, 1, 32>}, {transform_indices = @transform_5, window_bounds = array<i64: 1, 1, 32>}, {transform_indices = @transform_6, window_bounds = array<i64: 1, 16, 32>}]} {
    %c0 = arith.constant 0 : index
    %c0_0 = arith.constant 0 : index
    %c0_1 = arith.constant 0 : index
    %0 = vector.load %arg1[%c0, %c0_0, %c0_1] : memref<1x16x288xbf16, #tpu.memory_space<vmem>>, vector<1x16x288xbf16>
    %1 = vector.shape_cast %0 : vector<1x16x288xbf16> to vector<16x288xbf16>
    %c0_2 = arith.constant 0 : index
    %c0_3 = arith.constant 0 : index
    %2 = vector.load %arg2[%c0_2, %c0_3] : memref<288x32xbf16, #tpu.memory_space<vmem>>, vector<288x32xbf16>
    %cst = arith.constant dense<0.000000e+00> : vector<16x32xf32>
    %3 = tpu.matmul %1, %2, %cst {dimension_numbers = #tpu.dot_dimension_numbers<[1], [0], [0], [1], [0, 0, 1, 1], [], []>} : vector<16x288xbf16>, vector<288x32xbf16>, vector<16x32xf32> -> vector<16x32xf32>
    %c0_4 = arith.constant 0 : index
    %c0_5 = arith.constant 0 : index
    %4 = vector.load %arg3[%c0_4, %c0_5] : memref<1x32xf32, #tpu.memory_space<vmem>>, vector<1x32xf32>
    %5 = vector.broadcast %4 : vector<1x32xf32> to vector<16x32xf32>
    %6 = arith.addf %3, %5 : vector<16x32xf32>
    %cst_6 = arith.constant dense<0.000000e+00> : vector<32xf32>
    %7 = vector.multi_reduction <add>, %6, %cst_6 [0] : vector<16x32xf32> to vector<32xf32>
    %8 = vector.shape_cast %7 : vector<32xf32> to vector<1x32xf32>
    %cst_7 = arith.constant 1.600000e+01 : f32
    %9 = vector.broadcast %cst_7 : f32 to vector<1x32xf32>
    %10 = arith.divf %8, %9 : vector<1x32xf32>
    %11 = vector.broadcast %10 : vector<1x32xf32> to vector<16x32xf32>
    %12 = arith.subf %6, %11 : vector<16x32xf32>
    %13 = arith.mulf %12, %12 : vector<16x32xf32>
    %cst_8 = arith.constant dense<0.000000e+00> : vector<32xf32>
    %14 = vector.multi_reduction <add>, %13, %cst_8 [0] : vector<16x32xf32> to vector<32xf32>
    %15 = vector.shape_cast %14 : vector<32xf32> to vector<1x32xf32>
    %cst_9 = arith.constant 1.600000e+01 : f32
    %16 = vector.broadcast %cst_9 : f32 to vector<1x32xf32>
    %17 = arith.divf %15, %16 : vector<1x32xf32>
    %cst_10 = arith.constant 9.99999974E-6 : f32
    %18 = vector.broadcast %cst_10 : f32 to vector<1x32xf32>
    %19 = arith.addf %17, %18 : vector<1x32xf32>
    %20 = math.rsqrt %19 : vector<1x32xf32>
    %21 = vector.broadcast %20 : vector<1x32xf32> to vector<16x32xf32>
    %22 = arith.mulf %12, %21 : vector<16x32xf32>
    %23 = vector.shape_cast %6 : vector<16x32xf32> to vector<1x16x32xf32>
    %cst_11 = arith.constant dense<0.000000e+00> : vector<1xf32>
    %24 = vector.multi_reduction <add>, %23, %cst_11 [1, 2] : vector<1x16x32xf32> to vector<1xf32>
    %25 = vector.shape_cast %24 : vector<1xf32> to vector<1x1x1xf32>
    %26 = vector.extract %25[0, 0, 0] : f32 from vector<1x1x1xf32>
    %cst_12 = arith.constant 5.120000e+02 : f32
    %27 = arith.divf %26, %cst_12 : f32
    %28 = vector.broadcast %27 : f32 to vector<16x32xf32>
    %29 = arith.subf %6, %28 : vector<16x32xf32>
    %30 = arith.mulf %29, %29 : vector<16x32xf32>
    %31 = vector.shape_cast %30 : vector<16x32xf32> to vector<1x16x32xf32>
    %cst_13 = arith.constant dense<0.000000e+00> : vector<1xf32>
    %32 = vector.multi_reduction <add>, %31, %cst_13 [1, 2] : vector<1x16x32xf32> to vector<1xf32>
    %33 = vector.shape_cast %32 : vector<1xf32> to vector<1x1x1xf32>
    %34 = vector.extract %33[0, 0, 0] : f32 from vector<1x1x1xf32>
    %cst_14 = arith.constant 5.120000e+02 : f32
    %35 = arith.divf %34, %cst_14 : f32
    %cst_15 = arith.constant 9.99999974E-6 : f32
    %36 = arith.addf %35, %cst_15 : f32
    %37 = math.rsqrt %36 : f32
    %38 = vector.broadcast %37 : f32 to vector<16x32xf32>
    %39 = arith.mulf %29, %38 : vector<16x32xf32>
    %c0_16 = arith.constant 0 : index
    %c0_17 = arith.constant 0 : index
    %c0_18 = arith.constant 0 : index
    %40 = vector.load %arg6[%c0_16, %c0_17, %c0_18] : memref<1x1x32xf32, #tpu.memory_space<vmem>>, vector<1x1x32xf32>
    %41 = vector.shape_cast %40 : vector<1x1x32xf32> to vector<1x32xf32>
    %42 = arith.negf %41 : vector<1x32xf32>
    %43 = math.exp %42 : vector<1x32xf32>
    %cst_19 = arith.constant 1.000000e+00 : f32
    %44 = vector.broadcast %cst_19 : f32 to vector<1x32xf32>
    %45 = arith.addf %44, %43 : vector<1x32xf32>
    %46 = arith.divf %44, %45 : vector<1x32xf32>
    %47 = vector.broadcast %46 : vector<1x32xf32> to vector<16x32xf32>
    %48 = arith.mulf %47, %22 : vector<16x32xf32>
    %cst_20 = arith.constant 1.000000e+00 : f32
    %49 = vector.broadcast %cst_20 : f32 to vector<1x32xf32>
    %50 = arith.subf %49, %46 : vector<1x32xf32>
    %51 = vector.broadcast %50 : vector<1x32xf32> to vector<16x32xf32>
    %52 = arith.mulf %51, %39 : vector<16x32xf32>
    %53 = arith.addf %48, %52 : vector<16x32xf32>
    %c0_21 = arith.constant 0 : index
    %c0_22 = arith.constant 0 : index
    %c0_23 = arith.constant 0 : index
    %54 = vector.load %arg4[%c0_21, %c0_22, %c0_23] : memref<1x1x32xf32, #tpu.memory_space<vmem>>, vector<1x1x32xf32>
    %55 = vector.shape_cast %54 : vector<1x1x32xf32> to vector<1x32xf32>
    %56 = vector.broadcast %55 : vector<1x32xf32> to vector<16x32xf32>
    %57 = arith.mulf %53, %56 : vector<16x32xf32>
    %c0_24 = arith.constant 0 : index
    %c0_25 = arith.constant 0 : index
    %c0_26 = arith.constant 0 : index
    %58 = vector.load %arg5[%c0_24, %c0_25, %c0_26] : memref<1x1x32xf32, #tpu.memory_space<vmem>>, vector<1x1x32xf32>
    %59 = vector.shape_cast %58 : vector<1x1x32xf32> to vector<1x32xf32>
    %60 = vector.broadcast %59 : vector<1x32xf32> to vector<16x32xf32>
    %61 = arith.addf %57, %60 : vector<16x32xf32>
    %cst_27 = arith.constant 0.000000e+00 : f32
    %62 = vector.broadcast %cst_27 : f32 to vector<16x32xf32>
    %63 = arith.maximumf %61, %62 : vector<16x32xf32>
    %64 = arith.truncf %63 : vector<16x32xf32> to vector<16x32xbf16>
    %c0_28 = arith.constant 0 : index
    %c0_29 = arith.constant 0 : index
    %c0_30 = arith.constant 0 : index
    %65 = vector.load %arg7[%c0_28, %c0_29, %c0_30] : memref<1x16x32xbf16, #tpu.memory_space<vmem>>, vector<1x16x32xbf16>
    %66 = vector.shape_cast %65 : vector<1x16x32xbf16> to vector<16x32xbf16>
    %67 = vector.shape_cast %64 : vector<16x32xbf16> to vector<1x16x32xbf16>
    tpu.vector_store %arg7[%c0_28, %c0_29, %c0_30], %67 {strides = array<i32>} : memref<1x16x32xbf16, #tpu.memory_space<vmem>>, vector<1x16x32xbf16>,
    return
  }
  func.func @transform_0(%arg0: i32) -> (i32, i32, i32) {
    %c0_i32 = arith.constant 0 : i32
    %c0_i32_0 = arith.constant 0 : i32
    %c0_i32_1 = arith.constant 0 : i32
    return %arg0, %c0_i32, %c0_i32_0 : i32, i32, i32
  }
  func.func @transform_1(%arg0: i32) -> (i32, i32) {
    %c0_i32 = arith.constant 0 : i32
    %c0_i32_0 = arith.constant 0 : i32
    %c0_i32_1 = arith.constant 0 : i32
    return %c0_i32, %c0_i32_0 : i32, i32
  }
  func.func @transform_2(%arg0: i32) -> (i32, i32) {
    %c0_i32 = arith.constant 0 : i32
    %c0_i32_0 = arith.constant 0 : i32
    %c0_i32_1 = arith.constant 0 : i32
    return %c0_i32, %c0_i32_0 : i32, i32
  }
  func.func @transform_3(%arg0: i32) -> (i32, i32, i32) {
    %c0_i32 = arith.constant 0 : i32
    %c0_i32_0 = arith.constant 0 : i32
    %c0_i32_1 = arith.constant 0 : i32
    return %arg0, %c0_i32, %c0_i32_0 : i32, i32, i32
  }
  func.func @transform_4(%arg0: i32) -> (i32, i32, i32) {
    %c0_i32 = arith.constant 0 : i32
    %c0_i32_0 = arith.constant 0 : i32
    %c0_i32_1 = arith.constant 0 : i32
    return %arg0, %c0_i32, %c0_i32_0 : i32, i32, i32
  }
  func.func @transform_5(%arg0: i32) -> (i32, i32, i32) {
    %c0_i32 = arith.constant 0 : i32
    %c0_i32_0 = arith.constant 0 : i32
    %c0_i32_1 = arith.constant 0 : i32
    return %arg0, %c0_i32, %c0_i32_0 : i32, i32, i32
  }
  func.func @transform_6(%arg0: i32) -> (i32, i32, i32) {
    %c0_i32 = arith.constant 0 : i32
    %c0_i32_0 = arith.constant 0 : i32
    %c0_i32_1 = arith.constant 0 : i32
    return %arg0, %c0_i32, %c0_i32_0 : i32, i32, i32
  }
}

module attributes {stable_mosaic.version = 11 : i64} {
  func.func @_fused_conv_kernel(%arg0: i32, %arg1: memref<1x16x288xbf16, #tpu.memory_space<vmem>>, %arg2: memref<288x32xbf16, #tpu.memory_space<vmem>>, %arg3: memref<1x32xf32, #tpu.memory_space<vmem>>, %arg4: memref<1x1x32xf32, #tpu.memory_space<vmem>>, %arg5: memref<1x1x32xf32, #tpu.memory_space<vmem>>, %arg6: memref<1x1x32xf32, #tpu.memory_space<vmem>>, %arg7: memref<1x16x32xbf16, #tpu.memory_space<vmem>>, %arg8: memref<1x16x32xbf16, #tpu.memory_space<vmem>>) attributes {dimension_semantics = [#tpu.dimension_semantics<parallel>], iteration_bounds = array<i64: 2>, scalar_prefetch = 0 : i64, scratch_operands = 0 : i64, tpu.core_type = #tpu.core_type<tc>, window_params = [{transform_indices = @transform_0, window_bounds = array<i64: 1, 16, 288>}, {pipeline_mode = #tpu.pipeline_mode<synchronous>, transform_indices = @transform_1, window_bounds = array<i64: 288, 32>}, {pipeline_mode = #tpu.pipeline_mode<synchronous>, transform_indices = @transform_2, window_bounds = array<i64: 1, 32>}, {transform_indices = @transform_3, window_bounds = array<i64: 1, 1, 32>}, {transform_indices = @transform_4, window_bounds = array<i64: 1, 1, 32>}, {transform_indices = @transform_5, window_bounds = array<i64: 1, 1, 32>}, {transform_indices = @transform_6, window_bounds = array<i64: 1, 16, 32>}, {transform_indices = @transform_7, window_bounds = array<i64: 1, 16, 32>}]} {
    %c0 = arith.constant 0 : index
    %c0_0 = arith.constant 0 : index
    %c0_1 = arith.constant 0 : index
    %0 = vector.load %arg1[%c0, %c0_0, %c0_1] : memref<1x16x288xbf16, #tpu.memory_space<vmem>>, vector<1x16x288xbf16>
    %1 = vector.shape_cast %0 : vector<1x16x288xbf16> to vector<16x288xbf16>
    %c0_2 = arith.constant 0 : index
    %c0_3 = arith.constant 0 : index
    %2 = vector.load %arg2[%c0_2, %c0_3] : memref<288x32xbf16, #tpu.memory_space<vmem>>, vector<288x32xbf16>
    %cst = arith.constant dense<0.000000e+00> : vector<16x32xf32>
    %3 = tpu.matmul %1, %2, %cst {dimension_numbers = #tpu.dot_dimension_numbers<[1], [0], [0], [1], [0, 0, 1, 1], [], []>} : vector<16x288xbf16>, vector<288x32xbf16>, vector<16x32xf32> -> vector<16x32xf32>
    %c0_4 = arith.constant 0 : index
    %c0_5 = arith.constant 0 : index
    %4 = vector.load %arg3[%c0_4, %c0_5] : memref<1x32xf32, #tpu.memory_space<vmem>>, vector<1x32xf32>
    %5 = vector.broadcast %4 : vector<1x32xf32> to vector<16x32xf32>
    %6 = arith.addf %3, %5 : vector<16x32xf32>
    %cst_6 = arith.constant dense<0.000000e+00> : vector<32xf32>
    %7 = vector.multi_reduction <add>, %6, %cst_6 [0] : vector<16x32xf32> to vector<32xf32>
    %8 = vector.shape_cast %7 : vector<32xf32> to vector<1x32xf32>
    %cst_7 = arith.constant 1.600000e+01 : f32
    %9 = vector.broadcast %cst_7 : f32 to vector<1x32xf32>
    %10 = arith.divf %8, %9 : vector<1x32xf32>
    %11 = vector.broadcast %10 : vector<1x32xf32> to vector<16x32xf32>
    %12 = arith.subf %6, %11 : vector<16x32xf32>
    %13 = arith.mulf %12, %12 : vector<16x32xf32>
    %cst_8 = arith.constant dense<0.000000e+00> : vector<32xf32>
    %14 = vector.multi_reduction <add>, %13, %cst_8 [0] : vector<16x32xf32> to vector<32xf32>
    %15 = vector.shape_cast %14 : vector<32xf32> to vector<1x32xf32>
    %cst_9 = arith.constant 1.600000e+01 : f32
    %16 = vector.broadcast %cst_9 : f32 to vector<1x32xf32>
    %17 = arith.divf %15, %16 : vector<1x32xf32>
    %cst_10 = arith.constant 9.99999974E-6 : f32
    %18 = vector.broadcast %cst_10 : f32 to vector<1x32xf32>
    %19 = arith.addf %17, %18 : vector<1x32xf32>
    %20 = math.rsqrt %19 : vector<1x32xf32>
    %21 = vector.broadcast %20 : vector<1x32xf32> to vector<16x32xf32>
    %22 = arith.mulf %12, %21 : vector<16x32xf32>
    %23 = vector.shape_cast %6 : vector<16x32xf32> to vector<1x16x32xf32>
    %cst_11 = arith.constant dense<0.000000e+00> : vector<1xf32>
    %24 = vector.multi_reduction <add>, %23, %cst_11 [1, 2] : vector<1x16x32xf32> to vector<1xf32>
    %25 = vector.shape_cast %24 : vector<1xf32> to vector<1x1x1xf32>
    %26 = vector.extract %25[0, 0, 0] : f32 from vector<1x1x1xf32>
    %cst_12 = arith.constant 5.120000e+02 : f32
    %27 = arith.divf %26, %cst_12 : f32
    %28 = vector.broadcast %27 : f32 to vector<16x32xf32>
    %29 = arith.subf %6, %28 : vector<16x32xf32>
    %30 = arith.mulf %29, %29 : vector<16x32xf32>
    %31 = vector.shape_cast %30 : vector<16x32xf32> to vector<1x16x32xf32>
    %cst_13 = arith.constant dense<0.000000e+00> : vector<1xf32>
    %32 = vector.multi_reduction <add>, %31, %cst_13 [1, 2] : vector<1x16x32xf32> to vector<1xf32>
    %33 = vector.shape_cast %32 : vector<1xf32> to vector<1x1x1xf32>
    %34 = vector.extract %33[0, 0, 0] : f32 from vector<1x1x1xf32>
    %cst_14 = arith.constant 5.120000e+02 : f32
    %35 = arith.divf %34, %cst_14 : f32
    %cst_15 = arith.constant 9.99999974E-6 : f32
    %36 = arith.addf %35, %cst_15 : f32
    %37 = math.rsqrt %36 : f32
    %38 = vector.broadcast %37 : f32 to vector<16x32xf32>
    %39 = arith.mulf %29, %38 : vector<16x32xf32>
    %c0_16 = arith.constant 0 : index
    %c0_17 = arith.constant 0 : index
    %c0_18 = arith.constant 0 : index
    %40 = vector.load %arg6[%c0_16, %c0_17, %c0_18] : memref<1x1x32xf32, #tpu.memory_space<vmem>>, vector<1x1x32xf32>
    %41 = vector.shape_cast %40 : vector<1x1x32xf32> to vector<1x32xf32>
    %42 = arith.negf %41 : vector<1x32xf32>
    %43 = math.exp %42 : vector<1x32xf32>
    %cst_19 = arith.constant 1.000000e+00 : f32
    %44 = vector.broadcast %cst_19 : f32 to vector<1x32xf32>
    %45 = arith.addf %44, %43 : vector<1x32xf32>
    %46 = arith.divf %44, %45 : vector<1x32xf32>
    %47 = vector.broadcast %46 : vector<1x32xf32> to vector<16x32xf32>
    %48 = arith.mulf %47, %22 : vector<16x32xf32>
    %cst_20 = arith.constant 1.000000e+00 : f32
    %49 = vector.broadcast %cst_20 : f32 to vector<1x32xf32>
    %50 = arith.subf %49, %46 : vector<1x32xf32>
    %51 = vector.broadcast %50 : vector<1x32xf32> to vector<16x32xf32>
    %52 = arith.mulf %51, %39 : vector<16x32xf32>
    %53 = arith.addf %48, %52 : vector<16x32xf32>
    %c0_21 = arith.constant 0 : index
    %c0_22 = arith.constant 0 : index
    %c0_23 = arith.constant 0 : index
    %54 = vector.load %arg4[%c0_21, %c0_22, %c0_23] : memref<1x1x32xf32, #tpu.memory_space<vmem>>, vector<1x1x32xf32>
    %55 = vector.shape_cast %54 : vector<1x1x32xf32> to vector<1x32xf32>
    %56 = vector.broadcast %55 : vector<1x32xf32> to vector<16x32xf32>
    %57 = arith.mulf %53, %56 : vector<16x32xf32>
    %c0_24 = arith.constant 0 : index
    %c0_25 = arith.constant 0 : index
    %c0_26 = arith.constant 0 : index
    %58 = vector.load %arg5[%c0_24, %c0_25, %c0_26] : memref<1x1x32xf32, #tpu.memory_space<vmem>>, vector<1x1x32xf32>
    %59 = vector.shape_cast %58 : vector<1x1x32xf32> to vector<1x32xf32>
    %60 = vector.broadcast %59 : vector<1x32xf32> to vector<16x32xf32>
    %61 = arith.addf %57, %60 : vector<16x32xf32>
    %c0_27 = arith.constant 0 : index
    %c0_28 = arith.constant 0 : index
    %c0_29 = arith.constant 0 : index
    %62 = vector.load %arg7[%c0_27, %c0_28, %c0_29] : memref<1x16x32xbf16, #tpu.memory_space<vmem>>, vector<1x16x32xbf16>
    %63 = vector.shape_cast %62 : vector<1x16x32xbf16> to vector<16x32xbf16>
    %64 = arith.extf %63 : vector<16x32xbf16> to vector<16x32xf32>
    %65 = arith.addf %61, %64 : vector<16x32xf32>
    %66 = arith.truncf %65 : vector<16x32xf32> to vector<16x32xbf16>
    %c0_30 = arith.constant 0 : index
    %c0_31 = arith.constant 0 : index
    %c0_32 = arith.constant 0 : index
    %67 = vector.load %arg8[%c0_30, %c0_31, %c0_32] : memref<1x16x32xbf16, #tpu.memory_space<vmem>>, vector<1x16x32xbf16>
    %68 = vector.shape_cast %67 : vector<1x16x32xbf16> to vector<16x32xbf16>
    %69 = vector.shape_cast %66 : vector<16x32xbf16> to vector<1x16x32xbf16>
    tpu.vector_store %arg8[%c0_30, %c0_31, %c0_32], %69 {strides = array<i32>} : memref<1x16x32xbf16, #tpu.memory_space<vmem>>, vector<1x16x32xbf16>,
    return
  }
  func.func @transform_0(%arg0: i32) -> (i32, i32, i32) {
    %c0_i32 = arith.constant 0 : i32
    %c0_i32_0 = arith.constant 0 : i32
    %c0_i32_1 = arith.constant 0 : i32
    return %arg0, %c0_i32, %c0_i32_0 : i32, i32, i32
  }
  func.func @transform_1(%arg0: i32) -> (i32, i32) {
    %c0_i32 = arith.constant 0 : i32
    %c0_i32_0 = arith.constant 0 : i32
    %c0_i32_1 = arith.constant 0 : i32
    return %c0_i32, %c0_i32_0 : i32, i32
  }
  func.func @transform_2(%arg0: i32) -> (i32, i32) {
    %c0_i32 = arith.constant 0 : i32
    %c0_i32_0 = arith.constant 0 : i32
    %c0_i32_1 = arith.constant 0 : i32
    return %c0_i32, %c0_i32_0 : i32, i32
  }
  func.func @transform_3(%arg0: i32) -> (i32, i32, i32) {
    %c0_i32 = arith.constant 0 : i32
    %c0_i32_0 = arith.constant 0 : i32
    %c0_i32_1 = arith.constant 0 : i32
    return %arg0, %c0_i32, %c0_i32_0 : i32, i32, i32
  }
  func.func @transform_4(%arg0: i32) -> (i32, i32, i32) {
    %c0_i32 = arith.constant 0 : i32
    %c0_i32_0 = arith.constant 0 : i32
    %c0_i32_1 = arith.constant 0 : i32
    return %arg0, %c0_i32, %c0_i32_0 : i32, i32, i32
  }
  func.func @transform_5(%arg0: i32) -> (i32, i32, i32) {
    %c0_i32 = arith.constant 0 : i32
    %c0_i32_0 = arith.constant 0 : i32
    %c0_i32_1 = arith.constant 0 : i32
    return %arg0, %c0_i32, %c0_i32_0 : i32, i32, i32
  }
  func.func @transform_6(%arg0: i32) -> (i32, i32, i32) {
    %c0_i32 = arith.constant 0 : i32
    %c0_i32_0 = arith.constant 0 : i32
    %c0_i32_1 = arith.constant 0 : i32
    return %arg0, %c0_i32, %c0_i32_0 : i32, i32, i32
  }
  func.func @transform_7(%arg0: i32) -> (i32, i32, i32) {
    %c0_i32 = arith.constant 0 : i32
    %c0_i32_0 = arith.constant 0 : i32
    %c0_i32_1 = arith.constant 0 : i32
    return %arg0, %c0_i32, %c0_i32_0 : i32, i32, i32
  }
}

module attributes {stable_mosaic.version = 11 : i64} {
  func.func @_fused_conv_kernel(%arg0: i32, %arg1: memref<1x64x800xbf16, #tpu.memory_space<vmem>>, %arg2: memref<800x16xbf16, #tpu.memory_space<vmem>>, %arg3: memref<1x16xf32, #tpu.memory_space<vmem>>, %arg4: memref<1x16xf32, #tpu.memory_space<vmem>>, %arg5: memref<1x16xf32, #tpu.memory_space<vmem>>, %arg6: memref<1x64x16xbf16, #tpu.memory_space<vmem>>) attributes {dimension_semantics = [#tpu.dimension_semantics<parallel>], iteration_bounds = array<i64: 2>, scalar_prefetch = 0 : i64, scratch_operands = 0 : i64, tpu.core_type = #tpu.core_type<tc>, window_params = [{transform_indices = @transform_0, window_bounds = array<i64: 1, 64, 800>}, {pipeline_mode = #tpu.pipeline_mode<synchronous>, transform_indices = @transform_1, window_bounds = array<i64: 800, 16>}, {pipeline_mode = #tpu.pipeline_mode<synchronous>, transform_indices = @transform_2, window_bounds = array<i64: 1, 16>}, {pipeline_mode = #tpu.pipeline_mode<synchronous>, transform_indices = @transform_3, window_bounds = array<i64: 1, 16>}, {pipeline_mode = #tpu.pipeline_mode<synchronous>, transform_indices = @transform_4, window_bounds = array<i64: 1, 16>}, {transform_indices = @transform_5, window_bounds = array<i64: 1, 64, 16>}]} {
    %c0 = arith.constant 0 : index
    %c0_0 = arith.constant 0 : index
    %c0_1 = arith.constant 0 : index
    %0 = vector.load %arg1[%c0, %c0_0, %c0_1] : memref<1x64x800xbf16, #tpu.memory_space<vmem>>, vector<1x64x800xbf16>
    %1 = vector.shape_cast %0 : vector<1x64x800xbf16> to vector<64x800xbf16>
    %c0_2 = arith.constant 0 : index
    %c0_3 = arith.constant 0 : index
    %2 = vector.load %arg2[%c0_2, %c0_3] : memref<800x16xbf16, #tpu.memory_space<vmem>>, vector<800x16xbf16>
    %cst = arith.constant dense<0.000000e+00> : vector<64x16xf32>
    %3 = tpu.matmul %1, %2, %cst {dimension_numbers = #tpu.dot_dimension_numbers<[1], [0], [0], [1], [0, 0, 1, 1], [], []>} : vector<64x800xbf16>, vector<800x16xbf16>, vector<64x16xf32> -> vector<64x16xf32>
    %c0_4 = arith.constant 0 : index
    %c0_5 = arith.constant 0 : index
    %4 = vector.load %arg3[%c0_4, %c0_5] : memref<1x16xf32, #tpu.memory_space<vmem>>, vector<1x16xf32>
    %5 = vector.broadcast %4 : vector<1x16xf32> to vector<64x16xf32>
    %6 = arith.addf %3, %5 : vector<64x16xf32>
    %7 = vector.shape_cast %6 : vector<64x16xf32> to vector<1x64x16xf32>
    %cst_6 = arith.constant dense<0.000000e+00> : vector<1xf32>
    %8 = vector.multi_reduction <add>, %7, %cst_6 [1, 2] : vector<1x64x16xf32> to vector<1xf32>
    %9 = vector.shape_cast %8 : vector<1xf32> to vector<1x1x1xf32>
    %10 = vector.extract %9[0, 0, 0] : f32 from vector<1x1x1xf32>
    %cst_7 = arith.constant 1.024000e+03 : f32
    %11 = arith.divf %10, %cst_7 : f32
    %12 = vector.broadcast %11 : f32 to vector<64x16xf32>
    %13 = arith.subf %6, %12 : vector<64x16xf32>
    %14 = arith.mulf %13, %13 : vector<64x16xf32>
    %15 = vector.shape_cast %14 : vector<64x16xf32> to vector<1x64x16xf32>
    %cst_8 = arith.constant dense<0.000000e+00> : vector<1xf32>
    %16 = vector.multi_reduction <add>, %15, %cst_8 [1, 2] : vector<1x64x16xf32> to vector<1xf32>
    %17 = vector.shape_cast %16 : vector<1xf32> to vector<1x1x1xf32>
    %18 = vector.extract %17[0, 0, 0] : f32 from vector<1x1x1xf32>
    %cst_9 = arith.constant 1.023000e+03 : f32
    %19 = arith.divf %18, %cst_9 : f32
    %20 = math.sqrt %19 : f32
    %cst_10 = arith.constant 9.99999974E-6 : f32
    %21 = arith.addf %20, %cst_10 : f32
    %22 = vector.broadcast %21 : f32 to vector<64x16xf32>
    %23 = arith.divf %13, %22 : vector<64x16xf32>
    %c0_11 = arith.constant 0 : index
    %c0_12 = arith.constant 0 : index
    %24 = vector.load %arg4[%c0_11, %c0_12] : memref<1x16xf32, #tpu.memory_space<vmem>>, vector<1x16xf32>
    %25 = vector.broadcast %24 : vector<1x16xf32> to vector<64x16xf32>
    %26 = arith.mulf %23, %25 : vector<64x16xf32>
    %c0_13 = arith.constant 0 : index
    %c0_14 = arith.constant 0 : index
    %27 = vector.load %arg5[%c0_13, %c0_14] : memref<1x16xf32, #tpu.memory_space<vmem>>, vector<1x16xf32>
    %28 = vector.broadcast %27 : vector<1x16xf32> to vector<64x16xf32>
    %29 = arith.addf %26, %28 : vector<64x16xf32>
    %cst_15 = arith.constant 0.000000e+00 : f32
    %30 = vector.broadcast %cst_15 : f32 to vector<64x16xf32>
    %31 = arith.maximumf %29, %30 : vector<64x16xf32>
    %32 = arith.truncf %31 : vector<64x16xf32> to vector<64x16xbf16>
    %c0_16 = arith.constant 0 : index
    %c0_17 = arith.constant 0 : index
    %c0_18 = arith.constant 0 : index
    %33 = vector.load %arg6[%c0_16, %c0_17, %c0_18] : memref<1x64x16xbf16, #tpu.memory_space<vmem>>, vector<1x64x16xbf16>
    %34 = vector.shape_cast %33 : vector<1x64x16xbf16> to vector<64x16xbf16>
    %35 = vector.shape_cast %32 : vector<64x16xbf16> to vector<1x64x16xbf16>
    tpu.vector_store %arg6[%c0_16, %c0_17, %c0_18], %35 {strides = array<i32>} : memref<1x64x16xbf16, #tpu.memory_space<vmem>>, vector<1x64x16xbf16>,
    return
  }
  func.func @transform_0(%arg0: i32) -> (i32, i32, i32) {
    %c0_i32 = arith.constant 0 : i32
    %c0_i32_0 = arith.constant 0 : i32
    %c0_i32_1 = arith.constant 0 : i32
    return %arg0, %c0_i32, %c0_i32_0 : i32, i32, i32
  }
  func.func @transform_1(%arg0: i32) -> (i32, i32) {
    %c0_i32 = arith.constant 0 : i32
    %c0_i32_0 = arith.constant 0 : i32
    %c0_i32_1 = arith.constant 0 : i32
    return %c0_i32, %c0_i32_0 : i32, i32
  }
  func.func @transform_2(%arg0: i32) -> (i32, i32) {
    %c0_i32 = arith.constant 0 : i32
    %c0_i32_0 = arith.constant 0 : i32
    %c0_i32_1 = arith.constant 0 : i32
    return %c0_i32, %c0_i32_0 : i32, i32
  }
  func.func @transform_3(%arg0: i32) -> (i32, i32) {
    %c0_i32 = arith.constant 0 : i32
    %c0_i32_0 = arith.constant 0 : i32
    %c0_i32_1 = arith.constant 0 : i32
    return %c0_i32, %c0_i32_0 : i32, i32
  }
  func.func @transform_4(%arg0: i32) -> (i32, i32) {
    %c0_i32 = arith.constant 0 : i32
    %c0_i32_0 = arith.constant 0 : i32
    %c0_i32_1 = arith.constant 0 : i32
    return %c0_i32, %c0_i32_0 : i32, i32
  }
  func.func @transform_5(%arg0: i32) -> (i32, i32, i32) {
    %c0_i32 = arith.constant 0 : i32
    %c0_i32_0 = arith.constant 0 : i32
    %c0_i32_1 = arith.constant 0 : i32
    return %arg0, %c0_i32, %c0_i32_0 : i32, i32, i32
  }
}

module attributes {stable_mosaic.version = 11 : i64} {
  func.func @_fused_conv_kernel(%arg0: i32, %arg1: memref<1x256x400xbf16, #tpu.memory_space<vmem>>, %arg2: memref<400x8xbf16, #tpu.memory_space<vmem>>, %arg3: memref<1x8xf32, #tpu.memory_space<vmem>>, %arg4: memref<1x8xf32, #tpu.memory_space<vmem>>, %arg5: memref<1x8xf32, #tpu.memory_space<vmem>>, %arg6: memref<1x256x8xbf16, #tpu.memory_space<vmem>>) attributes {dimension_semantics = [#tpu.dimension_semantics<parallel>], iteration_bounds = array<i64: 2>, scalar_prefetch = 0 : i64, scratch_operands = 0 : i64, tpu.core_type = #tpu.core_type<tc>, window_params = [{transform_indices = @transform_0, window_bounds = array<i64: 1, 256, 400>}, {pipeline_mode = #tpu.pipeline_mode<synchronous>, transform_indices = @transform_1, window_bounds = array<i64: 400, 8>}, {pipeline_mode = #tpu.pipeline_mode<synchronous>, transform_indices = @transform_2, window_bounds = array<i64: 1, 8>}, {pipeline_mode = #tpu.pipeline_mode<synchronous>, transform_indices = @transform_3, window_bounds = array<i64: 1, 8>}, {pipeline_mode = #tpu.pipeline_mode<synchronous>, transform_indices = @transform_4, window_bounds = array<i64: 1, 8>}, {transform_indices = @transform_5, window_bounds = array<i64: 1, 256, 8>}]} {
    %c0 = arith.constant 0 : index
    %c0_0 = arith.constant 0 : index
    %c0_1 = arith.constant 0 : index
    %0 = vector.load %arg1[%c0, %c0_0, %c0_1] : memref<1x256x400xbf16, #tpu.memory_space<vmem>>, vector<1x256x400xbf16>
    %1 = vector.shape_cast %0 : vector<1x256x400xbf16> to vector<256x400xbf16>
    %c0_2 = arith.constant 0 : index
    %c0_3 = arith.constant 0 : index
    %2 = vector.load %arg2[%c0_2, %c0_3] : memref<400x8xbf16, #tpu.memory_space<vmem>>, vector<400x8xbf16>
    %cst = arith.constant dense<0.000000e+00> : vector<256x8xf32>
    %3 = tpu.matmul %1, %2, %cst {dimension_numbers = #tpu.dot_dimension_numbers<[1], [0], [0], [1], [0, 0, 1, 1], [], []>} : vector<256x400xbf16>, vector<400x8xbf16>, vector<256x8xf32> -> vector<256x8xf32>
    %c0_4 = arith.constant 0 : index
    %c0_5 = arith.constant 0 : index
    %4 = vector.load %arg3[%c0_4, %c0_5] : memref<1x8xf32, #tpu.memory_space<vmem>>, vector<1x8xf32>
    %5 = vector.broadcast %4 : vector<1x8xf32> to vector<256x8xf32>
    %6 = arith.addf %3, %5 : vector<256x8xf32>
    %7 = vector.shape_cast %6 : vector<256x8xf32> to vector<1x256x8xf32>
    %cst_6 = arith.constant dense<0.000000e+00> : vector<1xf32>
    %8 = vector.multi_reduction <add>, %7, %cst_6 [1, 2] : vector<1x256x8xf32> to vector<1xf32>
    %9 = vector.shape_cast %8 : vector<1xf32> to vector<1x1x1xf32>
    %10 = vector.extract %9[0, 0, 0] : f32 from vector<1x1x1xf32>
    %cst_7 = arith.constant 2.048000e+03 : f32
    %11 = arith.divf %10, %cst_7 : f32
    %12 = vector.broadcast %11 : f32 to vector<256x8xf32>
    %13 = arith.subf %6, %12 : vector<256x8xf32>
    %14 = arith.mulf %13, %13 : vector<256x8xf32>
    %15 = vector.shape_cast %14 : vector<256x8xf32> to vector<1x256x8xf32>
    %cst_8 = arith.constant dense<0.000000e+00> : vector<1xf32>
    %16 = vector.multi_reduction <add>, %15, %cst_8 [1, 2] : vector<1x256x8xf32> to vector<1xf32>
    %17 = vector.shape_cast %16 : vector<1xf32> to vector<1x1x1xf32>
    %18 = vector.extract %17[0, 0, 0] : f32 from vector<1x1x1xf32>
    %cst_9 = arith.constant 2.047000e+03 : f32
    %19 = arith.divf %18, %cst_9 : f32
    %20 = math.sqrt %19 : f32
    %cst_10 = arith.constant 9.99999974E-6 : f32
    %21 = arith.addf %20, %cst_10 : f32
    %22 = vector.broadcast %21 : f32 to vector<256x8xf32>
    %23 = arith.divf %13, %22 : vector<256x8xf32>
    %c0_11 = arith.constant 0 : index
    %c0_12 = arith.constant 0 : index
    %24 = vector.load %arg4[%c0_11, %c0_12] : memref<1x8xf32, #tpu.memory_space<vmem>>, vector<1x8xf32>
    %25 = vector.broadcast %24 : vector<1x8xf32> to vector<256x8xf32>
    %26 = arith.mulf %23, %25 : vector<256x8xf32>
    %c0_13 = arith.constant 0 : index
    %c0_14 = arith.constant 0 : index
    %27 = vector.load %arg5[%c0_13, %c0_14] : memref<1x8xf32, #tpu.memory_space<vmem>>, vector<1x8xf32>
    %28 = vector.broadcast %27 : vector<1x8xf32> to vector<256x8xf32>
    %29 = arith.addf %26, %28 : vector<256x8xf32>
    %cst_15 = arith.constant 0.000000e+00 : f32
    %30 = vector.broadcast %cst_15 : f32 to vector<256x8xf32>
    %31 = arith.maximumf %29, %30 : vector<256x8xf32>
    %32 = arith.truncf %31 : vector<256x8xf32> to vector<256x8xbf16>
    %c0_16 = arith.constant 0 : index
    %c0_17 = arith.constant 0 : index
    %c0_18 = arith.constant 0 : index
    %33 = vector.load %arg6[%c0_16, %c0_17, %c0_18] : memref<1x256x8xbf16, #tpu.memory_space<vmem>>, vector<1x256x8xbf16>
    %34 = vector.shape_cast %33 : vector<1x256x8xbf16> to vector<256x8xbf16>
    %35 = vector.shape_cast %32 : vector<256x8xbf16> to vector<1x256x8xbf16>
    tpu.vector_store %arg6[%c0_16, %c0_17, %c0_18], %35 {strides = array<i32>} : memref<1x256x8xbf16, #tpu.memory_space<vmem>>, vector<1x256x8xbf16>,
    return
  }
  func.func @transform_0(%arg0: i32) -> (i32, i32, i32) {
    %c0_i32 = arith.constant 0 : i32
    %c0_i32_0 = arith.constant 0 : i32
    %c0_i32_1 = arith.constant 0 : i32
    return %arg0, %c0_i32, %c0_i32_0 : i32, i32, i32
  }
  func.func @transform_1(%arg0: i32) -> (i32, i32) {
    %c0_i32 = arith.constant 0 : i32
    %c0_i32_0 = arith.constant 0 : i32
    %c0_i32_1 = arith.constant 0 : i32
    return %c0_i32, %c0_i32_0 : i32, i32
  }
  func.func @transform_2(%arg0: i32) -> (i32, i32) {
    %c0_i32 = arith.constant 0 : i32
    %c0_i32_0 = arith.constant 0 : i32
    %c0_i32_1 = arith.constant 0 : i32
    return %c0_i32, %c0_i32_0 : i32, i32
  }
  func.func @transform_3(%arg0: i32) -> (i32, i32) {
    %c0_i32 = arith.constant 0 : i32
    %c0_i32_0 = arith.constant 0 : i32
    %c0_i32_1 = arith.constant 0 : i32
    return %c0_i32, %c0_i32_0 : i32, i32
  }
  func.func @transform_4(%arg0: i32) -> (i32, i32) {
    %c0_i32 = arith.constant 0 : i32
    %c0_i32_0 = arith.constant 0 : i32
    %c0_i32_1 = arith.constant 0 : i32
    return %c0_i32, %c0_i32_0 : i32, i32
  }
  func.func @transform_5(%arg0: i32) -> (i32, i32, i32) {
    %c0_i32 = arith.constant 0 : i32
    %c0_i32_0 = arith.constant 0 : i32
    %c0_i32_1 = arith.constant 0 : i32
    return %arg0, %c0_i32, %c0_i32_0 : i32, i32, i32
  }
}

module attributes {stable_mosaic.version = 11 : i64} {
  func.func @_fused_conv_kernel(%arg0: i32, %arg1: memref<1x256x392xbf16, #tpu.memory_space<vmem>>, %arg2: memref<392x3xbf16, #tpu.memory_space<vmem>>, %arg3: memref<1x3xf32, #tpu.memory_space<vmem>>, %arg4: memref<1x256x3xbf16, #tpu.memory_space<vmem>>) attributes {dimension_semantics = [#tpu.dimension_semantics<parallel>], iteration_bounds = array<i64: 2>, scalar_prefetch = 0 : i64, scratch_operands = 0 : i64, tpu.core_type = #tpu.core_type<tc>, window_params = [{transform_indices = @transform_0, window_bounds = array<i64: 1, 256, 392>}, {pipeline_mode = #tpu.pipeline_mode<synchronous>, transform_indices = @transform_1, window_bounds = array<i64: 392, 3>}, {pipeline_mode = #tpu.pipeline_mode<synchronous>, transform_indices = @transform_2, window_bounds = array<i64: 1, 3>}, {transform_indices = @transform_3, window_bounds = array<i64: 1, 256, 3>}]} {
    %c0 = arith.constant 0 : index
    %c0_0 = arith.constant 0 : index
    %c0_1 = arith.constant 0 : index
    %0 = vector.load %arg1[%c0, %c0_0, %c0_1] : memref<1x256x392xbf16, #tpu.memory_space<vmem>>, vector<1x256x392xbf16>
    %1 = vector.shape_cast %0 : vector<1x256x392xbf16> to vector<256x392xbf16>
    %c0_2 = arith.constant 0 : index
    %c0_3 = arith.constant 0 : index
    %2 = vector.load %arg2[%c0_2, %c0_3] : memref<392x3xbf16, #tpu.memory_space<vmem>>, vector<392x3xbf16>
    %cst = arith.constant dense<0.000000e+00> : vector<256x3xf32>
    %3 = tpu.matmul %1, %2, %cst {dimension_numbers = #tpu.dot_dimension_numbers<[1], [0], [0], [1], [0, 0, 1, 1], [], []>} : vector<256x392xbf16>, vector<392x3xbf16>, vector<256x3xf32> -> vector<256x3xf32>
    %c0_4 = arith.constant 0 : index
    %c0_5 = arith.constant 0 : index
    %4 = vector.load %arg3[%c0_4, %c0_5] : memref<1x3xf32, #tpu.memory_space<vmem>>, vector<1x3xf32>
    %5 = vector.broadcast %4 : vector<1x3xf32> to vector<256x3xf32>
    %6 = arith.addf %3, %5 : vector<256x3xf32>
    %7 = math.tanh %6 : vector<256x3xf32>
    %8 = arith.truncf %7 : vector<256x3xf32> to vector<256x3xbf16>
    %c0_6 = arith.constant 0 : index
    %c0_7 = arith.constant 0 : index
    %c0_8 = arith.constant 0 : index
    %9 = vector.load %arg4[%c0_6, %c0_7, %c0_8] : memref<1x256x3xbf16, #tpu.memory_space<vmem>>, vector<1x256x3xbf16>
    %10 = vector.shape_cast %9 : vector<1x256x3xbf16> to vector<256x3xbf16>
    %11 = vector.shape_cast %8 : vector<256x3xbf16> to vector<1x256x3xbf16>
    tpu.vector_store %arg4[%c0_6, %c0_7, %c0_8], %11 {strides = array<i32>} : memref<1x256x3xbf16, #tpu.memory_space<vmem>>, vector<1x256x3xbf16>,
    return
  }
  func.func @transform_0(%arg0: i32) -> (i32, i32, i32) {
    %c0_i32 = arith.constant 0 : i32
    %c0_i32_0 = arith.constant 0 : i32
    %c0_i32_1 = arith.constant 0 : i32
    return %arg0, %c0_i32, %c0_i32_0 : i32, i32, i32
  }
  func.func @transform_1(%arg0: i32) -> (i32, i32) {
    %c0_i32 = arith.constant 0 : i32
    %c0_i32_0 = arith.constant 0 : i32
    %c0_i32_1 = arith.constant 0 : i32
    return %c0_i32, %c0_i32_0 : i32, i32
  }
  func.func @transform_2(%arg0: i32) -> (i32, i32) {
    %c0_i32 = arith.constant 0 : i32
    %c0_i32_0 = arith.constant 0 : i32
    %c0_i32_1 = arith.constant 0 : i32
    return %c0_i32, %c0_i32_0 : i32, i32
  }
  func.func @transform_3(%arg0: i32) -> (i32, i32, i32) {
    %c0_i32 = arith.constant 0 : i32
    %c0_i32_0 = arith.constant 0 : i32
    %c0_i32_1 = arith.constant 0 : i32
    return %arg0, %c0_i32, %c0_i32_0 : i32, i32, i32
  }
}

</mosaic_0001>

<bundles_post_ra>
// kernel: style_transfer_forward.9
= control target key start
LH: loop header
LB: loop body
LE: loop exit
PB: predicated region body
PF: predicated region fallthrough
CT: control target
= control target key end

     0   :  { %10 = vsyncpa [#allocation3], 0  ;;  %s1177_s0 = inlined_call_operand.vmem [shape: bf16[2,64,27], index: 0, kind: input, shape index: {}]   ;;  %s1178_s1 = inlined_call_operand.hbm [shape: bf16[27,32], index: 1, kind: input, shape index: {}]   ;;  %s1179_s2 = inlined_call_operand.hbm [shape: f32[1,32], index: 2, kind: input, shape index: {}]   ;;  %s1180_s3 = inlined_call_operand.hbm [shape: f32[1,32], index: 3, kind: input, shape index: {}]   ;;  %s1181_s4 = inlined_call_operand.hbm [shape: f32[1,32], index: 4, kind: input, shape index: {}]   ;;  %s1182_s5 = inlined_call_operand.vmem [shape: bf16[2,64,32], index: 5, kind: output, shape index: {}]  }
   0x1   :  { %11 = vsyncpa [#allocation5], 0 }
   0x2   :  { %12 = vsyncpa [#allocation8], 0  ;;  %s990_s18 = smov 0  }
   0x3 LB: > { %s953_s19 = smov [#allocation4]   ;;  %s996_s21 = sadd.s32 4294967295, %s951_s18   ;;  %s951_s18 = sphi %s990_s18, %s18_s18  }
   0x4   : > { %s185_s20 = sshll.u32 %s953_s19, 4  ;;  %p683_p0 = scmp.ge.s32.totalorder %s951_s18, 1  ;;  %s1001_s20 = int_to_ptr.vmem [resolvable:$true] %s185_s20 }
   0x5   : > { %p159_p1 = scmp.lt.s32.totalorder %s951_s18, 3  ;;  %p1183_p2 = scmp.eq.s32.totalorder %s996_s21, 0 }
   0x6   : > { %s954_s23 = smov [#allocation2]   ;;  %s955_s26 = smov [#allocation6]  }
   0x7   : > { %p1003_p3 = pnand %p683_p0, %p159_p1  ;;  %s171_s24 = sshll.u32 %s954_s23, 4  ;;  %s1009_s24 = int_to_ptr.vmem [resolvable:$true] %s171_s24 }
   0x8   : > { %s196_s27 = sshll.u32 %s955_s26, 4  ;;  %s956_s28 = smov [#allocation7]   ;;  %s1017_s27 = int_to_ptr.vmem [resolvable:$true] %s196_s27 }
   0x9   : > { %s1185_s22 = scalar_select %p1003_p3, 1, 0 }
   0xa   : > { %p775_p4 = pneg %p1003_p3  ;;  %s1019_s29 = sshll.u32 %s956_s28, 4  ;;  %s208_s29 = int_to_ptr.vmem [resolvable:$true] %s1019_s29 }
   0xb   : > { %s821_s7 = scalar_lea.hbm %s1179_s2, 16 }
   0xc   : > { %p1013_p5 = pnand %p1183_p2, %p775_p4  ;;  %p822_p6 = scmp.ne.s32.totalorder %s1179_s2, %s821_s7 }
   0xd   : > { %p828_p10 = scmp.lt.u32.totalorder %s821_s7, %s1179_s2 }
   0xe   : > { %p1029_p7 = pneg %p1013_p5 }
  0x10   : > { %p824_p8 = pnand %p1029_p7, %p822_p6 }
  0x12   : > { %p825_p9 = pneg %p824_p8 }
  0x14   : > { %p830_p11 = pnand %p828_p10, %p825_p9 }
  0x16   : > { %833 = shalt.err (!%p830_p11)
}
  0x17   : > { %s834_s13 = scalar_lea.vmem %s1001_s20, 16  ;;  %s841_s14 = scalar_lea.vmem %s1001_s20, 32 }
  0x18   : > { %p835_p12 = scmp.ne.s32.totalorder %s1001_s20, %s834_s13  ;;  %p842_p1 = scmp.lt.s32.totalorder %s1001_s20, %s1001_s20 }
  0x19   : > { %p843_p4 = scmp.lt.s32.totalorder %s841_s14, %s834_s13 }
  0x1a   : > { %p837_p13 = pnand %p835_p12, %p1029_p7 }
  0x1b   : > { %p844_p6 = por %p843_p4, %p842_p1 }
  0x1c   : > { %p838_p0 = pneg %p837_p13 }
  0x1e   : > { %p845_p8 = pnand %p844_p6, %p838_p0 }
  0x20   : > { %848 = shalt.err (!%p845_p8)
}
  0x21   : > { %781 = dma.hbm_to_vmem [thread:$0]  (!%p1013_p5), %s1179_s2, 16, %s1001_s20, [#allocation5]  }
  0x22   : > { %s849_s23 = scalar_lea.hbm %s1178_s1, 256 }
  0x23   : > { %p850_p9 = scmp.ne.s32.totalorder %s1178_s1, %s849_s23  ;;  %p856_p12 = scmp.lt.u32.totalorder %s849_s23, %s1178_s1 }
  0x25   : > { %p852_p10 = pnand %p850_p9, %p1029_p7 }
  0x27   : > { %p853_p11 = pneg %p852_p10 }
  0x29   : > { %p858_p13 = pnand %p856_p12, %p853_p11 }
  0x2b   : > { %861 = shalt.err (!%p858_p13)
}
  0x2c   : > { %s862_s20 = scalar_lea.vmem %s1009_s24, 256  ;;  %p870_p6 = scmp.lt.s32.totalorder %s1009_s24, %s1009_s24 }
  0x2d   : > { %p863_p0 = scmp.ne.s32.totalorder %s1009_s24, %s862_s20  ;;  %p871_p8 = scmp.lt.s32.totalorder %s862_s20, %s862_s20 }
  0x2f   : > { %p865_p1 = pnand %p863_p0, %p1029_p7  ;;  %p872_p9 = por %p871_p8, %p870_p6 }
  0x31   : > { %p866_p4 = pneg %p865_p1 }
  0x33   : > { %p873_p10 = pnand %p872_p9, %p866_p4 }
  0x35   : > { %876 = shalt.err (!%p873_p10)
}
  0x36   : > { %s957_s7 = smov 64   ;;  %s958_s8 = smov 4  }
  0x37   : > { %778 = dma.hbm_to_vmem [thread:$0]  (!%p1013_p5), %s1178_s1, 256, %s1009_s24, [#allocation3], %s957_s7, %s957_s7, %s958_s8  }
  0x38   : > { %s877_s14 = scalar_lea.hbm %s1180_s3, 16 }
  0x39   : > { %p878_p11 = scmp.ne.s32.totalorder %s1180_s3, %s877_s14  ;;  %p884_p0 = scmp.lt.u32.totalorder %s877_s14, %s1180_s3 }
  0x3b   : > { %p880_p12 = pnand %p878_p11, %p1029_p7 }
  0x3d   : > { %p881_p13 = pneg %p880_p12 }
  0x3f   : > { %p886_p1 = pnand %p884_p0, %p881_p13 }
  0x41   : > { %889 = shalt.err (!%p886_p1)
}
  0x42   : > { %s890_s24 = scalar_lea.vmem %s1017_s27, 16  ;;  %s897_s23 = scalar_lea.vmem %s1017_s27, 32 }
  0x43   : > { %p891_p4 = scmp.ne.s32.totalorder %s1017_s27, %s890_s24  ;;  %p898_p9 = scmp.lt.s32.totalorder %s1017_s27, %s1017_s27 }
  0x44   : > { %p899_p10 = scmp.lt.s32.totalorder %s897_s23, %s890_s24 }
  0x45   : > { %p893_p6 = pnand %p891_p4, %p1029_p7 }
  0x46   : > { %p900_p11 = por %p899_p10, %p898_p9 }
  0x47   : > { %p894_p8 = pneg %p893_p6 }
  0x49   : > { %p901_p12 = pnand %p900_p11, %p894_p8 }
  0x4b   : > { %904 = shalt.err (!%p901_p12)
}
  0x4c   : > { %784 = dma.hbm_to_vmem [thread:$0]  (!%p1013_p5), %s1180_s3, 16, %s1017_s27, [#allocation5]  }
  0x4d   : > { %s905_s20 = scalar_lea.hbm %s1181_s4, 16 }
  0x4e   : > { %p906_p13 = scmp.ne.s32.totalorder %s1181_s4, %s905_s20  ;;  %p912_p4 = scmp.lt.u32.totalorder %s905_s20, %s1181_s4 }
  0x50   : > { %p908_p0 = pnand %p906_p13, %p1029_p7 }
  0x52   : > { %p909_p1 = pneg %p908_p0 }
  0x54   : > { %p914_p6 = pnand %p912_p4, %p909_p1 }
  0x56   : > { %917 = shalt.err (!%p914_p6)
}
  0x57   : > { %s918_s12 = scalar_lea.vmem %s208_s29, 16  ;;  %s925_s27 = scalar_lea.vmem %s208_s29, 32 }
  0x58   : > { %p919_p8 = scmp.ne.s32.totalorder %s208_s29, %s918_s12  ;;  %p926_p11 = scmp.lt.s32.totalorder %s208_s29, %s208_s29 }
  0x59   : > { %p927_p12 = scmp.lt.s32.totalorder %s925_s27, %s918_s12 }
  0x5a   : > { %p921_p9 = pnand %p919_p8, %p1029_p7 }
  0x5b   : > { %p928_p2 = por %p927_p12, %p926_p11 }
  0x5c   : > { %p922_p10 = pneg %p921_p9 }
  0x5e   : > { %p929_p3 = pnand %p928_p2, %p922_p10 }
  0x60   : > { %932 = shalt.err (!%p929_p3)
}
  0x61   : > { %787 = dma.hbm_to_vmem [thread:$0]  (!%p1013_p5), %s1181_s4, 16, %s208_s29, [#allocation8]  }
  0x62   : > { %p1188_p13 = scmp.ne.s32.totalorder %s1185_s22, 0 }
  0x63   : > { %p1189_p0 = scmp.eq.s32.totalorder (!%p1188_p13), %s996_s21, 0 }
  0x64   : > { %228 = sbr.rel (%p1188_p13) target bundleno = 882 (0x372), region = 40 }
  0x6b   : > { %938 = dma.done.wait (%p1189_p0), [#allocation3], 256   ;;  %p1190_p7 = pmov %p1189_p0 }
  0x6c   : > { %p1191_p1 = pmov %p1189_p0 }
  0x6d   : > { %940 = vsyncadd (%p1190_p7), [#allocation3], 4294967040 }
  0x6e   : > { %942 = dma.done.wait (%p1191_p1), [#allocation5], 32   ;;  %p1192_p2 = pmov %p1189_p0 }
  0x6f   : > { %p1193_p3 = pmov %p1189_p0 }
  0x70   : > { %944 = vsyncadd (%p1192_p2), [#allocation5], 4294967264 }
  0x71   : > { %946 = dma.done.wait (%p1193_p3), [#allocation8], 16   ;;  %p1194_p5 = pmov %p1189_p0 }
  0x72   : > { %p268_p4 = scmp.lt.s32.totalorder %s996_s21, 1  ;;  %vm342_vm0 = vcmask 1044480   ;;  %vm343_vm1 = vcmask 1045504   ;;  %v959_v0 = vmov 65535   ;;  %vm329_vm2 = vcmask 220160   ;;  %v811_v2 = vld [vmem:[#allocation2] sm:$0xff]  }
  0x73   : > { %948 = vsyncadd (%p1194_p5), [#allocation8], 4294967280  ;;  %v344_v1 = vsel %vm342_vm0, 4294967295, %v959_v0  ;;  %v812_v4 = vld [vmem:[#allocation2 + $0x8] sm:$0x3f]   ;;  %737 = vmatprep.subr.bf16.mxu0 %v811_v2  ;;  %749 = vmatprep.subr.bf16.mxu1 %v811_v2  ;;  %vm414_vm3 = vcmask 261120  }
  0x74   : > { %s1196_s21 = smov (!%p268_p4, %s996_s21), 1  ;;  %v345_v3 = vsel %vm343_vm1, %v344_v1, 0  ;;  %738 = vmatpush3.bf16.msra.mxu0 %v811_v2  ;;  %751 = vmatpush3.bf16.msra.mxu1 %v811_v2  ;;  %v698_v10 = vld [vmem:[#allocation4] ss:$0 sm:$0xff]  ;;  %vm576_vm6 = vcmask 257024  }
  0x75   : > { %s721_s22 = sshll.u32 %s1196_s21, 5  ;;  %v347_v6 = vand.u32 %v812_v4, %v345_v3 }
  0x76   : > { %s272_s10 = scalar_lea.vmem %s1177_s0, %s721_s22  ;;  %s277_s30 = scalar_lea.vmem %s1182_s5, %s721_s22 }
  0x77   : > { %v813_v5 = vld [vmem:[%s272_s10] sm:$0xff]   ;;  %v815_v7 = vld [vmem:[%s272_s10 + $0x10] sm:$0xff]   ;;  %739 = vmatprep.subr.bf16.mxu0 %v347_v6  ;;  %750 = vmatprep.subr.bf16.mxu1 %v347_v6  ;;  %v814_v8 = vld [vmem:[%s272_s10 + $0x8] sm:$0xff]  }
  0x78   : > { %741 = vmatprep.mubr.msk.bf16.mxu0 %vm329_vm2, %v813_v5  ;;  %745 = vmatprep.mubr.msk.bf16.mxu1 %vm329_vm2, %v815_v7  ;;  %v816_v9 = vld [vmem:[%s272_s10 + $0x18] sm:$0xff]  }
  0x79   : > { %740 = vmatpush3.bf16.msra.mxu0 %v347_v6  ;;  %752 = vmatpush3.bf16.msra.mxu1 %v347_v6 }
  0x7c   : > { %742 = vmatmul.mubr.msk.bf16.vlgmr.msra.gmra.mrb[0].mxu0 %vm329_vm2, %v814_v8  ;;  %746 = vmatmul.mubr.msk.bf16.vlgmr.msra.gmra.mrb[0].mxu1 %vm329_vm2, %v816_v9 }
 0x14f   : > { %v743_v11 = vpop.f32.mrb[0].mxu0  ;;  %v747_v12 = vpop.f32.mrb[0].mxu1 }
 0x150   : > { %v383_v13 = vpop.f32.mrb[1].mxu0  ;;  %v399_v14 = vpop.f32.mrb[1].mxu1  ;;  %v392_v20 = vadd.f32 %v743_v11, %v698_v10  ;;  %v408_v33 = vadd.f32 %v747_v12, %v698_v10 }
 0x151   : > { %v384_v15 = vadd.f32 %v698_v10, %v383_v13  ;;  %v744_v16 = vpop.f32.mrb[2].mxu0  ;;  %v748_v17 = vpop.f32.mrb[2].mxu1  ;;  %v400_v25 = vadd.f32 %v698_v10, %v399_v14 }
 0x152   : > { %v386_v18 = vpop.f32.mrb[3].mxu0  ;;  %v402_v19 = vpop.f32.mrb[3].mxu1  ;;  %v395_v23 = vadd.f32 %v744_v16, %v698_v10  ;;  %v418_v27 = vsel %vm414_vm3, %v392_v20, 0.0  ;;  %v411_v35 = vadd.f32 %v748_v17, %v698_v10  ;;  %v426_v38 = vsel %vm414_vm3, %v408_v33, 0.0 }
 0x153   : > { %v387_v21 = vadd.f32 %v698_v10, %v386_v18  ;;  %v415_v22 = vsel %vm414_vm3, %v384_v15, 0.0  ;;  %v422_v30 = vsel %vm414_vm3, %v400_v25, 0.0  ;;  %v403_v31 = vadd.f32 %v698_v10, %v402_v19 }
 0x154   : > { %v420_v29 = vsel %vm414_vm3, %v395_v23, 0.0  ;;  %v428_v40 = vsel %vm414_vm3, %v411_v35, 0.0 }
 0x155   : > { %v416_v24 = vsel %vm414_vm3, %v387_v21, 0.0  ;;  %v424_v36 = vsel %vm414_vm3, %v403_v31, 0.0 }
 0x156   : > { %v417_v26 = vadd.f32 %v416_v24, %v415_v22 }
 0x158   : > { %v419_v28 = vadd.f32 %v418_v27, %v417_v26 }
 0x15a   : > { %v421_v32 = vadd.f32 %v420_v29, %v419_v28 }
 0x15c   : > { %v423_v34 = vadd.f32 %v422_v30, %v421_v32  ;;  %v709_v32 = vld [vmem:[#allocation6] ss:$0 sm:$0xff] }
 0x15e   : > { %v425_v37 = vadd.f32 %v424_v36, %v423_v34 }
 0x160   : > { %v427_v39 = vadd.f32 %v426_v38, %v425_v37 }
 0x162   : > { %v429_v41 = vadd.f32 %v428_v40, %v427_v39 }
 0x164   : > { %430 = vadd.xlane.f32.xlu0 %v429_v41  ;;  %v710_v41 = vld [vmem:[#allocation7] ss:$0 sm:$0xff] }
 0x1f1   : > { %v431_v42 = vpop.xlane.xlu0 %430 }
 0x1f2   : > { %v432_v43 = vrot.slane %v431_v42, 4 }
 0x1f4   : > { %v433_v44 = vadd.f32 %v432_v43, %v431_v42 }
 0x1f6   : > { %v434_v45 = vrot.slane %v433_v44, 2 }
 0x1f8   : > { %v435_v46 = vadd.f32 %v434_v45, %v433_v44 }
 0x1fa   : > { %v436_v47 = vrot.slane %v435_v46, 1 }
 0x1fc   : > { %v437_v48 = vadd.f32 %v436_v47, %v435_v46 }
 0x1fe   : > { %753 = vpush %v437_v48 }
 0x22f   : > { %s754_s15 = spop %753 }
 0x230   : > { %s441_s16 = smul.f32 0.00048828125, %s754_s15 }
 0x232   : > { %v442_v49 = vstv %s441_s16 }
 0x233   : > { %v443_v50 = vsub.f32 %v384_v15, %v442_v49  ;;  %v444_v51 = vsub.f32 %v387_v21, %v442_v49  ;;  %v445_v52 = vsub.f32 %v392_v20, %v442_v49  ;;  %v446_v53 = vsub.f32 %v395_v23, %v442_v49 }
 0x234   : > { %v447_v54 = vsub.f32 %v400_v25, %v442_v49  ;;  %v448_v58 = vsub.f32 %v403_v31, %v442_v49  ;;  %v449_v63 = vsub.f32 %v408_v33, %v442_v49  ;;  %v450_v3 = vsub.f32 %v411_v35, %v442_v49 }
 0x235   : > { %v451_v55 = vmul.f32 %v443_v50, %v443_v50  ;;  %v452_v56 = vmul.f32 %v444_v51, %v444_v51  ;;  %v453_v57 = vmul.f32 %v445_v52, %v445_v52  ;;  %v454_v59 = vmul.f32 %v446_v53, %v446_v53 }
 0x236   : > { %v455_v0 = vmul.f32 %v447_v54, %v447_v54  ;;  %v456_v4 = vmul.f32 %v448_v58, %v448_v58  ;;  %v457_v7 = vmul.f32 %v449_v63, %v449_v63  ;;  %v458_v10 = vmul.f32 %v450_v3, %v450_v3 }
 0x237   : > { %v459_v60 = vsel %vm414_vm3, %v451_v55, 0.0  ;;  %v460_v61 = vsel %vm414_vm3, %v452_v56, 0.0  ;;  %v462_v1 = vsel %vm414_vm3, %v453_v57, 0.0  ;;  %v464_v5 = vsel %vm414_vm3, %v454_v59, 0.0 }
 0x238   : > { %v461_v62 = vadd.f32 %v460_v61, %v459_v60  ;;  %v466_v8 = vsel %vm414_vm3, %v455_v0, 0.0  ;;  %v468_v11 = vsel %vm414_vm3, %v456_v4, 0.0  ;;  %v470_v13 = vsel %vm414_vm3, %v457_v7, 0.0 }
 0x239   : > { %v472_v15 = vsel %vm414_vm3, %v458_v10, 0.0 }
 0x23a   : > { %v463_v2 = vadd.f32 %v462_v1, %v461_v62 }
 0x23c   : > { %v465_v6 = vadd.f32 %v464_v5, %v463_v2 }
 0x23e   : > { %v467_v9 = vadd.f32 %v466_v8, %v465_v6 }
 0x240   : > { %v469_v12 = vadd.f32 %v468_v11, %v467_v9 }
 0x242   : > { %v471_v14 = vadd.f32 %v470_v13, %v469_v12 }
 0x244   : > { %v473_v16 = vadd.f32 %v472_v15, %v471_v14 }
 0x246   : > { %474 = vadd.xlane.f32.xlu0 %v473_v16 }
 0x2d3   : > { %v475_v17 = vpop.xlane.xlu0 %474 }
 0x2d4   : > { %v476_v18 = vrot.slane %v475_v17, 4 }
 0x2d6   : > { %v477_v19 = vadd.f32 %v476_v18, %v475_v17 }
 0x2d8   : > { %v478_v20 = vrot.slane %v477_v19, 2 }
 0x2da   : > { %v479_v21 = vadd.f32 %v478_v20, %v477_v19 }
 0x2dc   : > { %v480_v22 = vrot.slane %v479_v21, 1 }
 0x2de   : > { %v481_v23 = vadd.f32 %v480_v22, %v479_v21 }
 0x2e0   : > { %755 = vpush %v481_v23 }
 0x311   : > { %s756_s17 = spop %755 }
 0x312   : > { %s485_s19 = smul.f32 0.0004885198, %s756_s17 }
 0x314   : > { %v486_v24 = vstv %s485_s19 }
 0x315   : > { %817 = vrsqrt.f32 %v486_v24  ;;  %vm489_vm4 = vcmp.eq.f32.partialorder %v486_v24, inf  ;;  %v492_v27 = vand.u32 2147483648, %v486_v24  ;;  %vm491_vm5 = vcmp.eq.f32.partialorder %v486_v24, 0.0 }
 0x31f   : > { %v818_v25 = vpop.eup %817 }
 0x320   : > { %v488_v26 = vmul.f32 %v818_v25, %v486_v24 }
 0x322   : > { %v490_v28 = vsel %vm489_vm4, %v486_v24, %v488_v26 }
 0x323   : > { %v493_v29 = vsel %vm491_vm5, %v492_v27, %v490_v28 }
 0x324   : > { %757 = vpush %v493_v29 }
 0x355   : > { %s758_s24 = spop %757 }
 0x356   : > { %s495_s23 = sadd.f32 1e-05, %s758_s24 }
 0x358   : > { %v496_v30 = vstv %s495_s23 }
 0x359   : > { %819 = vrcp.f32 %v496_v30 }
 0x363   : > { %v820_v31 = vpop.eup %819 }
 0x364   : > { %v498_v33 = vmul.f32 %v820_v31, %v443_v50  ;;  %v499_v34 = vmul.f32 %v820_v31, %v444_v51  ;;  %v500_v35 = vmul.f32 %v820_v31, %v445_v52  ;;  %v501_v36 = vmul.f32 %v820_v31, %v446_v53 }
 0x365   : > { %v502_v37 = vmul.f32 %v820_v31, %v447_v54  ;;  %v503_v38 = vmul.f32 %v820_v31, %v448_v58  ;;  %v504_v39 = vmul.f32 %v820_v31, %v449_v63  ;;  %v505_v40 = vmul.f32 %v820_v31, %v450_v3 }
 0x366   : > { %v513_v42 = vmul.f32 %v709_v32, %v498_v33  ;;  %v514_v43 = vmul.f32 %v709_v32, %v499_v34  ;;  %v515_v44 = vmul.f32 %v709_v32, %v500_v35  ;;  %v516_v45 = vmul.f32 %v709_v32, %v501_v36 }
 0x367   : > { %v517_v46 = vmul.f32 %v709_v32, %v502_v37  ;;  %v518_v47 = vmul.f32 %v709_v32, %v503_v38  ;;  %v519_v48 = vmul.f32 %v709_v32, %v504_v39  ;;  %v520_v49 = vmul.f32 %v709_v32, %v505_v40 }
 0x368   : > { %v528_v55 = vadd.f32 %v710_v41, %v513_v42  ;;  %v529_v56 = vadd.f32 %v710_v41, %v514_v43  ;;  %v530_v50 = vadd.f32 %v710_v41, %v515_v44  ;;  %v531_v51 = vadd.f32 %v710_v41, %v516_v45 }
 0x369   : > { %v532_v52 = vadd.f32 %v710_v41, %v517_v46  ;;  %v533_v53 = vadd.f32 %v710_v41, %v518_v47  ;;  %v534_v54 = vadd.f32 %v710_v41, %v519_v48  ;;  %v535_v57 = vadd.f32 %v710_v41, %v520_v49 }
 0x36a   : > { %v536_v58 = vmax.f32 %v528_v55, 0.0  ;;  %v537_v59 = vmax.f32 %v529_v56, 0.0  ;;  %v538_v60 = vmax.f32 %v530_v50, 0.0  ;;  %v539_v61 = vmax.f32 %v531_v51, 0.0 }
 0x36b   : > { %v540_v62 = vmax.f32 %v532_v52, 0.0  ;;  %v541_v63 = vmax.f32 %v533_v53, 0.0  ;;  %v542_v0 = vmax.f32 %v534_v54, 0.0  ;;  %v543_v1 = vmax.f32 %v535_v57, 0.0 }
 0x36c   : > { %v723_v2 = vpack.c.bf16 %v536_v58, %v536_v58  ;;  %v724_v3 = vpack.c.bf16 %v537_v59, %v537_v59  ;;  %v725_v4 = vpack.c.bf16 %v538_v60, %v538_v60  ;;  %v726_v5 = vpack.c.bf16 %v539_v61, %v539_v61 }
 0x36d   : > { %v727_v6 = vpack.c.bf16 %v540_v62, %v540_v62  ;;  %v728_v7 = vpack.c.bf16 %v541_v63, %v541_v63  ;;  %v729_v8 = vpack.c.bf16 %v542_v0, %v542_v0  ;;  %v730_v9 = vpack.c.bf16 %v543_v1, %v543_v1 }
 0x36e   : > { %577 = vst.msk [vmem:[%s277_s30] sm:$0xf] %vm576_vm6, %v723_v2  ;;  %578 = vst.msk [vmem:[%s277_s30 + $0x4] sm:$0xf] %vm576_vm6, %v724_v3 }
 0x36f   : > { %579 = vst.msk [vmem:[%s277_s30 + $0x8] sm:$0xf] %vm576_vm6, %v725_v4  ;;  %580 = vst.msk [vmem:[%s277_s30 + $0xc] sm:$0xf] %vm576_vm6, %v726_v5 }
 0x370   : > { %581 = vst.msk [vmem:[%s277_s30 + $0x10] sm:$0xf] %vm576_vm6, %v727_v6  ;;  %582 = vst.msk [vmem:[%s277_s30 + $0x14] sm:$0xf] %vm576_vm6, %v728_v7 }
 0x371   : > { %583 = vst.msk [vmem:[%s277_s30 + $0x18] sm:$0xf] %vm576_vm6, %v729_v8  ;;  %584 = vst.msk [vmem:[%s277_s30 + $0x1c] sm:$0xf] %vm576_vm6, %v730_v9 }
 0x372 PF: > { %s18_s18 = sadd.s32 1, %s951_s18  }
 0x373   : > { %p15_p6 = scmp.ge.s32.totalorder %s18_s18, 4  }
 0x375   :  { %17 = sbr.rel (!%p15_p6) target bundleno = 3 (0x3), region = 87 }
 0x37c   :  { %606 = vsyncpa [#allocation3], 1 }
 0x37d   :  { %608 = vsyncpa [#allocation3 + $0x1], 1 }
 0x37e   :  { %609 = vsyncpa [#allocation5], 1 }
 0x37f   :  { %610 = vsyncpa [#allocation8], 1 }

// kernel: style_transfer_forward.10
= control target key start
LH: loop header
LB: loop body
LE: loop exit
PB: predicated region body
PF: predicated region fallthrough
CT: control target
= control target key end

     0   :  { %10 = vsyncpa [#allocation3], 0  ;;  %s1157_s0 = inlined_call_operand.vmem [shape: bf16[2,16,288], index: 0, kind: input, shape index: {}]   ;;  %s1158_s1 = inlined_call_operand.vmem [shape: bf16[288,32], index: 1, kind: input, shape index: {}]   ;;  %s1159_s2 = inlined_call_operand.hbm [shape: f32[1,32], index: 2, kind: input, shape index: {}]   ;;  %s1160_s3 = inlined_call_operand.hbm [shape: f32[1,32], index: 3, kind: input, shape index: {}]   ;;  %s1161_s4 = inlined_call_operand.hbm [shape: f32[1,32], index: 4, kind: input, shape index: {}]   ;;  %s1162_s5 = inlined_call_operand.vmem [shape: bf16[2,16,32], index: 5, kind: output, shape index: {}]  }
   0x1   :  { %11 = vsyncpa [#allocation5], 0  ;;  %s974_s18 = smov 0  }
   0x2 LB: > { %s980_s19 = sadd.s32 4294967295, %s937_s18   ;;  %p688_p0 = scmp.ge.s32.totalorder %s937_s18, 1  ;;  %s937_s18 = sphi %s974_s18, %s17_s18  }
   0x3   : > { %p158_p1 = scmp.lt.s32.totalorder %s937_s18, 3  ;;  %p1163_p2 = scmp.eq.s32.totalorder %s980_s19, 0 }
   0x4   : > { %s939_s21 = smov [#allocation4]   ;;  %s940_s23 = smov [#allocation2]  }
   0x5   : > { %p985_p3 = pnand %p688_p0, %p158_p1  ;;  %s185_s22 = sshll.u32 %s939_s21, 4  ;;  %s186_s22 = int_to_ptr.vmem [resolvable:$true] %s185_s22 }
   0x6   : > { %s174_s24 = sshll.u32 %s940_s23, 4  ;;  %s941_s25 = smov [#allocation6]   ;;  %s997_s24 = int_to_ptr.vmem [resolvable:$true] %s174_s24 }
   0x7   : > { %s1165_s20 = scalar_select %p985_p3, 1, 0 }
   0x8   : > { %p784_p4 = pneg %p985_p3  ;;  %s196_s26 = sshll.u32 %s941_s25, 4  ;;  %s999_s26 = int_to_ptr.vmem [resolvable:$true] %s196_s26 }
   0x9   : > { %s839_s30 = scalar_lea.hbm %s1160_s3, 16 }
   0xa   : > { %p993_p5 = pnand %p1163_p2, %p784_p4  ;;  %p840_p6 = scmp.ne.s32.totalorder %s1160_s3, %s839_s30 }
   0xb   : > { %p846_p10 = scmp.lt.u32.totalorder %s839_s30, %s1160_s3 }
   0xc   : > { %p1009_p7 = pneg %p993_p5 }
   0xe   : > { %p842_p8 = pnand %p1009_p7, %p840_p6 }
  0x10   : > { %p843_p9 = pneg %p842_p8 }
  0x12   : > { %p848_p11 = pnand %p846_p10, %p843_p9 }
  0x14   : > { %851 = shalt.err (!%p848_p11)
}
  0x15   : > { %s852_s11 = scalar_lea.vmem %s186_s22, 16  ;;  %s859_s12 = scalar_lea.vmem %s186_s22, 32 }
  0x16   : > { %p853_p12 = scmp.ne.s32.totalorder %s186_s22, %s852_s11  ;;  %p860_p1 = scmp.lt.s32.totalorder %s186_s22, %s186_s22 }
  0x17   : > { %p861_p4 = scmp.lt.s32.totalorder %s859_s12, %s852_s11 }
  0x18   : > { %p855_p13 = pnand %p853_p12, %p1009_p7 }
  0x19   : > { %p862_p2 = por %p861_p4, %p860_p1 }
  0x1a   : > { %p856_p0 = pneg %p855_p13 }
  0x1c   : > { %p863_p3 = pnand %p862_p2, %p856_p0 }
  0x1e   : > { %866 = shalt.err (!%p863_p3)
}
  0x1f   : > { %790 = dma.hbm_to_vmem [thread:$0]  (!%p993_p5), %s1160_s3, 16, %s186_s22, [#allocation5]  }
  0x20   : > { %s867_s17 = scalar_lea.hbm %s1159_s2, 16 }
  0x21   : > { %p868_p6 = scmp.ne.s32.totalorder %s1159_s2, %s867_s17  ;;  %p874_p2 = scmp.lt.u32.totalorder %s867_s17, %s1159_s2 }
  0x23   : > { %p870_p8 = pnand %p868_p6, %p1009_p7 }
  0x25   : > { %p871_p9 = pneg %p870_p8 }
  0x27   : > { %p876_p3 = pnand %p874_p2, %p871_p9 }
  0x29   : > { %879 = shalt.err (!%p876_p3)
}
  0x2a   : > { %s880_s22 = scalar_lea.vmem %s997_s24, 16  ;;  %s887_s29 = scalar_lea.vmem %s997_s24, 32 }
  0x2b   : > { %p881_p10 = scmp.ne.s32.totalorder %s997_s24, %s880_s22  ;;  %p888_p13 = scmp.lt.s32.totalorder %s997_s24, %s997_s24 }
  0x2c   : > { %p889_p0 = scmp.lt.s32.totalorder %s887_s29, %s880_s22 }
  0x2d   : > { %p883_p11 = pnand %p881_p10, %p1009_p7 }
  0x2e   : > { %p890_p1 = por %p889_p0, %p888_p13 }
  0x2f   : > { %p884_p12 = pneg %p883_p11 }
  0x31   : > { %p891_p4 = pnand %p890_p1, %p884_p12 }
  0x33   : > { %894 = shalt.err (!%p891_p4)
}
  0x34   : > { %787 = dma.hbm_to_vmem [thread:$0]  (!%p993_p5), %s1159_s2, 16, %s997_s24, [#allocation3]  }
  0x35   : > { %s895_s10 = scalar_lea.hbm %s1161_s4, 16 }
  0x36   : > { %p896_p6 = scmp.ne.s32.totalorder %s1161_s4, %s895_s10  ;;  %p902_p2 = scmp.lt.u32.totalorder %s895_s10, %s1161_s4 }
  0x38   : > { %p898_p8 = pnand %p896_p6, %p1009_p7 }
  0x3a   : > { %p899_p9 = pneg %p898_p8 }
  0x3c   : > { %p904_p3 = pnand %p902_p2, %p899_p9 }
  0x3e   : > { %907 = shalt.err (!%p904_p3)
}
  0x3f   : > { %s908_s24 = scalar_lea.vmem %s999_s26, 16  ;;  %s915_s15 = scalar_lea.vmem %s999_s26, 32 }
  0x40   : > { %p909_p10 = scmp.ne.s32.totalorder %s999_s26, %s908_s24  ;;  %p916_p13 = scmp.lt.s32.totalorder %s999_s26, %s999_s26 }
  0x41   : > { %p917_p0 = scmp.lt.s32.totalorder %s915_s15, %s908_s24 }
  0x42   : > { %p911_p11 = pnand %p909_p10, %p1009_p7 }
  0x43   : > { %p918_p1 = por %p917_p0, %p916_p13 }
  0x44   : > { %p912_p12 = pneg %p911_p11 }
  0x46   : > { %p919_p4 = pnand %p918_p1, %p912_p12 }
  0x48   : > { %922 = shalt.err (!%p919_p4)
}
  0x49   : > { %793 = dma.hbm_to_vmem [thread:$0]  (!%p993_p5), %s1161_s4, 16, %s999_s26, [#allocation5]  }
  0x4a   : > { %p1168_p6 = scmp.ne.s32.totalorder %s1165_s20, 0 }
  0x4b   : > { %p1169_p7 = scmp.eq.s32.totalorder (!%p1168_p6), %s980_s19, 0 }
  0x4c   : > { %217 = sbr.rel (%p1168_p6) target bundleno = 856 (0x358), region = 40 }
  0x53   : > { %928 = dma.done.wait (%p1169_p7), [#allocation3], 16   ;;  %p1170_p8 = pmov %p1169_p7 }
  0x54   : > { %p1171_p9 = pmov %p1169_p7 }
  0x55   : > { %930 = vsyncadd (%p1170_p8), [#allocation3], 4294967280 }
  0x56   : > { %932 = dma.done.wait (%p1171_p9), [#allocation5], 32   ;;  %p1172_p2 = pmov %p1169_p7 }
  0x57   : > { %v942_v0 = vmov 0.0   ;;  %vm943_vm0 = vmmov 0   ;;  %v813_v1 = vld [vmem:[%s1158_s1 + $0x40] sm:$0xff]   ;;  %v815_v3 = vld [vmem:[%s1158_s1 + $0x48] sm:$0xff]   ;;  %p253_p5 = scmp.lt.s32.totalorder %s980_s19, 1  ;;  %v817_v5 = vld [vmem:[%s1158_s1 + $0x50] sm:$0xff]  }
  0x58   : > { %934 = vsyncadd (%p1172_p2), [#allocation5], 4294967264  ;;  %757 = vmatprep.subr.bf16.mxu1 %v942_v0  ;;  %761 = vmatprep.mubr.msk.bf16.mxu1 %vm943_vm0, %v942_v0  ;;  %v814_v2 = vld [vmem:[%s1158_s1] sm:$0xff]   ;;  %v816_v4 = vld [vmem:[%s1158_s1 + $0x8] sm:$0xff]   ;;  %vm434_vm1 = vcmask 261120   ;;  %vm597_vm4 = vcmask 257024  }
  0x59   : > { %732 = vmatprep.subr.bf16.mxu0 %v813_v1  ;;  %v818_v6 = vld [vmem:[%s1158_s1 + $0x10] sm:$0xff]   ;;  %s1174_s19 = smov (!%p253_p5, %s980_s19), 1  ;;  %v819_v7 = vld [vmem:[%s1158_s1 + $0x58] sm:$0xff]   ;;  %v821_v9 = vld [vmem:[%s1158_s1 + $0x60] sm:$0xff]  }
  0x5a   : > { %733 = vmatpush3.bf16.msra.mxu0 %v814_v2  ;;  %v820_v8 = vld [vmem:[%s1158_s1 + $0x18] sm:$0xff]   ;;  %s765_s12 = smul.u32 24, %s1174_s19  ;;  %v827_v10 = vld [vmem:[%s1158_s1 + $0x80] sm:$0xff]   ;;  %v823_v12 = vld [vmem:[%s1158_s1 + $0x68] sm:$0xff]   ;;  %s729_s20 = sshll.u32 %s1174_s19, 3 }
  0x5b   : > { %734 = vmatprep.subr.bf16.mxu0 %v815_v3  ;;  %v822_v11 = vld [vmem:[%s1158_s1 + $0x20] sm:$0xff]   ;;  %758 = vmatpush3.bf16.msra.mxu1 %v827_v10  ;;  %v824_v13 = vld [vmem:[%s1158_s1 + $0x28] sm:$0xff]   ;;  %v825_v16 = vld [vmem:[%s1158_s1 + $0x70] sm:$0xff]   ;;  %s262_s8 = scalar_lea.vmem %s1162_s5, %s729_s20 }
  0x5c   : > { %s257_s27 = scalar_lea.vmem %s1157_s0, %s765_s12  ;;  %759 = vmatprep.subr.bf16.mxu1 %v942_v0  ;;  %v833_v15 = vld [vmem:[%s1158_s1 + $0x88] sm:$0xff]   ;;  %v826_v18 = vld [vmem:[%s1158_s1 + $0x30] sm:$0xff]   ;;  %v828_v19 = vld [vmem:[%s1158_s1 + $0x78] sm:$0xff]  }
  0x5d   : > { %v832_v14 = vld [vmem:[%s257_s27 + $0x4] ss:$12 sps:$4 sm:$0xff]   ;;  %v834_v17 = vld [vmem:[%s257_s27 + $0x8] ss:$12 sps:$4 sm:$0xff]   ;;  %v829_v20 = vld [vmem:[%s1158_s1 + $0x38] sm:$0xff]  }
  0x5e   : > { %735 = vmatpush3.bf16.msra.mxu0 %v816_v4  ;;  %470 = vmatprep.mubr.bf16.mxu0 %v832_v14  ;;  %v830_v21 = vld [vmem:[%s257_s27] ss:$12 sps:$4 sm:$0xff]  }
  0x5f   : > { %736 = vmatprep.subr.bf16.mxu0 %v817_v5  ;;  %760 = vmatpush3.bf16.msra.mxu1 %v833_v15  ;;  %v700_v28 = vld [vmem:[#allocation2] ss:$0 sm:$0xff] }
  0x62   : > { %737 = vmatpush3.bf16.msra.mxu0 %v818_v6  ;;  %762 = vmatmul.mubr.msk.bf16.vlgmr.msra.gmra.mrb[0].mxu1 %vm434_vm1, %v834_v17  ;;  %v723_v6 = vld [vmem:[#allocation4] ss:$0 sm:$0xff] }
  0x63   : > { %738 = vmatprep.subr.bf16.mxu0 %v819_v7 }
  0x66   : > { %739 = vmatpush3.bf16.msra.mxu0 %v820_v8 }
  0x67   : > { %740 = vmatprep.subr.bf16.mxu0 %v821_v9  ;;  %v724_v9 = vld [vmem:[#allocation6] ss:$0 sm:$0xff] }
  0x6a   : > { %741 = vmatpush3.bf16.msra.mxu0 %v822_v11 }
  0x6b   : > { %742 = vmatprep.subr.bf16.mxu0 %v823_v12 }
  0x6e   : > { %743 = vmatpush3.bf16.msra.mxu0 %v824_v13 }
  0x6f   : > { %744 = vmatprep.subr.bf16.mxu0 %v825_v16 }
  0x72   : > { %745 = vmatpush3.bf16.msra.mxu0 %v826_v18 }
  0x73   : > { %746 = vmatprep.subr.bf16.mxu0 %v828_v19 }
  0x76   : > { %747 = vmatpush3.bf16.msra.mxu0 %v829_v20 }
  0x79   : > { %471 = vmatmul.mubr.bf16.vlgmr.msra.gmra.mrb[0].mxu0 %v830_v21 }
 0x135   : > { %v513_v22 = vpop.f32.mrb[0].mxu1 }
 0x136   : > { %v763_v23 = vpop.f32.mrb[1].mxu1 }
 0x137   : > { %v516_v24 = vpop.f32.mrb[2].mxu1 }
 0x138   : > { %v764_v25 = vpop.f32.mrb[3].mxu1 }
 0x14c   : > { %v748_v26 = vpop.f32.mrb[0].mxu0 }
 0x14d   : > { %v749_v27 = vpop.f32.mrb[1].mxu0 }
 0x14e   : > { %v750_v29 = vadd.f32 %v749_v27, %v748_v26  ;;  %v751_v30 = vpop.f32.mrb[2].mxu0 }
 0x14f   : > { %v752_v31 = vpop.f32.mrb[3].mxu0 }
 0x150   : > { %v473_v32 = vadd.f32 %v750_v29, %v700_v28  ;;  %v753_v33 = vadd.f32 %v752_v31, %v751_v30 }
 0x152   : > { %v514_v34 = vadd.f32 %v513_v22, %v473_v32  ;;  %v476_v35 = vadd.f32 %v753_v33, %v700_v28 }
 0x154   : > { %v517_v36 = vadd.f32 %v516_v24, %v476_v35  ;;  %v520_v37 = vsel %vm434_vm1, %v514_v34, 0.0 }
 0x156   : > { %v521_v38 = vsel %vm434_vm1, %v517_v36, 0.0 }
 0x157   : > { %v522_v39 = vadd.f32 %v521_v38, %v520_v37 }
 0x159   : > { %523 = vadd.xlane.f32.xlu0 %v522_v39 }
 0x1e6   : > { %v524_v40 = vpop.xlane.xlu0 %523 }
 0x1e7   : > { %v525_v41 = vrot.slane %v524_v40, 4 }
 0x1e9   : > { %v526_v42 = vadd.f32 %v525_v41, %v524_v40 }
 0x1eb   : > { %v527_v43 = vrot.slane %v526_v42, 2 }
 0x1ed   : > { %v528_v44 = vadd.f32 %v527_v43, %v526_v42 }
 0x1ef   : > { %v529_v45 = vrot.slane %v528_v44, 1 }
 0x1f1   : > { %v530_v46 = vadd.f32 %v529_v45, %v528_v44 }
 0x1f3   : > { %766 = vpush %v530_v46 }
 0x224   : > { %s767_s13 = spop %766 }
 0x225   : > { %s534_s14 = smul.f32 0.001953125, %s767_s13 }
 0x227   : > { %v535_v47 = vstv %s534_s14 }
 0x228   : > { %v536_v48 = vsub.f32 %v514_v34, %v535_v47  ;;  %v537_v49 = vsub.f32 %v517_v36, %v535_v47 }
 0x22a   : > { %v538_v50 = vmul.f32 %v536_v48, %v536_v48  ;;  %v539_v51 = vmul.f32 %v537_v49, %v537_v49 }
 0x22c   : > { %v540_v52 = vsel %vm434_vm1, %v538_v50, 0.0  ;;  %v541_v53 = vsel %vm434_vm1, %v539_v51, 0.0 }
 0x22d   : > { %v542_v54 = vadd.f32 %v541_v53, %v540_v52 }
 0x22f   : > { %543 = vadd.xlane.f32.xlu0 %v542_v54 }
 0x2bc   : > { %v544_v55 = vpop.xlane.xlu0 %543 }
 0x2bd   : > { %v545_v56 = vrot.slane %v544_v55, 4 }
 0x2bf   : > { %v546_v57 = vadd.f32 %v545_v56, %v544_v55 }
 0x2c1   : > { %v547_v58 = vrot.slane %v546_v57, 2 }
 0x2c3   : > { %v548_v59 = vadd.f32 %v547_v58, %v546_v57 }
 0x2c5   : > { %v549_v60 = vrot.slane %v548_v59, 1 }
 0x2c7   : > { %v550_v61 = vadd.f32 %v549_v60, %v548_v59 }
 0x2c9   : > { %768 = vpush %v550_v61 }
 0x2fa   : > { %s769_s24 = spop %768 }
 0x2fb   : > { %s554_s15 = smul.f32 0.0019569471, %s769_s24 }
 0x2fd   : > { %v555_v62 = vstv %s554_s15 }
 0x2fe   : > { %835 = vrsqrt.f32 %v555_v62  ;;  %vm558_vm2 = vcmp.eq.f32.partialorder %v555_v62, inf  ;;  %v561_v1 = vand.u32 2147483648, %v555_v62  ;;  %vm560_vm3 = vcmp.eq.f32.partialorder %v555_v62, 0.0 }
 0x308   : > { %v836_v63 = vpop.eup %835 }
 0x309   : > { %v557_v0 = vmul.f32 %v836_v63, %v555_v62 }
 0x30b   : > { %v559_v2 = vsel %vm558_vm2, %v555_v62, %v557_v0 }
 0x30c   : > { %v562_v3 = vsel %vm560_vm3, %v561_v1, %v559_v2 }
 0x30d   : > { %770 = vpush %v562_v3 }
 0x33e   : > { %s771_s16 = spop %770 }
 0x33f   : > { %s564_s17 = sadd.f32 1e-05, %s771_s16 }
 0x341   : > { %v565_v4 = vstv %s564_s17 }
 0x342   : > { %837 = vrcp.f32 %v565_v4 }
 0x34c   : > { %v838_v5 = vpop.eup %837 }
 0x34d   : > { %v567_v7 = vmul.f32 %v838_v5, %v536_v48  ;;  %v568_v8 = vmul.f32 %v838_v5, %v537_v49 }
 0x34f   : > { %v576_v10 = vmul.f32 %v723_v6, %v567_v7  ;;  %v577_v11 = vmul.f32 %v723_v6, %v568_v8 }
 0x351   : > { %v585_v12 = vadd.f32 %v724_v9, %v576_v10  ;;  %v586_v13 = vadd.f32 %v724_v9, %v577_v11 }
 0x353   : > { %v587_v14 = vmax.f32 %v585_v12, 0.0  ;;  %v588_v15 = vmax.f32 %v586_v13, 0.0 }
 0x355   : > { %v730_v16 = vpack.c.bf16 %v587_v14, %v587_v14  ;;  %v731_v17 = vpack.c.bf16 %v588_v15, %v588_v15 }
 0x357   : > { %598 = vst.msk [vmem:[%s262_s8] sm:$0xf] %vm597_vm4, %v730_v16  ;;  %599 = vst.msk [vmem:[%s262_s8 + $0x4] sm:$0xf] %vm597_vm4, %v731_v17 }
 0x358 PF: > { %s17_s18 = sadd.s32 1, %s937_s18  }
 0x359   : > { %p14_p3 = scmp.ge.s32.totalorder %s17_s18, 4  }
 0x35b   :  { %16 = sbr.rel (!%p14_p3) target bundleno = 2 (0x2), region = 83 }
 0x362   :  { %621 = vsyncpa [#allocation3], 1 }
 0x363   :  { %623 = vsyncpa [#allocation3 + $0x1], 1 }
 0x364   :  { %624 = vsyncpa [#allocation5], 1 }

// kernel: style_transfer_forward.11
= control target key start
LH: loop header
LB: loop body
LE: loop exit
PB: predicated region body
PF: predicated region fallthrough
CT: control target
= control target key end

     0   :  { %s1558_s0 = inlined_call_operand.vmem [shape: bf16[2,16,288], index: 0, kind: input, shape index: {}]   ;;  %s1559_s1 = inlined_call_operand.vmem [shape: bf16[288,32], index: 1, kind: input, shape index: {}]   ;;  %s1560_s2 = inlined_call_operand.hbm [shape: f32[1,32], index: 2, kind: input, shape index: {}]   ;;  %s1561_s3 = inlined_call_operand.hbm [shape: f32[2,1,32], index: 3, kind: input, shape index: {}]   ;;  %s1562_s4 = inlined_call_operand.hbm [shape: f32[2,1,32], index: 4, kind: input, shape index: {}]   ;;  %s1563_s5 = inlined_call_operand.hbm [shape: f32[2,1,32], index: 5, kind: input, shape index: {}]   ;;  %s1564_s6 = inlined_call_operand.vmem [shape: bf16[2,16,32], index: 6, kind: output, shape index: {}]  }
   0x1   :  { %1571 = sst [smem:[#allocation12_spill]] %s1561_s3 }
   0x2   :  { %11 = vsyncpa [#allocation3], 0 }
   0x3   :  { %12 = vsyncpa [#allocation5], 0 }
   0x4   :  { %14 = vsyncpa [#allocation5 + $0x1], 0 }
   0x5   :  { %15 = vsyncpa [#allocation8], 0 }
   0x6   :  { %17 = vsyncpa [#allocation8 + $0x1], 0  ;;  %s1251_s21 = smov 0   ;;  %s1253_s22 = smov 0  }
   0x7   :  { %s1255_s23 = smov 0   ;;  %s1257_s24 = smov 0  }
   0x8 LB: > { %s1272_s25 = sadd.s32 1, %s1208_s24   ;;  %s98_s26 = sadd.s32 1, %s1204_s23  ;;  %s1208_s24 = sphi %s1257_s24, %s1588_s24   ;;  %s1204_s23 = sphi %s1255_s23, %s1587_s23   ;;  %s1200_s22 = sphi %s1253_s22, %s1586_s22   ;;  %s1196_s21 = sphi %s1251_s21, %s1585_s21  }
   0x9   : > { %s95_s27 = ssub.s32 %s1208_s24, %s1272_s25  ;;  %p105_p0 = scmp.ne.s32.totalorder %s1204_s23, %s1200_s22 }
   0xa   : > { %p96_p1 = scmp.eq.s32.totalorder %s95_s27, 0  ;;  %p106_p2 = scmp.eq.s32.totalorder %s1208_s24, 0 }
   0xb   : > { %p981_p3 = scmp.lt.s32.totalorder %s1208_s24, 2  ;;  %s235_s29 = sand.u32 1, %s1208_s24  }
   0xc   : > { %s1282_s28 = scalar_select %p96_p1, %s1204_s23, %s98_s26  }
   0xd   : > { %p107_p4 = por %p106_p2, %p105_p0  ;;  %s1286_s30 = sand.u32 1, %s1204_s23  }
   0xe   : > { %s1289_s7 = sshll.u32 %s1208_s24, 4  ;;  %s1572_s3 = sld [smem:[#allocation12_spill]] }
   0xf   : > { %s238_s11 = scalar_lea.vmem [#allocation4], %s1286_s30  ;;  %p1300_p5 = pnand %p981_p3, %p107_p4 }
  0x10   : > { %s245_s12 = sshll.u32 %s238_s11, 4  ;;  %s1305_s14 = sadd.s32 4294967295, %s1208_s24   ;;  %s1298_s12 = int_to_ptr.vmem [resolvable:$true] %s245_s12 }
  0x11   : > { %s1573_s13 = scalar_select %p1300_p5, 1, 0 }
  0x12   : > { %s1307_s15 = scalar_lea.sflag [#allocation5], %s235_s29  ;;  %p1313_p7 = pneg %p1300_p5 }
  0x14   : > { %s1295_s10 = scalar_lea.hbm %s1572_s3, %s1289_s7  ;;  %s1053_s20 = scalar_lea.hbm %s1572_s3, 32 }
  0x15   : > { %s1048_s16 = scalar_lea.hbm %s1295_s10, 16  ;;  %p1054_p10 = scmp.lt.u32.totalorder %s1295_s10, %s1572_s3 }
  0x16   : > { %p1049_p6 = scmp.ne.s32.totalorder %s1295_s10, %s1048_s16  ;;  %p1055_p11 = scmp.lt.u32.totalorder %s1053_s20, %s1048_s16 }
  0x17   : > { %p1057_p13 = scmp.lt.u32.totalorder %s1048_s16, %s1295_s10 }
  0x18   : > { %p1051_p8 = pnand %p1313_p7, %p1049_p6  ;;  %p1056_p12 = por %p1055_p11, %p1054_p10 }
  0x1a   : > { %p1052_p9 = pneg %p1051_p8  ;;  %p1058_p0 = por %p1057_p13, %p1056_p12 }
  0x1c   : > { %p1059_p1 = pnand %p1058_p0, %p1052_p9 }
  0x1e   : > { %1062 = shalt.err (!%p1059_p1)
}
  0x1f   : > { %s1063_s29 = scalar_lea.vmem %s1298_s12, 16  ;;  %s1210_s8 = smov [#allocation4]  }
  0x20   : > { %p1064_p2 = scmp.ne.s32.totalorder %s1298_s12, %s1063_s29  ;;  %s1068_s9 = sshll.u32 %s1210_s8, 4  ;;  %s1069_s9 = int_to_ptr.vmem [resolvable:$false] %s1068_s9 }
  0x21   : > { %s1070_s11 = scalar_lea.vmem %s1069_s9, 32  ;;  %p1071_p6 = scmp.lt.s32.totalorder %s1298_s12, %s1069_s9 }
  0x22   : > { %p1066_p3 = pnand %p1064_p2, %p1313_p7  ;;  %p1072_p8 = scmp.lt.s32.totalorder %s1070_s11, %s1063_s29 }
  0x24   : > { %p1067_p4 = pneg %p1066_p3  ;;  %p1073_p10 = por %p1072_p8, %p1071_p6 }
  0x26   : > { %p1074_p11 = pnand %p1073_p10, %p1067_p4 }
  0x28   : > { %1077 = shalt.err (!%p1074_p11)
}
  0x29   : > { %973 = dma.hbm_to_vmem [thread:$0]  (!%p1300_p5), %s1295_s10, 16, %s1298_s12, %s1307_s15  }
  0x2a   : > { %p111_p9 = scmp.ne.s32.totalorder %s1200_s22, %s1196_s21  ;;  %p1565_p12 = scmp.eq.s32.totalorder %s1305_s14, 0 }
  0x2b   : > { %p872_p13 = scmp.ge.s32.totalorder %s1208_s24, 1  ;;  %p200_p0 = scmp.lt.s32.totalorder %s1208_s24, 3 }
  0x2c   : > { %p1344_p1 = por %p1565_p12, %p111_p9  ;;  %s1211_s19 = smov [#allocation2]  }
  0x2d   : > { %p1348_p2 = pnand %p872_p13, %p200_p0  ;;  %s216_s20 = sshll.u32 %s1211_s19, 4  ;;  %s1354_s20 = int_to_ptr.vmem [resolvable:$true] %s216_s20 }
  0x2e   : > { %s1575_s16 = scalar_select %p1344_p1, 1, 0 }
  0x2f   : > { %s1576_s18 = scalar_select %p1348_p2, 1, 0 }
  0x30   : > { %p966_p3 = pneg %p1348_p2  ;;  %s1360_s24 = scalar_lea.hbm %s1562_s4, %s1289_s7 }
  0x31   : > { %s255_s12 = scalar_lea.vmem [#allocation6], %s1286_s30  ;;  %s1078_s29 = scalar_lea.hbm %s1360_s24, 16 }
  0x32   : > { %s262_s26 = sshll.u32 %s255_s12, 4  ;;  %p1365_p4 = pnand %p966_p3, %p1565_p12  ;;  %s263_s26 = int_to_ptr.vmem [resolvable:$true] %s262_s26 }
  0x33   : > { %p1079_p6 = scmp.ne.s32.totalorder %s1360_s24, %s1078_s29  ;;  %s1083_s11 = scalar_lea.hbm %s1562_s4, 32 }
  0x34   : > { %s1577_s27 = scalar_select %p1365_p4, 1, 0 }
  0x35   : > { %p1081_p8 = pnand %p1079_p6, %p1313_p7  ;;  %p1084_p11 = scmp.lt.u32.totalorder %s1360_s24, %s1562_s4 }
  0x36   : > { %p1085_p9 = scmp.lt.u32.totalorder %s1083_s11, %s1078_s29  ;;  %p1087_p0 = scmp.lt.u32.totalorder %s1078_s29, %s1360_s24 }
  0x37   : > { %p1082_p10 = pneg %p1081_p8 }
  0x38   : > { %p1086_p13 = por %p1085_p9, %p1084_p11 }
  0x3a   : > { %p1088_p3 = por %p1087_p0, %p1086_p13 }
  0x3c   : > { %p1089_p12 = pnand %p1088_p3, %p1082_p10 }
  0x3e   : > { %1092 = shalt.err (!%p1089_p12)
}
  0x3f   : > { %s1093_s10 = scalar_lea.vmem %s263_s26, 16  ;;  %s1212_s12 = smov [#allocation6]  }
  0x40   : > { %p1094_p1 = scmp.ne.s32.totalorder %s263_s26, %s1093_s10  ;;  %s1098_s3 = sshll.u32 %s1212_s12, 4  ;;  %s1099_s3 = int_to_ptr.vmem [resolvable:$false] %s1098_s3 }
  0x41   : > { %s1100_s8 = scalar_lea.vmem %s1099_s3, 32  ;;  %p1101_p2 = scmp.lt.s32.totalorder %s263_s26, %s1099_s3 }
  0x42   : > { %p1096_p6 = pnand %p1094_p1, %p1313_p7  ;;  %p1102_p4 = scmp.lt.s32.totalorder %s1100_s8, %s1093_s10 }
  0x44   : > { %p1097_p8 = pneg %p1096_p6  ;;  %p1103_p5 = por %p1102_p4, %p1101_p2 }
  0x46   : > { %p1104_p9 = pnand %p1103_p5, %p1097_p8 }
  0x48   : > { %1107 = shalt.err (!%p1104_p9)
}
  0x49   : > { %p1578_p11 = scmp.ne.s32.totalorder %s1573_s13, 0  ;;  %s1108_s11 = scalar_lea.hbm %s1560_s2, 16 }
  0x4a   : > { %p1109_p12 = scmp.ne.s32.totalorder %s1560_s2, %s1108_s11  ;;  %p1579_p1 = scmp.ne.s32.totalorder %s1577_s27, 0 }
  0x4b   : > { %976 = dma.hbm_to_vmem [thread:$0]  (!%p1578_p11), %s1360_s24, 16, %s263_s26, %s1307_s15  }
  0x4c   : > { %p1110_p10 = pneg %p1579_p1  ;;  %p1115_p5 = scmp.lt.u32.totalorder %s1108_s11, %s1560_s2 }
  0x4e   : > { %p1111_p13 = pnand %p1110_p10, %p1109_p12 }
  0x50   : > { %p1112_p2 = pneg %p1111_p13 }
  0x52   : > { %p1117_p4 = pnand %p1115_p5, %p1112_p2 }
  0x54   : > { %1120 = shalt.err (!%p1117_p4)
}
  0x55   : > { %s1121_s15 = scalar_lea.vmem %s1354_s20, 16  ;;  %s1128_s24 = scalar_lea.vmem %s1354_s20, 32 }
  0x56   : > { %p1122_p0 = scmp.ne.s32.totalorder %s1354_s20, %s1121_s15  ;;  %p1129_p8 = scmp.lt.s32.totalorder %s1354_s20, %s1354_s20 }
  0x57   : > { %p1130_p9 = scmp.lt.s32.totalorder %s1128_s24, %s1121_s15 }
  0x58   : > { %p1124_p3 = pnand %p1122_p0, %p1110_p10 }
  0x59   : > { %p1131_p12 = por %p1130_p9, %p1129_p8 }
  0x5a   : > { %p1125_p6 = pneg %p1124_p3 }
  0x5c   : > { %p1132_p13 = pnand %p1131_p12, %p1125_p6 }
  0x5e   : > { %1135 = shalt.err (!%p1132_p13)
}
  0x5f   : > { %969 = dma.hbm_to_vmem [thread:$0]  (!%p1579_p1), %s1560_s2, 16, %s1354_s20, [#allocation3]  }
  0x60   : > { %s1413_s9 = scalar_lea.hbm %s1563_s5, %s1289_s7  ;;  %s272_s11 = scalar_lea.vmem [#allocation7], %s1286_s30 }
  0x61   : > { %s279_s27 = sshll.u32 %s272_s11, 4  ;;  %s270_s19 = scalar_lea.sflag [#allocation8], %s1286_s30  ;;  %s280_s27 = int_to_ptr.vmem [resolvable:$true] %s279_s27 }
  0x62   : > { %s1136_s21 = scalar_lea.hbm %s1413_s9, 16  ;;  %s1141_s10 = scalar_lea.hbm %s1563_s5, 32 }
  0x63   : > { %p1137_p10 = scmp.ne.s32.totalorder %s1413_s9, %s1136_s21  ;;  %p1142_p1 = scmp.lt.u32.totalorder %s1413_s9, %s1563_s5 }
  0x64   : > { %p1143_p4 = scmp.lt.u32.totalorder %s1141_s10, %s1136_s21  ;;  %p1145_p3 = scmp.lt.u32.totalorder %s1136_s21, %s1413_s9 }
  0x65   : > { %p1139_p2 = pnand %p1137_p10, %p1313_p7 }
  0x66   : > { %p1144_p0 = por %p1143_p4, %p1142_p1 }
  0x67   : > { %p1140_p5 = pneg %p1139_p2 }
  0x68   : > { %p1146_p6 = por %p1145_p3, %p1144_p0 }
  0x6a   : > { %p1147_p8 = pnand %p1146_p6, %p1140_p5 }
  0x6c   : > { %1150 = shalt.err (!%p1147_p8)
}
  0x6d   : > { %s1151_s30 = scalar_lea.vmem %s280_s27, 16  ;;  %s1213_s24 = smov [#allocation7]  }
  0x6e   : > { %p1152_p9 = scmp.ne.s32.totalorder %s280_s27, %s1151_s30  ;;  %s1156_s26 = sshll.u32 %s1213_s24, 4  ;;  %s1157_s26 = int_to_ptr.vmem [resolvable:$false] %s1156_s26 }
  0x6f   : > { %s1158_s12 = scalar_lea.vmem %s1157_s26, 32  ;;  %p1159_p10 = scmp.lt.s32.totalorder %s280_s27, %s1157_s26 }
  0x70   : > { %p1154_p12 = pnand %p1152_p9, %p1313_p7  ;;  %p1160_p2 = scmp.lt.s32.totalorder %s1158_s12, %s1151_s30 }
  0x72   : > { %p1155_p13 = pneg %p1154_p12  ;;  %p1161_p11 = por %p1160_p2, %p1159_p10 }
  0x74   : > { %p1162_p1 = pnand %p1161_p11, %p1155_p13 }
  0x76   : > { %1165 = shalt.err (!%p1162_p1)
}
  0x77   : > { %p1580_p4 = scmp.ne.s32.totalorder %s1573_s13, 0  ;;  %p1581_p5 = scmp.ne.s32.totalorder %s1576_s18, 0 }
  0x78   : > { %p1582_p0 = scmp.eq.s32.totalorder (!%p1581_p5), %s1305_s14, 0 }
  0x79   : > { %979 = dma.hbm_to_vmem [thread:$0]  (!%p1580_p4), %s1413_s9, 16, %s280_s27, %s270_s19  }
  0x7a   : > { %288 = sbr.rel (%p1581_p5) target bundleno = 896 (0x380), region = 44 }
  0x81   : > { %1183 = dma.done.wait (%p1582_p0), [#allocation3], 16   ;;  %p1583_p7 = pmov %p1582_p0 }
  0x82   : > { %s294_s17 = sand.u32 1, %s1305_s14   ;;  %s1442_s8 = sand.u32 1, %s1200_s22  }
  0x83   : > { %1185 = vsyncadd (%p1583_p7), [#allocation3], 4294967280  ;;  %s295_s29 = scalar_lea.sflag [#allocation5], %s294_s17  ;;  %s297_s13 = scalar_lea.vmem [#allocation4], %s1442_s8 }
  0x84   : > { %p1584_p11 = scmp.ne.s32.totalorder %s1575_s16, 0 }
  0x86   : > { %1187 = dma.done.wait (%p1584_p11), %s295_s29, 32  }
  0x87   : > { %1189 = vsyncadd (%p1584_p11), %s295_s29, 4294967264  ;;  %s305_s18 = scalar_lea.vmem [#allocation6], %s1442_s8  ;;  %s311_s9 = scalar_lea.sflag [#allocation8], %s1442_s8 }
  0x88   : > { %s313_s11 = scalar_lea.vmem [#allocation7], %s1442_s8 }
  0x89   : > { %1191 = dma.done.wait (%p1584_p11), %s311_s9, 16  }
  0x8a   : > { %1193 = vsyncadd (%p1584_p11), %s311_s9, 4294967280  ;;  %v1214_v0 = vmov 0.0   ;;  %vm1215_vm0 = vmmov 0   ;;  %v1018_v1 = vld [vmem:[%s1559_s1 + $0x40] sm:$0xff]   ;;  %v1020_v3 = vld [vmem:[%s1559_s1 + $0x48] sm:$0xff]   ;;  %p354_p3 = scmp.lt.s32.totalorder %s1305_s14, 1 }
  0x8b   : > { %941 = vmatprep.subr.bf16.mxu1 %v1214_v0  ;;  %945 = vmatprep.mubr.msk.bf16.mxu1 %vm1215_vm0, %v1214_v0  ;;  %v1019_v2 = vld [vmem:[%s1559_s1] sm:$0xff]   ;;  %v1021_v4 = vld [vmem:[%s1559_s1 + $0x8] sm:$0xff]   ;;  %v1022_v5 = vld [vmem:[%s1559_s1 + $0x50] sm:$0xff]   ;;  %vm535_vm1 = vcmask 261120   ;;  %vm743_vm2 = vcmask 257024  }
  0x8c   : > { %916 = vmatprep.subr.bf16.mxu0 %v1018_v1  ;;  %v1023_v6 = vld [vmem:[%s1559_s1 + $0x10] sm:$0xff]   ;;  %s1590_s14 = smov (!%p354_p3, %s1305_s14), 1  ;;  %v1024_v7 = vld [vmem:[%s1559_s1 + $0x58] sm:$0xff]   ;;  %v1026_v9 = vld [vmem:[%s1559_s1 + $0x60] sm:$0xff]  }
  0x8d   : > { %917 = vmatpush3.bf16.msra.mxu0 %v1019_v2  ;;  %v1025_v8 = vld [vmem:[%s1559_s1 + $0x18] sm:$0xff]   ;;  %s949_s27 = smul.u32 24, %s1590_s14  ;;  %v1032_v10 = vld [vmem:[%s1559_s1 + $0x80] sm:$0xff]   ;;  %v1028_v12 = vld [vmem:[%s1559_s1 + $0x68] sm:$0xff]   ;;  %s913_s17 = sshll.u32 %s1590_s14, 3 }
  0x8e   : > { %918 = vmatprep.subr.bf16.mxu0 %v1020_v3  ;;  %v1027_v11 = vld [vmem:[%s1559_s1 + $0x20] sm:$0xff]   ;;  %942 = vmatpush3.bf16.msra.mxu1 %v1032_v10  ;;  %v1029_v13 = vld [vmem:[%s1559_s1 + $0x28] sm:$0xff]   ;;  %v1030_v16 = vld [vmem:[%s1559_s1 + $0x70] sm:$0xff]   ;;  %s363_s19 = scalar_lea.vmem %s1564_s6, %s913_s17 }
  0x8f   : > { %s358_s30 = scalar_lea.vmem %s1558_s0, %s949_s27  ;;  %943 = vmatprep.subr.bf16.mxu1 %v1214_v0  ;;  %v1038_v15 = vld [vmem:[%s1559_s1 + $0x88] sm:$0xff]   ;;  %v1031_v18 = vld [vmem:[%s1559_s1 + $0x30] sm:$0xff]   ;;  %v1033_v19 = vld [vmem:[%s1559_s1 + $0x78] sm:$0xff]  }
  0x90   : > { %v1037_v14 = vld [vmem:[%s358_s30 + $0x4] ss:$12 sps:$4 sm:$0xff]   ;;  %v1039_v17 = vld [vmem:[%s358_s30 + $0x8] ss:$12 sps:$4 sm:$0xff]   ;;  %v1034_v20 = vld [vmem:[%s1559_s1 + $0x38] sm:$0xff]  }
  0x91   : > { %919 = vmatpush3.bf16.msra.mxu0 %v1021_v4  ;;  %571 = vmatprep.mubr.bf16.mxu0 %v1037_v14  ;;  %v1035_v21 = vld [vmem:[%s358_s30] ss:$12 sps:$4 sm:$0xff]  }
  0x92   : > { %920 = vmatprep.subr.bf16.mxu0 %v1022_v5  ;;  %944 = vmatpush3.bf16.msra.mxu1 %v1038_v15  ;;  %v883_v28 = vld [vmem:[#allocation2] ss:$0 sm:$0xff] }
  0x95   : > { %921 = vmatpush3.bf16.msra.mxu0 %v1023_v6  ;;  %946 = vmatmul.mubr.msk.bf16.vlgmr.msra.gmra.mrb[0].mxu1 %vm535_vm1, %v1039_v17 }
  0x96   : > { %922 = vmatprep.subr.bf16.mxu0 %v1024_v7 }
  0x99   : > { %923 = vmatpush3.bf16.msra.mxu0 %v1025_v8 }
  0x9a   : > { %924 = vmatprep.subr.bf16.mxu0 %v1026_v9 }
  0x9d   : > { %925 = vmatpush3.bf16.msra.mxu0 %v1027_v11 }
  0x9e   : > { %926 = vmatprep.subr.bf16.mxu0 %v1028_v12 }
  0xa1   : > { %927 = vmatpush3.bf16.msra.mxu0 %v1029_v13 }
  0xa2   : > { %928 = vmatprep.subr.bf16.mxu0 %v1030_v16  ;;  %v689_v16 = vld [vmem:[%s313_s11] sm:$0x1] }
  0xa5   : > { %929 = vmatpush3.bf16.msra.mxu0 %v1031_v18  ;;  %v906_v18 = vmul.f32 -1.442695, %v689_v16 }
  0xa6   : > { %930 = vmatprep.subr.bf16.mxu0 %v1033_v19 }
  0xa9   : > { %931 = vmatpush3.bf16.msra.mxu0 %v1034_v20 }
  0xac   : > { %572 = vmatmul.mubr.bf16.vlgmr.msra.gmra.mrb[0].mxu0 %v1035_v21 }
 0x168   : > { %v614_v22 = vpop.f32.mrb[0].mxu1 }
 0x169   : > { %v947_v23 = vpop.f32.mrb[1].mxu1 }
 0x16a   : > { %v617_v24 = vpop.f32.mrb[2].mxu1 }
 0x16b   : > { %v948_v25 = vpop.f32.mrb[3].mxu1 }
 0x17f   : > { %v932_v26 = vpop.f32.mrb[0].mxu0 }
 0x180   : > { %v933_v27 = vpop.f32.mrb[1].mxu0 }
 0x181   : > { %v934_v29 = vadd.f32 %v933_v27, %v932_v26  ;;  %v935_v30 = vpop.f32.mrb[2].mxu0  ;;  %v697_v26 = vlaneseq }
 0x182   : > { %v936_v31 = vpop.f32.mrb[3].mxu0 }
 0x183   : > { %v574_v32 = vadd.f32 %v934_v29, %v883_v28  ;;  %v937_v33 = vadd.f32 %v936_v31, %v935_v30  ;;  %v698_v27 = vshrl.u32 %v697_v26, 7 }
 0x185   : > { %v615_v34 = vadd.f32 %v614_v22, %v574_v32  ;;  %v577_v35 = vadd.f32 %v937_v33, %v883_v28  ;;  %v699_v29 = vsub.s32 0, %v698_v27 }
 0x187   : > { %v618_v36 = vadd.f32 %v617_v24, %v577_v35  ;;  %v621_v37 = vsel %vm535_vm1, %v615_v34, 0.0 }
 0x189   : > { %v622_v38 = vsel %vm535_vm1, %v618_v36, 0.0 }
 0x18a   : > { %v623_v39 = vadd.f32 %v622_v38, %v621_v37 }
 0x18c   : > { %650 = vadd.xlane.f32.xlu0 %v623_v39  ;;  %v624_v62 = vrot.slane %v623_v39, 4 }
 0x18e   : > { %v625_v63 = vadd.f32 %v624_v62, %v623_v39 }
 0x190   : > { %v626_v0 = vrot.slane %v625_v63, 2 }
 0x192   : > { %v627_v1 = vadd.f32 %v626_v0, %v625_v63 }
 0x194   : > { %v628_v2 = vrot.slane %v627_v1, 1 }
 0x196   : > { %v629_v3 = vadd.f32 %v628_v2, %v627_v1 }
 0x198   : > { %v631_v4 = vmul.f32 0.0625, %v629_v3 }
 0x19a   : > { %v632_v6 = vsub.f32 %v615_v34, %v631_v4  ;;  %v633_v7 = vsub.f32 %v618_v36, %v631_v4 }
 0x19c   : > { %v634_v8 = vmul.f32 %v632_v6, %v632_v6  ;;  %v635_v9 = vmul.f32 %v633_v7, %v633_v7 }
 0x19e   : > { %v636_v10 = vsel %vm535_vm1, %v634_v8, 0.0  ;;  %v637_v11 = vsel %vm535_vm1, %v635_v9, 0.0 }
 0x19f   : > { %v638_v13 = vadd.f32 %v637_v11, %v636_v10 }
 0x1a1   : > { %v639_v14 = vrot.slane %v638_v13, 4 }
 0x1a3   : > { %v640_v15 = vadd.f32 %v639_v14, %v638_v13 }
 0x1a5   : > { %v641_v17 = vrot.slane %v640_v15, 2 }
 0x1a7   : > { %v642_v19 = vadd.f32 %v641_v17, %v640_v15 }
 0x1a9   : > { %v643_v20 = vrot.slane %v642_v19, 1 }
 0x1ab   : > { %v644_v21 = vadd.f32 %v643_v20, %v642_v19 }
 0x1ad   : > { %v645_v23 = vmul.f32 0.0625, %v644_v21 }
 0x1af   : > { %v646_v25 = vadd.f32 1e-05, %v645_v23 }
 0x219   : > { %v651_v40 = vpop.xlane.xlu0 %650 }
 0x21a   : > { %v652_v41 = vrot.slane %v651_v40, 4 }
 0x21c   : > { %v653_v42 = vadd.f32 %v652_v41, %v651_v40 }
 0x21e   : > { %v654_v43 = vrot.slane %v653_v42, 2 }
 0x220   : > { %v655_v44 = vadd.f32 %v654_v43, %v653_v42  ;;  %v907_v43 = vld [vmem:[%s297_s13] ss:$0 sm:$0xff] }
 0x222   : > { %v656_v45 = vrot.slane %v655_v44, 1 }
 0x224   : > { %v657_v46 = vadd.f32 %v656_v45, %v655_v44 }
 0x226   : > { %950 = vpush %v657_v46  ;;  %v908_v46 = vld [vmem:[%s305_s18] ss:$0 sm:$0xff] }
 0x257   : > { %s951_s7 = spop %950 }
 0x258   : > { %s661_s30 = smul.f32 0.001953125, %s951_s7 }
 0x25a   : > { %v662_v47 = vstv %s661_s30 }
 0x25b   : > { %v1521_v48 = vsub.f32 %v615_v34, %v662_v47  ;;  %v1523_v49 = vsub.f32 %v618_v36, %v662_v47 }
 0x25d   : > { %v665_v50 = vmul.f32 %v1521_v48, %v1521_v48  ;;  %v666_v51 = vmul.f32 %v1523_v49, %v1523_v49 }
 0x25f   : > { %v667_v52 = vsel %vm535_vm1, %v665_v50, 0.0  ;;  %v668_v53 = vsel %vm535_vm1, %v666_v51, 0.0 }
 0x260   : > { %v669_v54 = vadd.f32 %v668_v53, %v667_v52 }
 0x262   : > { %670 = vadd.xlane.f32.xlu0 %v669_v54 }
 0x2ef   : > { %v671_v55 = vpop.xlane.xlu0 %670 }
 0x2f0   : > { %v672_v56 = vrot.slane %v671_v55, 4 }
 0x2f2   : > { %v673_v57 = vadd.f32 %v672_v56, %v671_v55 }
 0x2f4   : > { %v674_v58 = vrot.slane %v673_v57, 2 }
 0x2f6   : > { %v675_v59 = vadd.f32 %v674_v58, %v673_v57 }
 0x2f8   : > { %v676_v60 = vrot.slane %v675_v59, 1 }
 0x2fa   : > { %v677_v61 = vadd.f32 %v676_v60, %v675_v59 }
 0x2fc   : > { %952 = vpush %v677_v61 }
 0x32d   : > { %s953_s24 = spop %952 }
 0x32e   : > { %s681_s26 = smul.f32 0.001953125, %s953_s24 }
 0x330   : > { %s682_s12 = sadd.f32 1e-05, %s681_s26 }
 0x332   : > { %v683_v5 = vstv %s682_s12 }
 0x333   : > { %1040 = vrsqrt.f32 %v683_v5 }
 0x334   : > { %1042 = vpow2.f32 %v906_v18 }
 0x33d   : > { %v1041_v12 = vpop.eup %1040 }
 0x33e   : > { %954 = vpush %v1041_v12  ;;  %v1043_v22 = vpop.eup %1042 }
 0x33f   : > { %v693_v24 = vadd.f32 1.0, %v1043_v22 }
 0x341   : > { %1044 = vrcp.f32 %v693_v24 }
 0x342   : > { %1046 = vrsqrt.f32 %v646_v25 }
 0x34b   : > { %v1045_v28 = vpop.eup %1044 }
 0x34c   : > { %v704_v30 = vsub.f32 1.0, %v1045_v28  ;;  %v1047_v31 = vpop.eup %1046  ;;  %v700_v34 = vrot.slane %v1045_v28, %v699_v29 }
 0x34d   : > { %v648_v32 = vmul.f32 %v1047_v31, %v632_v6  ;;  %v649_v33 = vmul.f32 %v1047_v31, %v633_v7 }
 0x34e   : > { %v709_v35 = vrot.slane %v704_v30, %v699_v29 }
 0x34f   : > { %v702_v39 = vmul.f32 %v700_v34, %v648_v32  ;;  %v703_v40 = vmul.f32 %v700_v34, %v649_v33 }
 0x36f   : > { %s955_s11 = spop %954 }
 0x370   : > { %v686_v36 = vstv %s955_s11 }
 0x371   : > { %v687_v37 = vmul.f32 %v686_v36, %v1521_v48  ;;  %v688_v38 = vmul.f32 %v686_v36, %v1523_v49 }
 0x373   : > { %v711_v41 = vmul.f32 %v709_v35, %v687_v37  ;;  %v712_v42 = vmul.f32 %v709_v35, %v688_v38 }
 0x375   : > { %v713_v44 = vadd.f32 %v711_v41, %v702_v39  ;;  %v714_v45 = vadd.f32 %v712_v42, %v703_v40 }
 0x377   : > { %v722_v47 = vmul.f32 %v907_v43, %v713_v44  ;;  %v723_v50 = vmul.f32 %v907_v43, %v714_v45 }
 0x379   : > { %v731_v51 = vadd.f32 %v908_v46, %v722_v47  ;;  %v732_v52 = vadd.f32 %v908_v46, %v723_v50 }
 0x37b   : > { %v733_v53 = vmax.f32 %v731_v51, 0.0  ;;  %v734_v54 = vmax.f32 %v732_v52, 0.0 }
 0x37d   : > { %v914_v48 = vpack.c.bf16 %v733_v53, %v733_v53  ;;  %v915_v49 = vpack.c.bf16 %v734_v54, %v734_v54 }
 0x37f   : > { %744 = vst.msk [vmem:[%s363_s19] sm:$0xf] %vm743_vm2, %v914_v48  ;;  %745 = vst.msk [vmem:[%s363_s19 + $0x4] sm:$0xf] %vm743_vm2, %v915_v49 }
 0x380 PF: > { %p20_p6 = scmp.ge.s32.totalorder %s1272_s25, 4   ;;  %s1585_s21 = smov %s1200_s22 }
 0x381   : > { %s1586_s22 = smov %s1204_s23  ;;  %s1587_s23 = smov %s1282_s28 }
 0x382   : > { %s1588_s24 = smov %s1272_s25  ;;  %22 = sbr.rel (!%p20_p6) target bundleno = 8 (0x8), region = 116 }
 0x389   :  { %767 = vsyncpa [#allocation3], 1 }
 0x38a   :  { %769 = vsyncpa [#allocation3 + $0x1], 1 }
 0x38b   :  { %770 = vsyncpa [#allocation5], 1 }
 0x38c   :  { %772 = vsyncpa [#allocation5 + $0x1], 1 }
 0x38d   :  { %773 = vsyncpa [#allocation8], 1 }
 0x38e   :  { %775 = vsyncpa [#allocation8 + $0x1], 1 }

// kernel: style_transfer_forward.12
= control target key start
LH: loop header
LB: loop body
LE: loop exit
PB: predicated region body
PF: predicated region fallthrough
CT: control target
= control target key end

     0   :  { %s1636_s0 = inlined_call_operand.vmem [shape: bf16[2,16,288], index: 0, kind: input, shape index: {}]   ;;  %s1637_s1 = inlined_call_operand.vmem [shape: bf16[288,32], index: 1, kind: input, shape index: {}]   ;;  %s1638_s2 = inlined_call_operand.hbm [shape: f32[1,32], index: 2, kind: input, shape index: {}]   ;;  %s1639_s3 = inlined_call_operand.hbm [shape: f32[2,1,32], index: 3, kind: input, shape index: {}]   ;;  %s1640_s4 = inlined_call_operand.hbm [shape: f32[2,1,32], index: 4, kind: input, shape index: {}]   ;;  %s1641_s5 = inlined_call_operand.hbm [shape: f32[2,1,32], index: 5, kind: input, shape index: {}]   ;;  %s1642_s6 = inlined_call_operand.vmem [shape: bf16[2,16,32], index: 6, kind: input, shape index: {}]   ;;  %s1643_s7 = inlined_call_operand.vmem [shape: bf16[2,16,32], index: 7, kind: output, shape index: {}]  }
   0x1   :  { %1650 = sst [smem:[#allocation13_spill]] %s1639_s3 }
   0x2   :  { %12 = vsyncpa [#allocation3], 0 }
   0x3   :  { %13 = vsyncpa [#allocation5], 0 }
   0x4   :  { %15 = vsyncpa [#allocation5 + $0x1], 0 }
   0x5   :  { %16 = vsyncpa [#allocation8], 0 }
   0x6   :  { %18 = vsyncpa [#allocation8 + $0x1], 0  ;;  %s1326_s24 = smov 0   ;;  %s1328_s25 = smov 0  }
   0x7   :  { %s1330_s26 = smov 0   ;;  %s1332_s27 = smov 0  }
   0x8 LB: > { %s1347_s28 = sadd.s32 1, %s1278_s27   ;;  %s99_s29 = sadd.s32 1, %s1274_s26  ;;  %s1278_s27 = sphi %s1332_s27, %s1669_s27   ;;  %s1274_s26 = sphi %s1330_s26, %s1668_s26   ;;  %s1270_s25 = sphi %s1328_s25, %s1667_s25   ;;  %s1266_s24 = sphi %s1326_s24, %s1666_s24  }
   0x9   : > { %s96_s30 = ssub.s32 %s1278_s27, %s1347_s28  ;;  %p106_p0 = scmp.ne.s32.totalorder %s1274_s26, %s1270_s25 }
   0xa   : > { %p97_p1 = scmp.eq.s32.totalorder %s96_s30, 0  ;;  %p107_p2 = scmp.eq.s32.totalorder %s1278_s27, 0 }
   0xb   : > { %p1051_p3 = scmp.lt.s32.totalorder %s1278_s27, 2  ;;  %s262_s9 = sand.u32 1, %s1278_s27  }
   0xc   : > { %s1357_s8 = scalar_select %p97_p1, %s1274_s26, %s99_s29  }
   0xd   : > { %p108_p4 = por %p107_p2, %p106_p0  ;;  %s1361_s10 = sand.u32 1, %s1274_s26  }
   0xe   : > { %1651 = sst [smem:[#allocation12_spill]] %s1357_s8  ;;  %s1364_s11 = sshll.u32 %s1278_s27, 4 }
   0xf   : > { %s1652_s3 = sld [smem:[#allocation13_spill]]  ;;  %s265_s15 = scalar_lea.vmem [#allocation4], %s1361_s10 }
  0x10   : > { %s272_s16 = sshll.u32 %s265_s15, 4  ;;  %p1375_p5 = pnand %p1051_p3, %p108_p4  ;;  %s1373_s16 = int_to_ptr.vmem [resolvable:$true] %s272_s16 }
  0x11   : > { %s1380_s18 = sadd.s32 4294967295, %s1278_s27   ;;  %s1382_s19 = scalar_lea.sflag [#allocation5], %s262_s9 }
  0x12   : > { %s1653_s17 = scalar_select %p1375_p5, 1, 0 }
  0x13   : > { %p1388_p7 = pneg %p1375_p5 }
  0x15   : > { %s1370_s14 = scalar_lea.hbm %s1652_s3, %s1364_s11  ;;  %s1123_s29 = scalar_lea.hbm %s1652_s3, 32 }
  0x16   : > { %s1118_s20 = scalar_lea.hbm %s1370_s14, 16  ;;  %p1124_p10 = scmp.lt.u32.totalorder %s1370_s14, %s1652_s3 }
  0x17   : > { %p1119_p6 = scmp.ne.s32.totalorder %s1370_s14, %s1118_s20  ;;  %p1125_p11 = scmp.lt.u32.totalorder %s1123_s29, %s1118_s20 }
  0x18   : > { %p1127_p13 = scmp.lt.u32.totalorder %s1118_s20, %s1370_s14 }
  0x19   : > { %p1121_p8 = pnand %p1388_p7, %p1119_p6  ;;  %p1126_p12 = por %p1125_p11, %p1124_p10 }
  0x1b   : > { %p1122_p9 = pneg %p1121_p8  ;;  %p1128_p0 = por %p1127_p13, %p1126_p12 }
  0x1d   : > { %p1129_p1 = pnand %p1128_p0, %p1122_p9 }
  0x1f   : > { %1132 = shalt.err (!%p1129_p1)
}
  0x20   : > { %s1133_s9 = scalar_lea.vmem %s1373_s16, 16  ;;  %s1280_s13 = smov [#allocation4]  }
  0x21   : > { %p1134_p2 = scmp.ne.s32.totalorder %s1373_s16, %s1133_s9  ;;  %s1138_s15 = sshll.u32 %s1280_s13, 4  ;;  %s1139_s15 = int_to_ptr.vmem [resolvable:$false] %s1138_s15 }
  0x22   : > { %s1140_s22 = scalar_lea.vmem %s1139_s15, 32  ;;  %p1141_p6 = scmp.lt.s32.totalorder %s1373_s16, %s1139_s15 }
  0x23   : > { %p1136_p3 = pnand %p1134_p2, %p1388_p7  ;;  %p1142_p8 = scmp.lt.s32.totalorder %s1140_s22, %s1133_s9 }
  0x25   : > { %p1137_p4 = pneg %p1136_p3  ;;  %p1143_p10 = por %p1142_p8, %p1141_p6 }
  0x27   : > { %p1144_p11 = pnand %p1143_p10, %p1137_p4 }
  0x29   : > { %1147 = shalt.err (!%p1144_p11)
}
  0x2a   : > { %1043 = dma.hbm_to_vmem [thread:$0]  (!%p1375_p5), %s1370_s14, 16, %s1373_s16, %s1382_s19  }
  0x2b   : > { %p112_p9 = scmp.ne.s32.totalorder %s1270_s25, %s1266_s24  ;;  %p1644_p12 = scmp.eq.s32.totalorder %s1380_s18, 0 }
  0x2c   : > { %p935_p13 = scmp.ge.s32.totalorder %s1278_s27, 1  ;;  %p227_p0 = scmp.lt.s32.totalorder %s1278_s27, 3 }
  0x2d   : > { %p1419_p1 = por %p1644_p12, %p112_p9  ;;  %s1281_s29 = smov [#allocation2]  }
  0x2e   : > { %p1423_p2 = pnand %p935_p13, %p227_p0  ;;  %s243_s30 = sshll.u32 %s1281_s29, 4  ;;  %s1429_s30 = int_to_ptr.vmem [resolvable:$true] %s243_s30 }
  0x2f   : > { %s1655_s20 = scalar_select %p1419_p1, 1, 0 }
  0x30   : > { %s1656_s23 = scalar_select %p1423_p2, 1, 0 }
  0x31   : > { %p1036_p3 = pneg %p1423_p2  ;;  %s1435_s27 = scalar_lea.hbm %s1640_s4, %s1364_s11 }
  0x32   : > { %s282_s16 = scalar_lea.vmem [#allocation6], %s1361_s10  ;;  %s1148_s13 = scalar_lea.hbm %s1435_s27, 16 }
  0x33   : > { %s289_s12 = sshll.u32 %s282_s16, 4  ;;  %p1440_p4 = pnand %p1036_p3, %p1644_p12  ;;  %s290_s12 = int_to_ptr.vmem [resolvable:$true] %s289_s12 }
  0x34   : > { %p1149_p6 = scmp.ne.s32.totalorder %s1435_s27, %s1148_s13  ;;  %s1153_s29 = scalar_lea.hbm %s1640_s4, 32 }
  0x35   : > { %s1657_s9 = scalar_select %p1440_p4, 1, 0 }
  0x36   : > { %p1151_p8 = pnand %p1149_p6, %p1388_p7  ;;  %p1154_p11 = scmp.lt.u32.totalorder %s1435_s27, %s1640_s4 }
  0x37   : > { %p1155_p9 = scmp.lt.u32.totalorder %s1153_s29, %s1148_s13  ;;  %p1157_p0 = scmp.lt.u32.totalorder %s1148_s13, %s1435_s27 }
  0x38   : > { %p1152_p10 = pneg %p1151_p8 }
  0x39   : > { %p1156_p13 = por %p1155_p9, %p1154_p11 }
  0x3b   : > { %p1158_p3 = por %p1157_p0, %p1156_p13 }
  0x3d   : > { %p1159_p12 = pnand %p1158_p3, %p1152_p10 }
  0x3f   : > { %1162 = shalt.err (!%p1159_p12)
}
  0x40   : > { %s1163_s16 = scalar_lea.vmem %s290_s12, 16  ;;  %s1282_s3 = smov [#allocation6]  }
  0x41   : > { %p1164_p1 = scmp.ne.s32.totalorder %s290_s12, %s1163_s16  ;;  %s1168_s8 = sshll.u32 %s1282_s3, 4  ;;  %s1169_s8 = int_to_ptr.vmem [resolvable:$false] %s1168_s8 }
  0x42   : > { %s1170_s15 = scalar_lea.vmem %s1169_s8, 32  ;;  %p1171_p2 = scmp.lt.s32.totalorder %s290_s12, %s1169_s8 }
  0x43   : > { %p1166_p6 = pnand %p1164_p1, %p1388_p7  ;;  %p1172_p4 = scmp.lt.s32.totalorder %s1170_s15, %s1163_s16 }
  0x45   : > { %p1167_p8 = pneg %p1166_p6  ;;  %p1173_p5 = por %p1172_p4, %p1171_p2 }
  0x47   : > { %p1174_p9 = pnand %p1173_p5, %p1167_p8 }
  0x49   : > { %1177 = shalt.err (!%p1174_p9)
}
  0x4a   : > { %p1658_p11 = scmp.ne.s32.totalorder %s1653_s17, 0  ;;  %s1178_s29 = scalar_lea.hbm %s1638_s2, 16 }
  0x4b   : > { %p1179_p12 = scmp.ne.s32.totalorder %s1638_s2, %s1178_s29  ;;  %p1659_p1 = scmp.ne.s32.totalorder %s1657_s9, 0 }
  0x4c   : > { %1046 = dma.hbm_to_vmem [thread:$0]  (!%p1658_p11), %s1435_s27, 16, %s290_s12, %s1382_s19  }
  0x4d   : > { %p1180_p10 = pneg %p1659_p1  ;;  %p1185_p5 = scmp.lt.u32.totalorder %s1178_s29, %s1638_s2 }
  0x4f   : > { %p1181_p13 = pnand %p1180_p10, %p1179_p12 }
  0x51   : > { %p1182_p2 = pneg %p1181_p13 }
  0x53   : > { %p1187_p4 = pnand %p1185_p5, %p1182_p2 }
  0x55   : > { %1190 = shalt.err (!%p1187_p4)
}
  0x56   : > { %s1191_s19 = scalar_lea.vmem %s1429_s30, 16  ;;  %s1198_s27 = scalar_lea.vmem %s1429_s30, 32 }
  0x57   : > { %p1192_p0 = scmp.ne.s32.totalorder %s1429_s30, %s1191_s19  ;;  %p1199_p8 = scmp.lt.s32.totalorder %s1429_s30, %s1429_s30 }
  0x58   : > { %p1200_p9 = scmp.lt.s32.totalorder %s1198_s27, %s1191_s19 }
  0x59   : > { %p1194_p3 = pnand %p1192_p0, %p1180_p10 }
  0x5a   : > { %p1201_p12 = por %p1200_p9, %p1199_p8 }
  0x5b   : > { %p1195_p6 = pneg %p1194_p3 }
  0x5d   : > { %p1202_p13 = pnand %p1201_p12, %p1195_p6 }
  0x5f   : > { %1205 = shalt.err (!%p1202_p13)
}
  0x60   : > { %1039 = dma.hbm_to_vmem [thread:$0]  (!%p1659_p1), %s1638_s2, 16, %s1429_s30, [#allocation3]  }
  0x61   : > { %s1488_s22 = scalar_lea.hbm %s1641_s5, %s1364_s11  ;;  %s299_s29 = scalar_lea.vmem [#allocation7], %s1361_s10 }
  0x62   : > { %s306_s9 = sshll.u32 %s299_s29, 4  ;;  %s297_s24 = scalar_lea.sflag [#allocation8], %s1361_s10  ;;  %s307_s9 = int_to_ptr.vmem [resolvable:$true] %s306_s9 }
  0x63   : > { %s1206_s14 = scalar_lea.hbm %s1488_s22, 16  ;;  %s1211_s8 = scalar_lea.hbm %s1641_s5, 32 }
  0x64   : > { %p1207_p10 = scmp.ne.s32.totalorder %s1488_s22, %s1206_s14  ;;  %p1212_p1 = scmp.lt.u32.totalorder %s1488_s22, %s1641_s5 }
  0x65   : > { %p1213_p4 = scmp.lt.u32.totalorder %s1211_s8, %s1206_s14  ;;  %p1215_p3 = scmp.lt.u32.totalorder %s1206_s14, %s1488_s22 }
  0x66   : > { %p1209_p2 = pnand %p1207_p10, %p1388_p7 }
  0x67   : > { %p1214_p0 = por %p1213_p4, %p1212_p1 }
  0x68   : > { %p1210_p5 = pneg %p1209_p2 }
  0x69   : > { %p1216_p6 = por %p1215_p3, %p1214_p0 }
  0x6b   : > { %p1217_p8 = pnand %p1216_p6, %p1210_p5 }
  0x6d   : > { %1220 = shalt.err (!%p1217_p8)
}
  0x6e   : > { %s1221_s10 = scalar_lea.vmem %s307_s9, 16  ;;  %s1283_s27 = smov [#allocation7]  }
  0x6f   : > { %p1222_p9 = scmp.ne.s32.totalorder %s307_s9, %s1221_s10  ;;  %s1226_s12 = sshll.u32 %s1283_s27, 4  ;;  %s1227_s12 = int_to_ptr.vmem [resolvable:$false] %s1226_s12 }
  0x70   : > { %s1228_s16 = scalar_lea.vmem %s1227_s12, 32  ;;  %p1229_p10 = scmp.lt.s32.totalorder %s307_s9, %s1227_s12 }
  0x71   : > { %p1224_p12 = pnand %p1222_p9, %p1388_p7  ;;  %p1230_p2 = scmp.lt.s32.totalorder %s1228_s16, %s1221_s10 }
  0x73   : > { %p1225_p13 = pneg %p1224_p12  ;;  %p1231_p11 = por %p1230_p2, %p1229_p10 }
  0x75   : > { %p1232_p1 = pnand %p1231_p11, %p1225_p13 }
  0x77   : > { %1235 = shalt.err (!%p1232_p1)
}
  0x78   : > { %p1660_p4 = scmp.ne.s32.totalorder %s1653_s17, 0  ;;  %p1661_p5 = scmp.ne.s32.totalorder %s1656_s23, 0 }
  0x79   : > { %p1662_p0 = scmp.eq.s32.totalorder (!%p1661_p5), %s1380_s18, 0 }
  0x7a   : > { %1049 = dma.hbm_to_vmem [thread:$0]  (!%p1660_p4), %s1488_s22, 16, %s307_s9, %s297_s24  }
  0x7b   : > { %323 = sbr.rel (%p1661_p5) target bundleno = 897 (0x381), region = 48 }
  0x82   : > { %1253 = dma.done.wait (%p1662_p0), [#allocation3], 16   ;;  %p1663_p7 = pmov %p1662_p0 }
  0x83   : > { %s329_s21 = sand.u32 1, %s1380_s18   ;;  %s1517_s15 = sand.u32 1, %s1270_s25  }
  0x84   : > { %1255 = vsyncadd (%p1663_p7), [#allocation3], 4294967280  ;;  %s330_s13 = scalar_lea.sflag [#allocation5], %s329_s21  ;;  %s332_s17 = scalar_lea.vmem [#allocation4], %s1517_s15 }
  0x85   : > { %p1664_p11 = scmp.ne.s32.totalorder %s1655_s20, 0 }
  0x87   : > { %1257 = dma.done.wait (%p1664_p11), %s330_s13, 32  }
  0x88   : > { %1259 = vsyncadd (%p1664_p11), %s330_s13, 4294967264  ;;  %s340_s23 = scalar_lea.vmem [#allocation6], %s1517_s15  ;;  %s346_s22 = scalar_lea.sflag [#allocation8], %s1517_s15 }
  0x89   : > { %s348_s29 = scalar_lea.vmem [#allocation7], %s1517_s15 }
  0x8a   : > { %1261 = dma.done.wait (%p1664_p11), %s346_s22, 16  }
  0x8b   : > { %1263 = vsyncadd (%p1664_p11), %s346_s22, 4294967280  ;;  %v1284_v0 = vmov 0.0   ;;  %vm1285_vm0 = vmmov 0   ;;  %v1088_v1 = vld [vmem:[%s1637_s1 + $0x40] sm:$0xff]   ;;  %v1090_v3 = vld [vmem:[%s1637_s1 + $0x48] sm:$0xff]   ;;  %p396_p3 = scmp.lt.s32.totalorder %s1380_s18, 1 }
  0x8c   : > { %1011 = vmatprep.subr.bf16.mxu1 %v1284_v0  ;;  %1015 = vmatprep.mubr.msk.bf16.mxu1 %vm1285_vm0, %v1284_v0  ;;  %v1089_v2 = vld [vmem:[%s1637_s1] sm:$0xff]   ;;  %v1091_v4 = vld [vmem:[%s1637_s1 + $0x8] sm:$0xff]   ;;  %v1092_v5 = vld [vmem:[%s1637_s1 + $0x50] sm:$0xff]   ;;  %vm582_vm1 = vcmask 261120   ;;  %vm794_vm2 = vcmask 257024  }
  0x8d   : > { %986 = vmatprep.subr.bf16.mxu0 %v1088_v1  ;;  %v1093_v6 = vld [vmem:[%s1637_s1 + $0x10] sm:$0xff]   ;;  %s1671_s18 = smov (!%p396_p3, %s1380_s18), 1  ;;  %v1094_v7 = vld [vmem:[%s1637_s1 + $0x58] sm:$0xff]   ;;  %v1096_v9 = vld [vmem:[%s1637_s1 + $0x60] sm:$0xff]  }
  0x8e   : > { %987 = vmatpush3.bf16.msra.mxu0 %v1089_v2  ;;  %v1095_v8 = vld [vmem:[%s1637_s1 + $0x18] sm:$0xff]   ;;  %s1019_s9 = smul.u32 24, %s1671_s18  ;;  %v1102_v10 = vld [vmem:[%s1637_s1 + $0x80] sm:$0xff]   ;;  %v1098_v12 = vld [vmem:[%s1637_s1 + $0x68] sm:$0xff]  }
  0x8f   : > { %988 = vmatprep.subr.bf16.mxu0 %v1090_v3  ;;  %v1097_v11 = vld [vmem:[%s1637_s1 + $0x20] sm:$0xff]   ;;  %1012 = vmatpush3.bf16.msra.mxu1 %v1102_v10  ;;  %v1099_v13 = vld [vmem:[%s1637_s1 + $0x28] sm:$0xff]   ;;  %v1100_v16 = vld [vmem:[%s1637_s1 + $0x70] sm:$0xff]  }
  0x90   : > { %s400_s10 = scalar_lea.vmem %s1636_s0, %s1019_s9  ;;  %1013 = vmatprep.subr.bf16.mxu1 %v1284_v0  ;;  %v1108_v15 = vld [vmem:[%s1637_s1 + $0x88] sm:$0xff]   ;;  %v1101_v18 = vld [vmem:[%s1637_s1 + $0x30] sm:$0xff]   ;;  %v1103_v19 = vld [vmem:[%s1637_s1 + $0x78] sm:$0xff]  }
  0x91   : > { %v1107_v14 = vld [vmem:[%s400_s10 + $0x4] ss:$12 sps:$4 sm:$0xff]   ;;  %v1109_v17 = vld [vmem:[%s400_s10 + $0x8] ss:$12 sps:$4 sm:$0xff]   ;;  %v1104_v20 = vld [vmem:[%s1637_s1 + $0x38] sm:$0xff]  }
  0x92   : > { %989 = vmatpush3.bf16.msra.mxu0 %v1091_v4  ;;  %618 = vmatprep.mubr.bf16.mxu0 %v1107_v14  ;;  %v1105_v21 = vld [vmem:[%s400_s10] ss:$12 sps:$4 sm:$0xff]  }
  0x93   : > { %990 = vmatprep.subr.bf16.mxu0 %v1092_v5  ;;  %1014 = vmatpush3.bf16.msra.mxu1 %v1108_v15  ;;  %v948_v28 = vld [vmem:[#allocation2] ss:$0 sm:$0xff] }
  0x96   : > { %991 = vmatpush3.bf16.msra.mxu0 %v1093_v6  ;;  %1016 = vmatmul.mubr.msk.bf16.vlgmr.msra.gmra.mrb[0].mxu1 %vm582_vm1, %v1109_v17 }
  0x97   : > { %992 = vmatprep.subr.bf16.mxu0 %v1094_v7 }
  0x9a   : > { %993 = vmatpush3.bf16.msra.mxu0 %v1095_v8 }
  0x9b   : > { %994 = vmatprep.subr.bf16.mxu0 %v1096_v9 }
  0x9e   : > { %995 = vmatpush3.bf16.msra.mxu0 %v1097_v11 }
  0x9f   : > { %996 = vmatprep.subr.bf16.mxu0 %v1098_v12 }
  0xa2   : > { %997 = vmatpush3.bf16.msra.mxu0 %v1099_v13 }
  0xa3   : > { %998 = vmatprep.subr.bf16.mxu0 %v1100_v16  ;;  %v736_v16 = vld [vmem:[%s348_s29] sm:$0x1]  ;;  %s978_s29 = sshll.u32 %s1671_s18, 3 }
  0xa4   : > { %s405_s24 = scalar_lea.vmem %s1642_s6, %s978_s29  ;;  %s410_s14 = scalar_lea.vmem %s1643_s7, %s978_s29 }
  0xa6   : > { %999 = vmatpush3.bf16.msra.mxu0 %v1101_v18  ;;  %v971_v18 = vmul.f32 -1.442695, %v736_v16 }
  0xa7   : > { %1000 = vmatprep.subr.bf16.mxu0 %v1103_v19 }
  0xaa   : > { %1001 = vmatpush3.bf16.msra.mxu0 %v1104_v20 }
  0xad   : > { %619 = vmatmul.mubr.bf16.vlgmr.msra.gmra.mrb[0].mxu0 %v1105_v21 }
 0x169   : > { %v661_v22 = vpop.f32.mrb[0].mxu1 }
 0x16a   : > { %v1017_v23 = vpop.f32.mrb[1].mxu1 }
 0x16b   : > { %v664_v24 = vpop.f32.mrb[2].mxu1 }
 0x16c   : > { %v1018_v25 = vpop.f32.mrb[3].mxu1 }
 0x180   : > { %v1002_v26 = vpop.f32.mrb[0].mxu0 }
 0x181   : > { %v1003_v27 = vpop.f32.mrb[1].mxu0 }
 0x182   : > { %v1004_v29 = vadd.f32 %v1003_v27, %v1002_v26  ;;  %v1005_v30 = vpop.f32.mrb[2].mxu0  ;;  %v744_v26 = vlaneseq }
 0x183   : > { %v1006_v31 = vpop.f32.mrb[3].mxu0 }
 0x184   : > { %v621_v32 = vadd.f32 %v1004_v29, %v948_v28  ;;  %v1007_v33 = vadd.f32 %v1006_v31, %v1005_v30  ;;  %v745_v27 = vshrl.u32 %v744_v26, 7 }
 0x186   : > { %v662_v34 = vadd.f32 %v661_v22, %v621_v32  ;;  %v624_v35 = vadd.f32 %v1007_v33, %v948_v28  ;;  %v746_v29 = vsub.s32 0, %v745_v27 }
 0x188   : > { %v665_v36 = vadd.f32 %v664_v24, %v624_v35  ;;  %v668_v37 = vsel %vm582_vm1, %v662_v34, 0.0 }
 0x18a   : > { %v669_v38 = vsel %vm582_vm1, %v665_v36, 0.0 }
 0x18b   : > { %v670_v39 = vadd.f32 %v669_v38, %v668_v37 }
 0x18d   : > { %697 = vadd.xlane.f32.xlu0 %v670_v39  ;;  %v671_v62 = vrot.slane %v670_v39, 4 }
 0x18f   : > { %v672_v63 = vadd.f32 %v671_v62, %v670_v39 }
 0x191   : > { %v673_v0 = vrot.slane %v672_v63, 2 }
 0x193   : > { %v674_v1 = vadd.f32 %v673_v0, %v672_v63 }
 0x195   : > { %v675_v2 = vrot.slane %v674_v1, 1 }
 0x197   : > { %v676_v3 = vadd.f32 %v675_v2, %v674_v1 }
 0x199   : > { %v678_v4 = vmul.f32 0.0625, %v676_v3 }
 0x19b   : > { %v679_v6 = vsub.f32 %v662_v34, %v678_v4  ;;  %v680_v7 = vsub.f32 %v665_v36, %v678_v4 }
 0x19d   : > { %v681_v8 = vmul.f32 %v679_v6, %v679_v6  ;;  %v682_v9 = vmul.f32 %v680_v7, %v680_v7 }
 0x19f   : > { %v683_v10 = vsel %vm582_vm1, %v681_v8, 0.0  ;;  %v684_v11 = vsel %vm582_vm1, %v682_v9, 0.0 }
 0x1a0   : > { %v685_v13 = vadd.f32 %v684_v11, %v683_v10 }
 0x1a2   : > { %v686_v14 = vrot.slane %v685_v13, 4 }
 0x1a4   : > { %v687_v15 = vadd.f32 %v686_v14, %v685_v13 }
 0x1a6   : > { %v688_v17 = vrot.slane %v687_v15, 2 }
 0x1a8   : > { %v689_v19 = vadd.f32 %v688_v17, %v687_v15 }
 0x1aa   : > { %v690_v20 = vrot.slane %v689_v19, 1 }
 0x1ac   : > { %v691_v21 = vadd.f32 %v690_v20, %v689_v19 }
 0x1ae   : > { %v692_v23 = vmul.f32 0.0625, %v691_v21 }
 0x1b0   : > { %v693_v25 = vadd.f32 1e-05, %v692_v23 }
 0x21a   : > { %v698_v40 = vpop.xlane.xlu0 %697 }
 0x21b   : > { %v699_v41 = vrot.slane %v698_v40, 4 }
 0x21d   : > { %v700_v42 = vadd.f32 %v699_v41, %v698_v40 }
 0x21f   : > { %v701_v43 = vrot.slane %v700_v42, 2 }
 0x221   : > { %v702_v44 = vadd.f32 %v701_v43, %v700_v42  ;;  %v983_v43 = vld [vmem:[%s405_s24] sm:$0xff]  }
 0x223   : > { %v703_v45 = vrot.slane %v702_v44, 1 }
 0x225   : > { %v704_v46 = vadd.f32 %v703_v45, %v702_v44  ;;  %v972_v44 = vld [vmem:[%s332_s17] ss:$0 sm:$0xff] }
 0x227   : > { %1020 = vpush %v704_v46 }
 0x258   : > { %s1021_s11 = spop %1020 }
 0x259   : > { %s708_s10 = smul.f32 0.001953125, %s1021_s11 }
 0x25b   : > { %v709_v47 = vstv %s708_s10 }
 0x25c   : > { %v1596_v48 = vsub.f32 %v662_v34, %v709_v47  ;;  %v1598_v49 = vsub.f32 %v665_v36, %v709_v47  ;;  %v973_v47 = vld [vmem:[%s340_s23] ss:$0 sm:$0xff] }
 0x25e   : > { %v712_v50 = vmul.f32 %v1596_v48, %v1596_v48  ;;  %v713_v51 = vmul.f32 %v1598_v49, %v1598_v49 }
 0x260   : > { %v714_v52 = vsel %vm582_vm1, %v712_v50, 0.0  ;;  %v715_v53 = vsel %vm582_vm1, %v713_v51, 0.0  ;;  %v984_v50 = vunpack.c.l.bf16 %v983_v43  ;;  %v985_v51 = vunpack.c.h.bf16 %v983_v43 }
 0x261   : > { %v716_v54 = vadd.f32 %v715_v53, %v714_v52 }
 0x263   : > { %717 = vadd.xlane.f32.xlu0 %v716_v54 }
 0x2f0   : > { %v718_v55 = vpop.xlane.xlu0 %717 }
 0x2f1   : > { %v719_v56 = vrot.slane %v718_v55, 4 }
 0x2f3   : > { %v720_v57 = vadd.f32 %v719_v56, %v718_v55 }
 0x2f5   : > { %v721_v58 = vrot.slane %v720_v57, 2 }
 0x2f7   : > { %v722_v59 = vadd.f32 %v721_v58, %v720_v57 }
 0x2f9   : > { %v723_v60 = vrot.slane %v722_v59, 1 }
 0x2fb   : > { %v724_v61 = vadd.f32 %v723_v60, %v722_v59 }
 0x2fd   : > { %1022 = vpush %v724_v61 }
 0x32e   : > { %s1023_s27 = spop %1022 }
 0x32f   : > { %s728_s12 = smul.f32 0.001953125, %s1023_s27 }
 0x331   : > { %s729_s16 = sadd.f32 1e-05, %s728_s12 }
 0x333   : > { %v730_v5 = vstv %s729_s16 }
 0x334   : > { %1110 = vrsqrt.f32 %v730_v5 }
 0x335   : > { %1112 = vpow2.f32 %v971_v18 }
 0x33e   : > { %v1111_v12 = vpop.eup %1110 }
 0x33f   : > { %1024 = vpush %v1111_v12  ;;  %v1113_v22 = vpop.eup %1112 }
 0x340   : > { %v740_v24 = vadd.f32 1.0, %v1113_v22 }
 0x342   : > { %1114 = vrcp.f32 %v740_v24 }
 0x343   : > { %1116 = vrsqrt.f32 %v693_v25 }
 0x34c   : > { %v1115_v28 = vpop.eup %1114 }
 0x34d   : > { %v751_v30 = vsub.f32 1.0, %v1115_v28  ;;  %v1117_v31 = vpop.eup %1116  ;;  %v747_v34 = vrot.slane %v1115_v28, %v746_v29 }
 0x34e   : > { %v695_v32 = vmul.f32 %v1117_v31, %v679_v6  ;;  %v696_v33 = vmul.f32 %v1117_v31, %v680_v7 }
 0x34f   : > { %v756_v35 = vrot.slane %v751_v30, %v746_v29 }
 0x350   : > { %v749_v39 = vmul.f32 %v747_v34, %v695_v32  ;;  %v750_v40 = vmul.f32 %v747_v34, %v696_v33 }
 0x370   : > { %s1025_s21 = spop %1024 }
 0x371   : > { %v733_v36 = vstv %s1025_s21 }
 0x372   : > { %v734_v37 = vmul.f32 %v733_v36, %v1596_v48  ;;  %v735_v38 = vmul.f32 %v733_v36, %v1598_v49 }
 0x374   : > { %v758_v41 = vmul.f32 %v756_v35, %v734_v37  ;;  %v759_v42 = vmul.f32 %v756_v35, %v735_v38 }
 0x376   : > { %v760_v45 = vadd.f32 %v758_v41, %v749_v39  ;;  %v761_v46 = vadd.f32 %v759_v42, %v750_v40 }
 0x378   : > { %v769_v52 = vmul.f32 %v972_v44, %v760_v45  ;;  %v770_v53 = vmul.f32 %v972_v44, %v761_v46 }
 0x37a   : > { %v778_v54 = vadd.f32 %v973_v47, %v769_v52  ;;  %v779_v55 = vadd.f32 %v973_v47, %v770_v53 }
 0x37c   : > { %v784_v48 = vadd.f32 %v984_v50, %v778_v54  ;;  %v785_v56 = vadd.f32 %v985_v51, %v779_v55 }
 0x37e   : > { %v980_v49 = vpack.c.bf16 %v784_v48, %v784_v48  ;;  %v981_v57 = vpack.c.bf16 %v785_v56, %v785_v56 }
 0x380   : > { %795 = vst.msk [vmem:[%s410_s14] sm:$0xf] %vm794_vm2, %v980_v49  ;;  %796 = vst.msk [vmem:[%s410_s14 + $0x4] sm:$0xf] %vm794_vm2, %v981_v57 }
 0x381 PF: > { %s1665_s15 = sld [smem:[#allocation12_spill]]  ;;  %p21_p6 = scmp.ge.s32.totalorder %s1347_s28, 4  }
 0x382   : > { %s1666_s24 = smov %s1270_s25  ;;  %s1667_s25 = smov %s1274_s26 }
 0x383   : > { %s1669_s27 = smov %s1347_s28  ;;  %23 = sbr.rel (!%p21_p6) target bundleno = 8 (0x8), region = 123 }
 0x387   : > { %s1668_s26 = smov %s1665_s15 }
 0x38a   :  { %818 = vsyncpa [#allocation3], 1 }
 0x38b   :  { %820 = vsyncpa [#allocation3 + $0x1], 1 }
 0x38c   :  { %821 = vsyncpa [#allocation5], 1 }
 0x38d   :  { %823 = vsyncpa [#allocation5 + $0x1], 1 }
 0x38e   :  { %824 = vsyncpa [#allocation8], 1 }
 0x38f   :  { %826 = vsyncpa [#allocation8 + $0x1], 1 }

// kernel: style_transfer_forward.15
= control target key start
LH: loop header
LB: loop body
LE: loop exit
PB: predicated region body
PF: predicated region fallthrough
CT: control target
= control target key end

     0   :  { %s1717_s18 = smov 0   ;;  %s1971_s0 = inlined_call_operand.vmem [shape: bf16[2,64,800], index: 0, kind: input, shape index: {}]   ;;  %s1972_s1 = inlined_call_operand.vmem [shape: bf16[800,16], index: 1, kind: input, shape index: {}]   ;;  %s1973_s2 = inlined_call_operand.vmem [shape: f32[1,16], index: 2, kind: input, shape index: {}]   ;;  %s1974_s3 = inlined_call_operand.vmem [shape: f32[1,16], index: 3, kind: input, shape index: {}]   ;;  %s1975_s4 = inlined_call_operand.vmem [shape: f32[1,16], index: 4, kind: input, shape index: {}]   ;;  %s1976_s5 = inlined_call_operand.vmem [shape: bf16[2,64,16], index: 5, kind: output, shape index: {}]  }
   0x1 LB: > { %s1304_s19 = sadd.s32 4294967295, %s1685_s18   ;;  %p1308_p0 = scmp.ge.s32.totalorder %s1685_s18, 1  ;;  %s1685_s18 = sphi %s1717_s18, %s15_s18  }
   0x2   : > { %p187_p1 = scmp.lt.s32.totalorder %s1685_s18, 3 }
   0x4   : > { %p188_p2 = pnand %p1308_p0, %p187_p1 }
   0x5   : > { %v1585_v0 = vld [vmem:[%s1972_s1 + $0x40] sm:$0xff] (!%p188_p2)   ;;  %v1589_v4 = vld [vmem:[%s1972_s1 + $0x48] sm:$0xff] (!%p188_p2)   ;;  %v1593_v8 = vld [vmem:[%s1972_s1 + $0x50] sm:$0xff] (!%p188_p2)   ;;  %p215_p3 = scmp.lt.s32.totalorder (!%p188_p2), %s1304_s19, 1  ;;  %vm805_vm0 = vcmask (!%p188_p2), 261120   ;;  %vm1078_vm1 = vcmask (!%p188_p2), 130048  }
   0x6   : > { %191 = sbr.rel (%p188_p2) target bundleno = 842 (0x34a), region = 40  ;;  %v1586_v1 = vld [vmem:[%s1972_s1 + $0xc0] sm:$0xff] (!%p188_p2)   ;;  %1416 = vmatprep.subr.bf16.mxu0 (!%p188_p2), %v1585_v0  ;;  %v1590_v5 = vld [vmem:[%s1972_s1 + $0xc8] sm:$0xff] (!%p188_p2)   ;;  %v1594_v9 = vld [vmem:[%s1972_s1 + $0xd0] sm:$0xff] (!%p188_p2)   ;;  %vm1240_vm4 = vcmask (!%p188_p2), 125952  }
   0x7   : > { %v1587_v2 = vld [vmem:[%s1972_s1] sm:$0xff] (!%p188_p2)   ;;  %1456 = vmatprep.subr.bf16.mxu1 (!%p188_p2), %v1586_v1  ;;  %v1591_v6 = vld [vmem:[%s1972_s1 + $0x8] sm:$0xff] (!%p188_p2)   ;;  %v1595_v10 = vld [vmem:[%s1972_s1 + $0x10] sm:$0xff] (!%p188_p2)  }
   0x8   : > { %v1588_v3 = vld [vmem:[%s1972_s1 + $0x80] sm:$0xff] (!%p188_p2)   ;;  %1417 = vmatpush3.bf16.msra.mxu0 (!%p188_p2), %v1587_v2  ;;  %v1592_v7 = vld [vmem:[%s1972_s1 + $0x88] sm:$0xff] (!%p188_p2)   ;;  %v1596_v11 = vld [vmem:[%s1972_s1 + $0x90] sm:$0xff] (!%p188_p2)  }
   0x9   : > { %1457 = vmatpush3.bf16.msra.mxu1 (!%p188_p2), %v1588_v3  ;;  %1418 = vmatprep.subr.bf16.mxu0 (!%p188_p2), %v1589_v4  ;;  %v1597_v12 = vld [vmem:[%s1972_s1 + $0x58] sm:$0xff] (!%p188_p2)   ;;  %v1601_v16 = vld [vmem:[%s1972_s1 + $0x60] sm:$0xff] (!%p188_p2)   ;;  %v1605_v20 = vld [vmem:[%s1972_s1 + $0x68] sm:$0xff] (!%p188_p2)  }
   0xa   : > { %1458 = vmatprep.subr.bf16.mxu1 (!%p188_p2), %v1590_v5  ;;  %v1598_v13 = vld [vmem:[%s1972_s1 + $0xd8] sm:$0xff] (!%p188_p2)   ;;  %v1602_v17 = vld [vmem:[%s1972_s1 + $0xe0] sm:$0xff] (!%p188_p2)   ;;  %v1606_v21 = vld [vmem:[%s1972_s1 + $0xe8] sm:$0xff] (!%p188_p2)  }
   0xb   : > { %v1599_v14 = vld [vmem:[%s1972_s1 + $0x18] sm:$0xff] (!%p188_p2)   ;;  %v1603_v18 = vld [vmem:[%s1972_s1 + $0x20] sm:$0xff] (!%p188_p2)   ;;  %v1607_v22 = vld [vmem:[%s1972_s1 + $0x28] sm:$0xff] (!%p188_p2)  }
   0xc   : > { %1419 = vmatpush3.bf16.msra.mxu0 (!%p188_p2), %v1591_v6  ;;  %v1600_v15 = vld [vmem:[%s1972_s1 + $0x98] sm:$0xff] (!%p188_p2)   ;;  %v1604_v19 = vld [vmem:[%s1972_s1 + $0xa0] sm:$0xff] (!%p188_p2)   ;;  %v1608_v23 = vld [vmem:[%s1972_s1 + $0xa8] sm:$0xff] (!%p188_p2)  }
   0xd   : > { %1459 = vmatpush3.bf16.msra.mxu1 %v1592_v7  ;;  %1420 = vmatprep.subr.bf16.mxu0 %v1593_v8  ;;  %s1978_s19 = smov (!%p215_p3, %s1304_s19), 1  ;;  %v1609_v24 = vld [vmem:[%s1972_s1 + $0x70] sm:$0xff]   ;;  %v1613_v28 = vld [vmem:[%s1972_s1 + $0x78] sm:$0xff]   ;;  %v1623_v36 = vld [vmem:[%s1972_s1 + $0x140] sm:$0xff]  }
   0xe   : > { %1460 = vmatprep.subr.bf16.mxu1 %v1594_v9  ;;  %v1610_v25 = vld [vmem:[%s1972_s1 + $0xf0] sm:$0xff]   ;;  %s1570_s26 = smul.u32 224, %s1978_s19  ;;  %v1614_v29 = vld [vmem:[%s1972_s1 + $0xf8] sm:$0xff]   ;;  %v1624_v37 = vld [vmem:[%s1972_s1 + $0x100] sm:$0xff]   ;;  %s1407_s22 = sshll.u32 %s1978_s19, 5 }
   0xf   : > { %v1611_v26 = vld [vmem:[%s1972_s1 + $0x30] sm:$0xff]   ;;  %v1615_v30 = vld [vmem:[%s1972_s1 + $0x38] sm:$0xff]   ;;  %v1625_v38 = vld [vmem:[%s1972_s1 + $0x148] sm:$0xff]   ;;  %s224_s25 = scalar_lea.vmem %s1976_s5, %s1407_s22 }
  0x10   : > { %1421 = vmatpush3.bf16.msra.mxu0 %v1595_v10  ;;  %v1612_v27 = vld [vmem:[%s1972_s1 + $0xb0] sm:$0xff]   ;;  %s1825_s12 = scalar_lea.vmem %s1971_s0, %s1570_s26  ;;  %v1616_v31 = vld [vmem:[%s1972_s1 + $0xb8] sm:$0xff]   ;;  %v1626_v39 = vld [vmem:[%s1972_s1 + $0x108] sm:$0xff]  }
  0x11   : > { %1461 = vmatpush3.bf16.msra.mxu1 %v1596_v11  ;;  %1422 = vmatprep.subr.bf16.mxu0 %v1597_v12  ;;  %v1617_v32 = vld [vmem:[%s1825_s12] ss:$28 sps:$4 sm:$0xff]   ;;  %v1620_v34 = vld [vmem:[%s1825_s12 + $0x8] ss:$28 sps:$4 sm:$0xff]   ;;  %v1631_v42 = vld [vmem:[%s1825_s12 + $0x38] ss:$28 sps:$4 sm:$0xff]  }
  0x12   : > { %1462 = vmatprep.subr.bf16.mxu1 %v1598_v13  ;;  %v1619_v33 = vld [vmem:[%s1825_s12 + $0x4] ss:$28 sps:$4 sm:$0xff]   ;;  %v1622_v35 = vld [vmem:[%s1825_s12 + $0xc] ss:$28 sps:$4 sm:$0xff]   ;;  %v1627_v40 = vld [vmem:[%s1825_s12 + $0x3c] ss:$28 sps:$4 sm:$0xff]  }
  0x13   : > { %850 = vmatprep.mubr.bf16.mxu0 %v1619_v33  ;;  %915 = vmatprep.mubr.bf16.mxu1 %v1622_v35  ;;  %v1629_v41 = vld [vmem:[%s1825_s12 + $0x44] ss:$28 sps:$4 sm:$0xff]   ;;  %v1633_v44 = vld [vmem:[%s1972_s1 + $0x150] sm:$0xff]   ;;  %v1635_v46 = vld [vmem:[%s1972_s1 + $0x158] sm:$0xff]  }
  0x14   : > { %1423 = vmatpush3.bf16.msra.mxu0 %v1599_v14  ;;  %v1632_v43 = vld [vmem:[%s1825_s12 + $0x40] ss:$28 sps:$4 sm:$0xff]   ;;  %v1634_v45 = vld [vmem:[%s1972_s1 + $0x110] sm:$0xff]   ;;  %v1645_v54 = vld [vmem:[%s1972_s1 + $0x168] sm:$0xff]  }
  0x15   : > { %1463 = vmatpush3.bf16.msra.mxu1 %v1600_v15  ;;  %1424 = vmatprep.subr.bf16.mxu0 %v1601_v16  ;;  %v1636_v47 = vld [vmem:[%s1972_s1 + $0x118] sm:$0xff]   ;;  %v1637_v48 = vld [vmem:[%s1825_s12 + $0x74] ss:$28 sps:$4 sm:$0xff]   ;;  %v1643_v51 = vld [vmem:[%s1972_s1 + $0x160] sm:$0xff]  }
  0x16   : > { %1464 = vmatprep.subr.bf16.mxu1 %v1602_v17  ;;  %v1639_v49 = vld [vmem:[%s1825_s12 + $0x7c] ss:$28 sps:$4 sm:$0xff]   ;;  %v1641_v50 = vld [vmem:[%s1825_s12 + $0x70] ss:$28 sps:$4 sm:$0xff]   ;;  %v1644_v53 = vld [vmem:[%s1972_s1 + $0x120] sm:$0xff]  }
  0x17   : > { %v1642_v52 = vld [vmem:[%s1825_s12 + $0x78] ss:$28 sps:$4 sm:$0xff]   ;;  %v1647_v55 = vld [vmem:[%s1825_s12 + $0xac] ss:$28 sps:$4 sm:$0xff]   ;;  %v1663_v2 = vld [vmem:[%s1972_s1 + $0x180] sm:$0xff]  }
  0x18   : > { %1425 = vmatpush3.bf16.msra.mxu0 %v1603_v18  ;;  %v1649_v56 = vld [vmem:[%s1825_s12 + $0xb4] ss:$28 sps:$4 sm:$0xff]   ;;  %v1646_v57 = vld [vmem:[%s1972_s1 + $0x128] sm:$0xff]   ;;  %v1655_v62 = vld [vmem:[%s1972_s1 + $0x178] sm:$0xff]  }
  0x19   : > { %1465 = vmatpush3.bf16.msra.mxu1 %v1604_v19  ;;  %1426 = vmatprep.subr.bf16.mxu0 %v1605_v20  ;;  %v1653_v58 = vld [vmem:[%s1972_s1 + $0x170] sm:$0xff]   ;;  %v1651_v59 = vld [vmem:[%s1825_s12 + $0xa8] ss:$28 sps:$4 sm:$0xff]   ;;  %v1662_v0 = vld [vmem:[%s1825_s12 + $0xbc] ss:$28 sps:$4 sm:$0xff]  }
  0x1a   : > { %1466 = vmatprep.subr.bf16.mxu1 %v1606_v21  ;;  %v1652_v60 = vld [vmem:[%s1825_s12 + $0xb0] ss:$28 sps:$4 sm:$0xff]   ;;  %v1656_v1 = vld [vmem:[%s1972_s1 + $0x138] sm:$0xff]   ;;  %v1668_v8 = vld [vmem:[%s1825_s12 + $0x48] ss:$28 sps:$4 sm:$0xff]  }
  0x1b   : > { %v1654_v61 = vld [vmem:[%s1972_s1 + $0x130] sm:$0xff]   ;;  %v1665_v5 = vld [vmem:[%s1825_s12 + $0x4c] ss:$28 sps:$4 sm:$0xff]   ;;  %v1670_v10 = vld [vmem:[%s1825_s12 + $0x84] ss:$28 sps:$4 sm:$0xff]  }
  0x1c   : > { %1427 = vmatpush3.bf16.msra.mxu0 %v1607_v22  ;;  %v1659_v63 = vld [vmem:[%s1825_s12 + $0x14] ss:$28 sps:$4 sm:$0xff]   ;;  %v1664_v7 = vld [vmem:[%s1972_s1 + $0x188] sm:$0xff]   ;;  %v1673_v12 = vld [vmem:[%s1825_s12 + $0x80] ss:$28 sps:$4 sm:$0xff]  }
  0x1d   : > { %1467 = vmatpush3.bf16.msra.mxu1 %v1608_v23  ;;  %1428 = vmatprep.subr.bf16.mxu0 %v1609_v24  ;;  %v1657_v3 = vld [vmem:[%s1825_s12 + $0x10] ss:$28 sps:$4 sm:$0xff]   ;;  %v1660_v4 = vld [vmem:[%s1825_s12 + $0xb8] ss:$28 sps:$4 sm:$0xff]   ;;  %v1672_v11 = vld [vmem:[%s1825_s12 + $0x88] ss:$28 sps:$4 sm:$0xff]  }
  0x1e   : > { %1468 = vmatprep.subr.bf16.mxu1 %v1610_v25  ;;  %v1667_v6 = vld [vmem:[%s1825_s12 + $0x18] ss:$28 sps:$4 sm:$0xff]   ;;  %v1669_v9 = vld [vmem:[%s1825_s12 + $0x50] ss:$28 sps:$4 sm:$0xff]   ;;  %v1674_v13 = vld [vmem:[%s1825_s12 + $0xc0] ss:$28 sps:$4 sm:$0xff]  }
  0x1f   : > { %v1312_v15 = vld [vmem:[%s1973_s2] ss:$0 sm:$0xff] }
  0x20   : > { %1429 = vmatpush3.bf16.msra.mxu0 %v1611_v26 }
  0x21   : > { %1469 = vmatpush3.bf16.msra.mxu1 %v1612_v27  ;;  %1430 = vmatprep.subr.bf16.mxu0 %v1613_v28 }
  0x22   : > { %1470 = vmatprep.subr.bf16.mxu1 %v1614_v29 }
  0x24   : > { %1431 = vmatpush3.bf16.msra.mxu0 %v1615_v30 }
  0x25   : > { %1471 = vmatpush3.bf16.msra.mxu1 %v1616_v31  ;;  %1496 = vmatprep.subr.bf16.mxu0 %v1623_v36 }
  0x26   : > { %1554 = vmatprep.subr.bf16.mxu1 %v1623_v36 }
  0x27   : > { %851 = vmatmul.mubr.bf16.vlgmr.msra.gmra.mrb[0].mxu0 %v1617_v32 }
  0x28   : > { %916 = vmatmul.mubr.bf16.vlgmr.msra.gmra.mrb[0].mxu1 %v1620_v34  ;;  %1497 = vmatpush3.bf16.msra.mxu0 %v1624_v37 }
  0x29   : > { %1562 = vmatpush3.bf16.msra.mxu1 %v1624_v37  ;;  %1498 = vmatprep.subr.bf16.mxu0 %v1625_v38 }
  0x2a   : > { %1555 = vmatprep.subr.bf16.mxu1 %v1625_v38  ;;  %858 = vmatprep.mubr.bf16.mxu0 %v1627_v40 }
  0x2b   : > { %923 = vmatprep.mubr.bf16.mxu1 %v1629_v41 }
  0x2c   : > { %1499 = vmatpush3.bf16.msra.mxu0 %v1626_v39 }
  0x2d   : > { %1563 = vmatpush3.bf16.msra.mxu1 %v1626_v39  ;;  %1500 = vmatprep.subr.bf16.mxu0 %v1633_v44 }
  0x2e   : > { %1556 = vmatprep.subr.bf16.mxu1 %v1633_v44 }
  0x2f   : > { %859 = vmatmul.mubr.bf16.gmra.mrb[4].mxu0 %v1631_v42 }
  0x30   : > { %924 = vmatmul.mubr.bf16.gmra.mrb[4].mxu1 %v1632_v43  ;;  %1501 = vmatpush3.bf16.msra.mxu0 %v1634_v45 }
  0x31   : > { %1564 = vmatpush3.bf16.msra.mxu1 %v1634_v45  ;;  %1502 = vmatprep.subr.bf16.mxu0 %v1635_v46 }
  0x32   : > { %1557 = vmatprep.subr.bf16.mxu1 %v1635_v46  ;;  %866 = vmatprep.mubr.bf16.mxu0 %v1637_v48 }
  0x33   : > { %931 = vmatprep.mubr.bf16.mxu1 %v1639_v49 }
  0x34   : > { %1503 = vmatpush3.bf16.msra.mxu0 %v1636_v47 }
  0x35   : > { %1565 = vmatpush3.bf16.msra.mxu1 %v1636_v47  ;;  %1504 = vmatprep.subr.bf16.mxu0 %v1643_v51 }
  0x36   : > { %1558 = vmatprep.subr.bf16.mxu1 %v1643_v51 }
  0x37   : > { %867 = vmatmul.mubr.bf16.gmra.mrb[8].mxu0 %v1641_v50 }
  0x38   : > { %932 = vmatmul.mubr.bf16.gmra.mrb[8].mxu1 %v1642_v52  ;;  %1505 = vmatpush3.bf16.msra.mxu0 %v1644_v53 }
  0x39   : > { %874 = vmatprep.mubr.bf16.mxu0 %v1647_v55  ;;  %1566 = vmatpush3.bf16.msra.mxu1 %v1644_v53 }
  0x3a   : > { %1506 = vmatprep.subr.bf16.mxu0 %v1645_v54  ;;  %1559 = vmatprep.subr.bf16.mxu1 %v1645_v54 }
  0x3b   : > { %939 = vmatprep.mubr.bf16.mxu1 %v1649_v56 }
  0x3c   : > { %1507 = vmatpush3.bf16.msra.mxu0 %v1646_v57 }
  0x3d   : > { %1567 = vmatpush3.bf16.msra.mxu1 %v1646_v57  ;;  %1508 = vmatprep.subr.bf16.mxu0 %v1653_v58 }
  0x3e   : > { %1560 = vmatprep.subr.bf16.mxu1 %v1653_v58 }
  0x3f   : > { %875 = vmatmul.mubr.bf16.gmra.mrb[12].mxu0 %v1651_v59 }
  0x40   : > { %940 = vmatmul.mubr.bf16.gmra.mrb[12].mxu1 %v1652_v60  ;;  %980 = vmatprep.mubr.bf16.mxu0 %v1659_v63 }
  0x41   : > { %1509 = vmatpush3.bf16.msra.mxu0 %v1654_v61  ;;  %1568 = vmatpush3.bf16.msra.mxu1 %v1654_v61 }
  0x42   : > { %1510 = vmatprep.subr.bf16.mxu0 %v1655_v62  ;;  %1561 = vmatprep.subr.bf16.mxu1 %v1655_v62 }
  0x43   : > { %1004 = vmatprep.mubr.bf16.mxu1 %v1662_v0 }
  0x45   : > { %1511 = vmatpush3.bf16.msra.mxu0 %v1656_v1  ;;  %1569 = vmatpush3.bf16.msra.mxu1 %v1656_v1 }
  0x46   : > { %1542 = vmatprep.subr.bf16.mxu1 %v1663_v2 }
  0x48   : > { %981 = vmatmul.mubr.bf16.vlgmr.msra.gmra.mrb[16].mxu0 %v1657_v3  ;;  %1005 = vmatmul.mubr.bf16.vlgmr.msra.gmra.mrb[16].mxu1 %v1660_v4 }
  0x49   : > { %988 = vmatprep.mubr.bf16.mxu0 %v1665_v5  ;;  %1543 = vmatpush3.bf16.msra.mxu1 %v1663_v2 }
  0x4a   : > { %1546 = vmatprep.mubr.msk.bf16.mxu1 %vm805_vm0, %v1667_v6  ;;  %1544 = vmatprep.subr.bf16.mxu1 %v1664_v7 }
  0x4d   : > { %1545 = vmatpush3.bf16.msra.mxu1 %v1664_v7 }
  0x50   : > { %989 = vmatmul.mubr.bf16.gmra.mrb[20].mxu0 %v1668_v8  ;;  %1547 = vmatmul.mubr.msk.bf16.vlgmr.msra.gmra.mrb[20].mxu1 %vm805_vm0, %v1669_v9 }
  0x51   : > { %996 = vmatprep.mubr.bf16.mxu0 %v1670_v10  ;;  %1550 = vmatprep.mubr.msk.bf16.mxu1 %vm805_vm0, %v1672_v11 }
  0x58   : > { %997 = vmatmul.mubr.bf16.gmra.mrb[24].mxu0 %v1673_v12  ;;  %1551 = vmatmul.mubr.msk.bf16.gmra.mrb[24].mxu1 %vm805_vm0, %v1674_v13 }
  0xfa   : > { %v1432_v14 = vpop.f32.mrb[0].mxu0 }
  0xfb   : > { %v1433_v16 = vpop.f32.mrb[1].mxu0  ;;  %v1472_v17 = vpop.f32.mrb[0].mxu1 }
  0xfc   : > { %v1434_v18 = vadd.f32 %v1433_v16, %v1432_v14  ;;  %v1435_v19 = vpop.f32.mrb[2].mxu0  ;;  %v1473_v20 = vpop.f32.mrb[1].mxu1 }
  0xfd   : > { %v1436_v21 = vpop.f32.mrb[3].mxu0  ;;  %v1474_v22 = vadd.f32 %v1473_v20, %v1472_v17  ;;  %v1475_v23 = vpop.f32.mrb[2].mxu1 }
  0xfe   : > { %v853_v24 = vadd.f32 %v1434_v18, %v1312_v15  ;;  %v1437_v25 = vadd.f32 %v1436_v21, %v1435_v19  ;;  %v1476_v26 = vpop.f32.mrb[3].mxu1 }
  0xff   : > { %v1477_v27 = vadd.f32 %v1476_v26, %v1475_v23 }
 0x100   : > { %v856_v28 = vadd.f32 %v1437_v25, %v1312_v15  ;;  %v918_v29 = vadd.f32 %v1474_v22, %v853_v24 }
 0x102   : > { %v1922_v30 = vadd.f32 %v1477_v27, %v856_v28  ;;  %v1438_v31 = vpop.f32.mrb[4].mxu0 }
 0x103   : > { %v1439_v32 = vpop.f32.mrb[5].mxu0  ;;  %v1478_v33 = vpop.f32.mrb[4].mxu1 }
 0x104   : > { %v1440_v34 = vadd.f32 %v1439_v32, %v1438_v31  ;;  %v1441_v35 = vpop.f32.mrb[6].mxu0  ;;  %v1479_v36 = vpop.f32.mrb[5].mxu1 }
 0x105   : > { %v1442_v37 = vpop.f32.mrb[7].mxu0  ;;  %v1480_v38 = vadd.f32 %v1479_v36, %v1478_v33  ;;  %v1481_v39 = vpop.f32.mrb[6].mxu1 }
 0x106   : > { %v861_v40 = vadd.f32 %v1440_v34, %v1312_v15  ;;  %v1443_v41 = vadd.f32 %v1442_v37, %v1441_v35  ;;  %v1482_v42 = vpop.f32.mrb[7].mxu1 }
 0x107   : > { %v1483_v43 = vadd.f32 %v1482_v42, %v1481_v39 }
 0x108   : > { %v864_v44 = vadd.f32 %v1443_v41, %v1312_v15  ;;  %v926_v45 = vadd.f32 %v1480_v38, %v861_v40 }
 0x10a   : > { %v1924_v46 = vadd.f32 %v1483_v43, %v864_v44  ;;  %v1444_v47 = vpop.f32.mrb[8].mxu0 }
 0x10b   : > { %v1445_v48 = vpop.f32.mrb[9].mxu0  ;;  %v1484_v49 = vpop.f32.mrb[8].mxu1 }
 0x10c   : > { %v1446_v50 = vadd.f32 %v1445_v48, %v1444_v47  ;;  %v1447_v51 = vpop.f32.mrb[10].mxu0  ;;  %v1485_v52 = vpop.f32.mrb[9].mxu1 }
 0x10d   : > { %v1448_v53 = vpop.f32.mrb[11].mxu0  ;;  %v1486_v54 = vadd.f32 %v1485_v52, %v1484_v49  ;;  %v1487_v55 = vpop.f32.mrb[10].mxu1 }
 0x10e   : > { %v869_v56 = vadd.f32 %v1446_v50, %v1312_v15  ;;  %v1449_v57 = vadd.f32 %v1448_v53, %v1447_v51  ;;  %v1488_v58 = vpop.f32.mrb[11].mxu1 }
 0x10f   : > { %v1489_v59 = vadd.f32 %v1488_v58, %v1487_v55 }
 0x110   : > { %v872_v60 = vadd.f32 %v1449_v57, %v1312_v15  ;;  %v1926_v61 = vadd.f32 %v1486_v54, %v869_v56 }
 0x112   : > { %v1928_v62 = vadd.f32 %v1489_v59, %v872_v60  ;;  %v1450_v63 = vpop.f32.mrb[12].mxu0 }
 0x113   : > { %v1451_v0 = vpop.f32.mrb[13].mxu0  ;;  %v1490_v1 = vpop.f32.mrb[12].mxu1 }
 0x114   : > { %v1452_v2 = vadd.f32 %v1451_v0, %v1450_v63  ;;  %v1453_v3 = vpop.f32.mrb[14].mxu0  ;;  %v1491_v4 = vpop.f32.mrb[13].mxu1 }
 0x115   : > { %v1454_v5 = vpop.f32.mrb[15].mxu0  ;;  %v1492_v6 = vadd.f32 %v1491_v4, %v1490_v1  ;;  %v1493_v7 = vpop.f32.mrb[14].mxu1 }
 0x116   : > { %v877_v8 = vadd.f32 %v1452_v2, %v1312_v15  ;;  %v1455_v9 = vadd.f32 %v1454_v5, %v1453_v3  ;;  %v1494_v10 = vpop.f32.mrb[15].mxu1 }
 0x117   : > { %v1495_v11 = vadd.f32 %v1494_v10, %v1493_v7 }
 0x118   : > { %v880_v12 = vadd.f32 %v1455_v9, %v1312_v15  ;;  %v942_v13 = vadd.f32 %v1492_v6, %v877_v8 }
 0x11a   : > { %v945_v14 = vadd.f32 %v1495_v11, %v880_v12 }
 0x11b   : > { %v1512_v16 = vpop.f32.mrb[16].mxu0  ;;  %v1530_v17 = vpop.f32.mrb[16].mxu1 }
 0x11c   : > { %v1513_v18 = vpop.f32.mrb[17].mxu0  ;;  %v1531_v20 = vpop.f32.mrb[17].mxu1 }
 0x11d   : > { %v1514_v19 = vadd.f32 %v1513_v18, %v1512_v16  ;;  %v1515_v21 = vpop.f32.mrb[18].mxu0  ;;  %v1532_v22 = vadd.f32 %v1531_v20, %v1530_v17  ;;  %v1533_v23 = vpop.f32.mrb[18].mxu1 }
 0x11e   : > { %v1516_v24 = vpop.f32.mrb[19].mxu0  ;;  %v1534_v26 = vpop.f32.mrb[19].mxu1 }
 0x11f   : > { %v1517_v25 = vadd.f32 %v1516_v24, %v1515_v21  ;;  %v983_v27 = vadd.f32 %v1514_v19, %v918_v29  ;;  %v1535_v28 = vadd.f32 %v1534_v26, %v1533_v23  ;;  %v1007_v31 = vadd.f32 %v1532_v22, %v942_v13 }
 0x121   : > { %v986_v32 = vadd.f32 %v1517_v25, %v1922_v30  ;;  %v1010_v33 = vadd.f32 %v1535_v28, %v945_v14 }
 0x123   : > { %v1518_v15 = vpop.f32.mrb[20].mxu0  ;;  %v1548_v34 = vpop.f32.mrb[20].mxu1 }
 0x124   : > { %v1519_v35 = vpop.f32.mrb[21].mxu0  ;;  %v1047_v37 = vpop.f32.mrb[21].mxu1 }
 0x125   : > { %v1520_v36 = vadd.f32 %v1519_v35, %v1518_v15  ;;  %v1521_v38 = vpop.f32.mrb[22].mxu0  ;;  %v1048_v39 = vadd.f32 %v1047_v37, %v983_v27  ;;  %v1549_v40 = vpop.f32.mrb[22].mxu1 }
 0x126   : > { %v1522_v41 = vpop.f32.mrb[23].mxu0  ;;  %v1050_v44 = vpop.f32.mrb[23].mxu1 }
 0x127   : > { %v991_v42 = vadd.f32 %v1520_v36, %v926_v45  ;;  %v1523_v43 = vadd.f32 %v1522_v41, %v1521_v38  ;;  %v1051_v47 = vadd.f32 %v1050_v44, %v986_v32  ;;  %v1079_v30 = vsel %vm1078_vm1, %v1048_v39, 0.0 }
 0x129   : > { %v1056_v29 = vadd.f32 %v1548_v34, %v991_v42  ;;  %v994_v48 = vadd.f32 %v1523_v43, %v1924_v46  ;;  %v1080_v49 = vsel %vm1078_vm1, %v1051_v47, 0.0 }
 0x12a   : > { %v1081_v51 = vadd.f32 %v1080_v49, %v1079_v30 }
 0x12b   : > { %v1059_v50 = vadd.f32 %v1549_v40, %v994_v48  ;;  %v1082_v52 = vsel %vm1078_vm1, %v1056_v29, 0.0  ;;  %v1524_v53 = vpop.f32.mrb[24].mxu0  ;;  %v1552_v54 = vpop.f32.mrb[24].mxu1 }
 0x12c   : > { %v1525_v55 = vpop.f32.mrb[25].mxu0  ;;  %v1072_v56 = vadd.f32 %v1552_v54, %v1007_v31  ;;  %v1063_v57 = vpop.f32.mrb[25].mxu1  ;;  %v1083_v59 = vadd.f32 %v1082_v52, %v1081_v51 }
 0x12d   : > { %v1526_v45 = vadd.f32 %v1525_v55, %v1524_v53  ;;  %v1527_v58 = vpop.f32.mrb[26].mxu0  ;;  %v1553_v60 = vpop.f32.mrb[26].mxu1  ;;  %v1084_v0 = vsel %vm1078_vm1, %v1059_v50, 0.0 }
 0x12e   : > { %v1528_v63 = vpop.f32.mrb[27].mxu0  ;;  %v1075_v1 = vadd.f32 %v1553_v60, %v1010_v33  ;;  %v1066_v2 = vpop.f32.mrb[27].mxu1  ;;  %v1085_v5 = vadd.f32 %v1084_v0, %v1083_v59  ;;  %v1090_v12 = vsel %vm1078_vm1, %v1072_v56, 0.0 }
 0x12f   : > { %v999_v46 = vadd.f32 %v1526_v45, %v1926_v61  ;;  %v1529_v3 = vadd.f32 %v1528_v63, %v1527_v58 }
 0x130   : > { %v1092_v61 = vsel %vm1078_vm1, %v1075_v1, 0.0 }
 0x131   : > { %v1064_v4 = vadd.f32 %v1063_v57, %v999_v46  ;;  %v1002_v6 = vadd.f32 %v1529_v3, %v1928_v62 }
 0x133   : > { %v1086_v7 = vsel %vm1078_vm1, %v1064_v4, 0.0  ;;  %v1067_v9 = vadd.f32 %v1066_v2, %v1002_v6  ;;  %v1395_v6 = vld [vmem:[%s1974_s3] ss:$0 sm:$0xff] }
 0x134   : > { %v1087_v8 = vadd.f32 %v1086_v7, %v1085_v5 }
 0x135   : > { %v1088_v10 = vsel %vm1078_vm1, %v1067_v9, 0.0 }
 0x136   : > { %v1089_v11 = vadd.f32 %v1088_v10, %v1087_v8 }
 0x138   : > { %v1091_v13 = vadd.f32 %v1090_v12, %v1089_v11 }
 0x13a   : > { %v1093_v14 = vadd.f32 %v1092_v61, %v1091_v13 }
 0x13c   : > { %1094 = vadd.xlane.f32.xlu0 %v1093_v14  ;;  %v1396_v14 = vld [vmem:[%s1975_s4] ss:$0 sm:$0xff] }
 0x1c9   : > { %v1095_v16 = vpop.xlane.xlu0 %1094 }
 0x1ca   : > { %v1096_v17 = vrot.slane %v1095_v16, 4 }
 0x1cc   : > { %v1097_v18 = vadd.f32 %v1096_v17, %v1095_v16 }
 0x1ce   : > { %v1098_v19 = vrot.slane %v1097_v18, 2 }
 0x1d0   : > { %v1099_v20 = vadd.f32 %v1098_v19, %v1097_v18 }
 0x1d2   : > { %v1100_v62 = vrot.slane %v1099_v20, 1 }
 0x1d4   : > { %v1101_v21 = vadd.f32 %v1100_v62, %v1099_v20 }
 0x1d6   : > { %1571 = vpush %v1101_v21 }
 0x207   : > { %s1572_s12 = spop %1571 }
 0x208   : > { %s1105_s10 = smul.f32 0.0009765625, %s1572_s12 }
 0x20a   : > { %v1106_v22 = vstv %s1105_s10 }
 0x20b   : > { %v1107_v23 = vsub.f32 %v1048_v39, %v1106_v22  ;;  %v1108_v24 = vsub.f32 %v1051_v47, %v1106_v22  ;;  %v1109_v25 = vsub.f32 %v1056_v29, %v1106_v22  ;;  %v1110_v26 = vsub.f32 %v1059_v50, %v1106_v22 }
 0x20c   : > { %v1111_v27 = vsub.f32 %v1064_v4, %v1106_v22  ;;  %v1112_v33 = vsub.f32 %v1067_v9, %v1106_v22  ;;  %v1113_v37 = vsub.f32 %v1072_v56, %v1106_v22  ;;  %v1114_v39 = vsub.f32 %v1075_v1, %v1106_v22 }
 0x20d   : > { %v1115_v28 = vmul.f32 %v1107_v23, %v1107_v23  ;;  %v1116_v31 = vmul.f32 %v1108_v24, %v1108_v24  ;;  %v1117_v32 = vmul.f32 %v1109_v25, %v1109_v25  ;;  %v1118_v15 = vmul.f32 %v1110_v26, %v1110_v26 }
 0x20e   : > { %v1119_v38 = vmul.f32 %v1111_v27, %v1111_v27  ;;  %v1120_v42 = vmul.f32 %v1112_v33, %v1112_v33  ;;  %v1121_v47 = vmul.f32 %v1113_v37, %v1113_v37  ;;  %v1122_v30 = vmul.f32 %v1114_v39, %v1114_v39 }
 0x20f   : > { %v1123_v34 = vsel %vm1078_vm1, %v1115_v28, 0.0  ;;  %v1124_v35 = vsel %vm1078_vm1, %v1116_v31, 0.0  ;;  %v1126_v40 = vsel %vm1078_vm1, %v1117_v32, 0.0  ;;  %v1128_v43 = vsel %vm1078_vm1, %v1118_v15, 0.0 }
 0x210   : > { %v1125_v36 = vadd.f32 %v1124_v35, %v1123_v34  ;;  %v1130_v29 = vsel %vm1078_vm1, %v1119_v38, 0.0  ;;  %v1132_v49 = vsel %vm1078_vm1, %v1120_v42, 0.0  ;;  %v1134_v51 = vsel %vm1078_vm1, %v1121_v47, 0.0 }
 0x211   : > { %v1136_v53 = vsel %vm1078_vm1, %v1122_v30, 0.0 }
 0x212   : > { %v1127_v41 = vadd.f32 %v1126_v40, %v1125_v36 }
 0x214   : > { %v1129_v44 = vadd.f32 %v1128_v43, %v1127_v41 }
 0x216   : > { %v1131_v48 = vadd.f32 %v1130_v29, %v1129_v44 }
 0x218   : > { %v1133_v50 = vadd.f32 %v1132_v49, %v1131_v48 }
 0x21a   : > { %v1135_v52 = vadd.f32 %v1134_v51, %v1133_v50 }
 0x21c   : > { %v1137_v54 = vadd.f32 %v1136_v53, %v1135_v52 }
 0x21e   : > { %1138 = vadd.xlane.f32.xlu0 %v1137_v54 }
 0x2ab   : > { %v1139_v55 = vpop.xlane.xlu0 %1138 }
 0x2ac   : > { %v1140_v56 = vrot.slane %v1139_v55, 4 }
 0x2ae   : > { %v1141_v45 = vadd.f32 %v1140_v56, %v1139_v55 }
 0x2b0   : > { %v1142_v57 = vrot.slane %v1141_v45, 2 }
 0x2b2   : > { %v1143_v58 = vadd.f32 %v1142_v57, %v1141_v45 }
 0x2b4   : > { %v1144_v59 = vrot.slane %v1143_v58, 1 }
 0x2b6   : > { %v1145_v60 = vadd.f32 %v1144_v59, %v1143_v58 }
 0x2b8   : > { %1573 = vpush %v1145_v60 }
 0x2e9   : > { %s1574_s11 = spop %1573 }
 0x2ea   : > { %s1149_s13 = smul.f32 0.0009775171, %s1574_s11 }
 0x2ec   : > { %v1150_v63 = vstv %s1149_s13 }
 0x2ed   : > { %1675 = vrsqrt.f32 %v1150_v63  ;;  %vm1153_vm2 = vcmp.eq.f32.partialorder %v1150_v63, inf  ;;  %v1156_v1 = vand.u32 2147483648, %v1150_v63  ;;  %vm1155_vm3 = vcmp.eq.f32.partialorder %v1150_v63, 0.0 }
 0x2f7   : > { %v1676_v46 = vpop.eup %1675 }
 0x2f8   : > { %v1152_v0 = vmul.f32 %v1676_v46, %v1150_v63 }
 0x2fa   : > { %v1154_v2 = vsel %vm1153_vm2, %v1150_v63, %v1152_v0 }
 0x2fb   : > { %v1157_v3 = vsel %vm1155_vm3, %v1156_v1, %v1154_v2 }
 0x2fc   : > { %1575 = vpush %v1157_v3 }
 0x32d   : > { %s1576_s14 = spop %1575 }
 0x32e   : > { %s1159_s15 = sadd.f32 1e-05, %s1576_s14 }
 0x330   : > { %v1160_v4 = vstv %s1159_s15 }
 0x331   : > { %1677 = vrcp.f32 %v1160_v4 }
 0x33b   : > { %v1678_v5 = vpop.eup %1677 }
 0x33c   : > { %v1162_v7 = vmul.f32 %v1678_v5, %v1107_v23  ;;  %v1163_v8 = vmul.f32 %v1678_v5, %v1108_v24  ;;  %v1164_v9 = vmul.f32 %v1678_v5, %v1109_v25  ;;  %v1165_v10 = vmul.f32 %v1678_v5, %v1110_v26 }
 0x33d   : > { %v1166_v11 = vmul.f32 %v1678_v5, %v1111_v27  ;;  %v1167_v12 = vmul.f32 %v1678_v5, %v1112_v33  ;;  %v1168_v13 = vmul.f32 %v1678_v5, %v1113_v37  ;;  %v1169_v61 = vmul.f32 %v1678_v5, %v1114_v39 }
 0x33e   : > { %v1177_v16 = vmul.f32 %v1395_v6, %v1162_v7  ;;  %v1178_v17 = vmul.f32 %v1395_v6, %v1163_v8  ;;  %v1179_v18 = vmul.f32 %v1395_v6, %v1164_v9  ;;  %v1180_v19 = vmul.f32 %v1395_v6, %v1165_v10 }
 0x33f   : > { %v1181_v20 = vmul.f32 %v1395_v6, %v1166_v11  ;;  %v1182_v62 = vmul.f32 %v1395_v6, %v1167_v12  ;;  %v1183_v21 = vmul.f32 %v1395_v6, %v1168_v13  ;;  %v1184_v22 = vmul.f32 %v1395_v6, %v1169_v61 }
 0x340   : > { %v1192_v23 = vadd.f32 %v1396_v14, %v1177_v16  ;;  %v1193_v24 = vadd.f32 %v1396_v14, %v1178_v17  ;;  %v1194_v25 = vadd.f32 %v1396_v14, %v1179_v18  ;;  %v1195_v26 = vadd.f32 %v1396_v14, %v1180_v19 }
 0x341   : > { %v1196_v27 = vadd.f32 %v1396_v14, %v1181_v20  ;;  %v1197_v28 = vadd.f32 %v1396_v14, %v1182_v62  ;;  %v1198_v31 = vadd.f32 %v1396_v14, %v1183_v21  ;;  %v1199_v32 = vadd.f32 %v1396_v14, %v1184_v22 }
 0x342   : > { %v1200_v33 = vmax.f32 %v1192_v23, 0.0  ;;  %v1201_v15 = vmax.f32 %v1193_v24, 0.0  ;;  %v1202_v34 = vmax.f32 %v1194_v25, 0.0  ;;  %v1203_v35 = vmax.f32 %v1195_v26, 0.0 }
 0x343   : > { %v1204_v36 = vmax.f32 %v1196_v27, 0.0  ;;  %v1205_v37 = vmax.f32 %v1197_v28, 0.0  ;;  %v1206_v38 = vmax.f32 %v1198_v31, 0.0  ;;  %v1207_v40 = vmax.f32 %v1199_v32, 0.0 }
 0x344   : > { %v1408_v41 = vpack.c.bf16 %v1200_v33, %v1200_v33  ;;  %v1409_v39 = vpack.c.bf16 %v1201_v15, %v1201_v15  ;;  %v1410_v42 = vpack.c.bf16 %v1202_v34, %v1202_v34  ;;  %v1411_v43 = vpack.c.bf16 %v1203_v35, %v1203_v35 }
 0x345   : > { %v1412_v44 = vpack.c.bf16 %v1204_v36, %v1204_v36  ;;  %v1413_v47 = vpack.c.bf16 %v1205_v37, %v1205_v37  ;;  %v1414_v29 = vpack.c.bf16 %v1206_v38, %v1206_v38  ;;  %v1415_v48 = vpack.c.bf16 %v1207_v40, %v1207_v40 }
 0x346   : > { %1241 = vst.msk [vmem:[%s224_s25] sm:$0xf] %vm1240_vm4, %v1408_v41  ;;  %1242 = vst.msk [vmem:[%s224_s25 + $0x4] sm:$0xf] %vm1240_vm4, %v1409_v39 }
 0x347   : > { %1243 = vst.msk [vmem:[%s224_s25 + $0x8] sm:$0xf] %vm1240_vm4, %v1410_v42  ;;  %1244 = vst.msk [vmem:[%s224_s25 + $0xc] sm:$0xf] %vm1240_vm4, %v1411_v43 }
 0x348   : > { %1245 = vst.msk [vmem:[%s224_s25 + $0x10] sm:$0xf] %vm1240_vm4, %v1412_v44  ;;  %1246 = vst.msk [vmem:[%s224_s25 + $0x14] sm:$0xf] %vm1240_vm4, %v1413_v47 }
 0x349   : > { %1247 = vst.msk [vmem:[%s224_s25 + $0x18] sm:$0xf] %vm1240_vm4, %v1414_v29  ;;  %1248 = vst.msk [vmem:[%s224_s25 + $0x1c] sm:$0xf] %vm1240_vm4, %v1415_v48 }
 0x34a PF: > { %s15_s18 = sadd.s32 1, %s1685_s18  }
 0x34b   : > { %p12_p4 = scmp.ge.s32.totalorder %s15_s18, 4  }
 0x34d   :  { %14 = sbr.rel (!%p12_p4) target bundleno = 1 (0x1), region = 70 }

// kernel: style_transfer_forward.16
= control target key start
LH: loop header
LB: loop body
LE: loop exit
PB: predicated region body
PF: predicated region fallthrough
CT: control target
= control target key end

     0   :  { %s2234_s18 = smov 0   ;;  %s3016_s0 = inlined_call_operand.vmem [shape: bf16[2,256,400], index: 0, kind: input, shape index: {}]   ;;  %s3017_s1 = inlined_call_operand.vmem [shape: bf16[400,8], index: 1, kind: input, shape index: {}]   ;;  %s3018_s2 = inlined_call_operand.vmem [shape: f32[1,8], index: 2, kind: input, shape index: {}]   ;;  %s3019_s3 = inlined_call_operand.vmem [shape: f32[1,8], index: 3, kind: input, shape index: {}]   ;;  %s3020_s4 = inlined_call_operand.vmem [shape: f32[1,8], index: 4, kind: input, shape index: {}]   ;;  %s3021_s5 = inlined_call_operand.vmem [shape: bf16[2,256,8], index: 5, kind: output, shape index: {}]  }
   0x1 LB: > { %s1758_s19 = sadd.s32 4294967295, %s2201_s18   ;;  %p1762_p0 = scmp.ge.s32.totalorder %s2201_s18, 1  ;;  %s2201_s18 = sphi %s2234_s18, %s15_s18  }
   0x2   : > { %p187_p1 = scmp.lt.s32.totalorder %s2201_s18, 3 }
   0x4   : > { %p188_p2 = pnand %p1762_p0, %p187_p1 }
   0x5   : > { %v2070_v0 = vld [vmem:[%s3017_s1 + $0x40] sm:$0xff] (!%p188_p2)   ;;  %v2203_v1 = vmov (!%p188_p2), 0   ;;  %v2073_v4 = vld [vmem:[%s3017_s1 + $0x48] sm:$0xff] (!%p188_p2)   ;;  %v2076_v7 = vld [vmem:[%s3017_s1 + $0x50] sm:$0xff] (!%p188_p2)   ;;  %p215_p3 = scmp.lt.s32.totalorder (!%p188_p2), %s1758_s19, 1  ;;  %vm801_vm0 = vcmask (!%p188_p2), 130048  }
   0x6   : > { %191 = sbr.rel (%p188_p2) target bundleno = 994 (0x3e2), region = 40  ;;  %1011 = vmatprep.subr.bf16.mxu1 (!%p188_p2), %v2203_v1  ;;  %v2071_v2 = vld [vmem:[%s3017_s1 + $0x80] sm:$0xff] (!%p188_p2)   ;;  %1943 = vmatprep.subr.bf16.mxu0 (!%p188_p2), %v2070_v0  ;;  %v2074_v5 = vld [vmem:[%s3017_s1 + $0x88] sm:$0xff] (!%p188_p2)   ;;  %v2077_v8 = vld [vmem:[%s3017_s1 + $0x90] sm:$0xff] (!%p188_p2)   ;;  %vm1172_vm1 = vcmask (!%p188_p2), 64512   ;;  %vm1670_vm4 = vcmask (!%p188_p2), 60416  }
   0x7   : > { %v2072_v3 = vld [vmem:[%s3017_s1] sm:$0xff] (!%p188_p2)   ;;  %1012 = vmatpush1.bf16.msra.mxu1 (!%p188_p2), %v2071_v2  ;;  %v2075_v6 = vld [vmem:[%s3017_s1 + $0x8] sm:$0xff] (!%p188_p2)   ;;  %v2078_v9 = vld [vmem:[%s3017_s1 + $0x10] sm:$0xff] (!%p188_p2)  }
   0x8   : > { %1944 = vmatpush3.bf16.msra.mxu0 (!%p188_p2), %v2072_v3  ;;  %1013 = vmatprep.subr.bf16.mxu1 (!%p188_p2), %v2203_v1  ;;  %v2079_v10 = vld [vmem:[%s3017_s1 + $0x58] sm:$0xff] (!%p188_p2)   ;;  %v2082_v13 = vld [vmem:[%s3017_s1 + $0x60] sm:$0xff] (!%p188_p2)   ;;  %v2085_v16 = vld [vmem:[%s3017_s1 + $0x68] sm:$0xff] (!%p188_p2)  }
   0x9   : > { %1945 = vmatprep.subr.bf16.mxu0 (!%p188_p2), %v2073_v4  ;;  %v2080_v11 = vld [vmem:[%s3017_s1 + $0x98] sm:$0xff] (!%p188_p2)   ;;  %v2083_v14 = vld [vmem:[%s3017_s1 + $0xa0] sm:$0xff] (!%p188_p2)   ;;  %v2086_v17 = vld [vmem:[%s3017_s1 + $0xa8] sm:$0xff] (!%p188_p2)  }
   0xa   : > { %v2081_v12 = vld [vmem:[%s3017_s1 + $0x18] sm:$0xff] (!%p188_p2)   ;;  %v2084_v15 = vld [vmem:[%s3017_s1 + $0x20] sm:$0xff] (!%p188_p2)   ;;  %v2087_v18 = vld [vmem:[%s3017_s1 + $0x28] sm:$0xff] (!%p188_p2)  }
   0xb   : > { %1014 = vmatpush1.bf16.msra.mxu1 (!%p188_p2), %v2074_v5  ;;  %v2088_v19 = vld [vmem:[%s3017_s1 + $0x70] sm:$0xff] (!%p188_p2)   ;;  %v2091_v22 = vld [vmem:[%s3017_s1 + $0x78] sm:$0xff] (!%p188_p2)   ;;  %v2097_v28 = vld [vmem:[%s3017_s1 + $0xc0] sm:$0xff] (!%p188_p2)  }
   0xc   : > { %1946 = vmatpush3.bf16.msra.mxu0 (!%p188_p2), %v2075_v6  ;;  %1015 = vmatprep.subr.bf16.mxu1 (!%p188_p2), %v2203_v1  ;;  %v2089_v20 = vld [vmem:[%s3017_s1 + $0xb0] sm:$0xff] (!%p188_p2)   ;;  %v2092_v24 = vld [vmem:[%s3017_s1 + $0xb8] sm:$0xff] (!%p188_p2)  }
   0xd   : > { %1947 = vmatprep.subr.bf16.mxu0 %v2076_v7  ;;  %s3023_s19 = smov (!%p215_p3, %s1758_s19), 1  ;;  %v2090_v21 = vld [vmem:[%s3017_s1 + $0x30] sm:$0xff]   ;;  %v2093_v26 = vld [vmem:[%s3017_s1 + $0x38] sm:$0xff]  }
   0xe   : > { %s1909_s6 = sshll.u32 %s3023_s19, 9 }
   0xf   : > { %1016 = vmatpush1.bf16.msra.mxu1 %v2077_v8  ;;  %s2318_s15 = scalar_lea.vmem %s3016_s0, %s1909_s6 }
  0x10   : > { %1948 = vmatpush3.bf16.msra.mxu0 %v2078_v9  ;;  %1017 = vmatprep.subr.bf16.mxu1 %v2203_v1  ;;  %v2096_v23 = vld [vmem:[%s2318_s15 + $0x4] ss:$16 sps:$4 sm:$0xff]   ;;  %v2100_v25 = vld [vmem:[%s2318_s15 + $0xc] ss:$16 sps:$4 sm:$0xff]   ;;  %v2094_v27 = vld [vmem:[%s2318_s15] ss:$16 sps:$4 sm:$0xff]  }
  0x11   : > { %1949 = vmatprep.subr.bf16.mxu0 %v2079_v10  ;;  %882 = vmatprep.mubr.bf16.mxu0 %v2096_v23  ;;  %v2101_v29 = vld [vmem:[%s2318_s15 + $0x24] ss:$16 sps:$4 sm:$0xff]   ;;  %v2098_v30 = vld [vmem:[%s2318_s15 + $0x8] ss:$16 sps:$4 sm:$0xff]   ;;  %v2104_v31 = vld [vmem:[%s2318_s15 + $0x2c] ss:$16 sps:$4 sm:$0xff]  }
  0x12   : > { %1857 = vmatprep.mubr.msk.bf16.mxu1 %vm801_vm0, %v2100_v25  ;;  %v2103_v32 = vld [vmem:[%s2318_s15 + $0x20] ss:$16 sps:$4 sm:$0xff]   ;;  %v2107_v33 = vld [vmem:[%s2318_s15 + $0x44] ss:$16 sps:$4 sm:$0xff]   ;;  %v2106_v34 = vld [vmem:[%s2318_s15 + $0x28] ss:$16 sps:$4 sm:$0xff]  }
  0x13   : > { %1018 = vmatpush1.bf16.msra.mxu1 %v2080_v11  ;;  %v2110_v35 = vld [vmem:[%s2318_s15 + $0x4c] ss:$16 sps:$4 sm:$0xff]   ;;  %v2109_v36 = vld [vmem:[%s2318_s15 + $0x40] ss:$16 sps:$4 sm:$0xff]   ;;  %v2113_v37 = vld [vmem:[%s2318_s15 + $0x64] ss:$16 sps:$4 sm:$0xff]  }
  0x14   : > { %1950 = vmatpush3.bf16.msra.mxu0 %v2081_v12  ;;  %1019 = vmatprep.subr.bf16.mxu1 %v2203_v1  ;;  %v2112_v38 = vld [vmem:[%s2318_s15 + $0x48] ss:$16 sps:$4 sm:$0xff]   ;;  %v2116_v39 = vld [vmem:[%s2318_s15 + $0x6c] ss:$16 sps:$4 sm:$0xff]   ;;  %v2115_v40 = vld [vmem:[%s2318_s15 + $0x60] ss:$16 sps:$4 sm:$0xff]  }
  0x15   : > { %1951 = vmatprep.subr.bf16.mxu0 %v2082_v13  ;;  %v2119_v41 = vld [vmem:[%s2318_s15 + $0x84] ss:$16 sps:$4 sm:$0xff]   ;;  %v2118_v42 = vld [vmem:[%s2318_s15 + $0x68] ss:$16 sps:$4 sm:$0xff]   ;;  %v2122_v43 = vld [vmem:[%s2318_s15 + $0x8c] ss:$16 sps:$4 sm:$0xff]  }
  0x16   : > { %v2121_v44 = vld [vmem:[%s2318_s15 + $0x80] ss:$16 sps:$4 sm:$0xff]   ;;  %v2125_v45 = vld [vmem:[%s2318_s15 + $0xa4] ss:$16 sps:$4 sm:$0xff]   ;;  %v2124_v46 = vld [vmem:[%s2318_s15 + $0x88] ss:$16 sps:$4 sm:$0xff]  }
  0x17   : > { %1020 = vmatpush1.bf16.msra.mxu1 %v2083_v14  ;;  %v2128_v47 = vld [vmem:[%s2318_s15 + $0xac] ss:$16 sps:$4 sm:$0xff]   ;;  %v2127_v48 = vld [vmem:[%s2318_s15 + $0xa0] ss:$16 sps:$4 sm:$0xff]   ;;  %v2131_v49 = vld [vmem:[%s2318_s15 + $0xc4] ss:$16 sps:$4 sm:$0xff]  }
  0x18   : > { %1952 = vmatpush3.bf16.msra.mxu0 %v2084_v15  ;;  %1021 = vmatprep.subr.bf16.mxu1 %v2203_v1  ;;  %v2130_v50 = vld [vmem:[%s2318_s15 + $0xa8] ss:$16 sps:$4 sm:$0xff]   ;;  %v2134_v51 = vld [vmem:[%s2318_s15 + $0xcc] ss:$16 sps:$4 sm:$0xff]   ;;  %v2133_v52 = vld [vmem:[%s2318_s15 + $0xc0] ss:$16 sps:$4 sm:$0xff]  }
  0x19   : > { %1953 = vmatprep.subr.bf16.mxu0 %v2085_v16  ;;  %v2137_v53 = vld [vmem:[%s2318_s15 + $0xe4] ss:$16 sps:$4 sm:$0xff]   ;;  %v2136_v54 = vld [vmem:[%s2318_s15 + $0xc8] ss:$16 sps:$4 sm:$0xff]   ;;  %v2140_v55 = vld [vmem:[%s2318_s15 + $0xec] ss:$16 sps:$4 sm:$0xff]  }
  0x1a   : > { %v2139_v56 = vld [vmem:[%s2318_s15 + $0xe0] ss:$16 sps:$4 sm:$0xff]   ;;  %v2143_v57 = vld [vmem:[%s2318_s15 + $0x104] ss:$16 sps:$4 sm:$0xff]   ;;  %v2142_v58 = vld [vmem:[%s2318_s15 + $0xe8] ss:$16 sps:$4 sm:$0xff]  }
  0x1b   : > { %1022 = vmatpush1.bf16.msra.mxu1 %v2086_v17  ;;  %v2146_v59 = vld [vmem:[%s2318_s15 + $0x10c] ss:$16 sps:$4 sm:$0xff]   ;;  %v2145_v60 = vld [vmem:[%s2318_s15 + $0x100] ss:$16 sps:$4 sm:$0xff]   ;;  %v2149_v61 = vld [vmem:[%s2318_s15 + $0x124] ss:$16 sps:$4 sm:$0xff]  }
  0x1c   : > { %1954 = vmatpush3.bf16.msra.mxu0 %v2087_v18  ;;  %1023 = vmatprep.subr.bf16.mxu1 %v2203_v1  ;;  %v2148_v62 = vld [vmem:[%s2318_s15 + $0x108] ss:$16 sps:$4 sm:$0xff]   ;;  %v2152_v63 = vld [vmem:[%s2318_s15 + $0x12c] ss:$16 sps:$4 sm:$0xff]   ;;  %v2151_v0 = vld [vmem:[%s2318_s15 + $0x120] ss:$16 sps:$4 sm:$0xff]  }
  0x1d   : > { %1955 = vmatprep.subr.bf16.mxu0 %v2088_v19  ;;  %v2154_v2 = vld [vmem:[%s2318_s15 + $0x128] ss:$16 sps:$4 sm:$0xff]   ;;  %v2158_v3 = vld [vmem:[%s2318_s15 + $0x14c] ss:$16 sps:$4 sm:$0xff]   ;;  %v2157_v4 = vld [vmem:[%s2318_s15 + $0x140] ss:$16 sps:$4 sm:$0xff]  }
  0x1e   : > { %v2161_v5 = vld [vmem:[%s2318_s15 + $0x164] ss:$16 sps:$4 sm:$0xff]   ;;  %v2160_v6 = vld [vmem:[%s2318_s15 + $0x148] ss:$16 sps:$4 sm:$0xff]   ;;  %v2164_v7 = vld [vmem:[%s2318_s15 + $0x16c] ss:$16 sps:$4 sm:$0xff]  }
  0x1f   : > { %1024 = vmatpush1.bf16.msra.mxu1 %v2089_v20  ;;  %v2163_v8 = vld [vmem:[%s2318_s15 + $0x160] ss:$16 sps:$4 sm:$0xff]   ;;  %v2167_v9 = vld [vmem:[%s2318_s15 + $0x184] ss:$16 sps:$4 sm:$0xff]   ;;  %v2166_v10 = vld [vmem:[%s2318_s15 + $0x168] ss:$16 sps:$4 sm:$0xff]  }
  0x20   : > { %1956 = vmatpush3.bf16.msra.mxu0 %v2090_v21  ;;  %1025 = vmatprep.subr.bf16.mxu1 %v2203_v1  ;;  %v2170_v11 = vld [vmem:[%s2318_s15 + $0x18c] ss:$16 sps:$4 sm:$0xff]   ;;  %v2169_v12 = vld [vmem:[%s2318_s15 + $0x180] ss:$16 sps:$4 sm:$0xff]   ;;  %v2173_v13 = vld [vmem:[%s2318_s15 + $0x1a4] ss:$16 sps:$4 sm:$0xff]  }
  0x21   : > { %1957 = vmatprep.subr.bf16.mxu0 %v2091_v22  ;;  %v2172_v14 = vld [vmem:[%s2318_s15 + $0x188] ss:$16 sps:$4 sm:$0xff]   ;;  %v2176_v15 = vld [vmem:[%s2318_s15 + $0x1ac] ss:$16 sps:$4 sm:$0xff]   ;;  %v2175_v16 = vld [vmem:[%s2318_s15 + $0x1a0] ss:$16 sps:$4 sm:$0xff]  }
  0x22   : > { %v2179_v17 = vld [vmem:[%s2318_s15 + $0x1c4] ss:$16 sps:$4 sm:$0xff]   ;;  %v2178_v18 = vld [vmem:[%s2318_s15 + $0x1a8] ss:$16 sps:$4 sm:$0xff]   ;;  %v2182_v19 = vld [vmem:[%s2318_s15 + $0x1cc] ss:$16 sps:$4 sm:$0xff]  }
  0x23   : > { %1026 = vmatpush1.bf16.msra.mxu1 %v2092_v24  ;;  %v2181_v20 = vld [vmem:[%s2318_s15 + $0x1c0] ss:$16 sps:$4 sm:$0xff]   ;;  %v2185_v21 = vld [vmem:[%s2318_s15 + $0x1e4] ss:$16 sps:$4 sm:$0xff]   ;;  %v2184_v22 = vld [vmem:[%s2318_s15 + $0x1c8] ss:$16 sps:$4 sm:$0xff]  }
  0x24   : > { %1958 = vmatpush3.bf16.msra.mxu0 %v2093_v26  ;;  %1027 = vmatprep.subr.bf16.mxu1 %v2203_v1  ;;  %v2155_v1 = vld [vmem:[%s2318_s15 + $0x144] ss:$16 sps:$4 sm:$0xff]   ;;  %v2188_v23 = vld [vmem:[%s2318_s15 + $0x1ec] ss:$16 sps:$4 sm:$0xff]   ;;  %v2187_v24 = vld [vmem:[%s2318_s15 + $0x1e0] ss:$16 sps:$4 sm:$0xff]  }
  0x25   : > { %v2190_v25 = vld [vmem:[%s2318_s15 + $0x1e8] ss:$16 sps:$4 sm:$0xff]   ;;  %s1910_s15 = sshll.u32 %s3023_s19, 7 }
  0x26   : > { %s2943_s17 = scalar_lea.vmem %s3021_s5, %s1910_s15 }
  0x27   : > { %883 = vmatmul.mubr.bf16.vlgmr.msra.gmra.mrb[0].mxu0 %v2094_v27  ;;  %1028 = vmatpush1.bf16.msra.mxu1 %v2097_v28  ;;  %v2421_v28 = vld [vmem:[%s3018_s2] ss:$0 sm:$0xff] }
  0x28   : > { %890 = vmatprep.mubr.bf16.mxu0 %v2101_v29 }
  0x2a   : > { %1044 = vmatmul.mubr.bf16.vlgmr.msra.gmra.mrb[0].mxu1 %v2098_v30 }
  0x2b   : > { %1858 = vmatprep.mubr.msk.bf16.mxu1 %vm801_vm0, %v2104_v31 }
  0x2f   : > { %891 = vmatmul.mubr.bf16.gmra.mrb[4].mxu0 %v2103_v32 }
  0x30   : > { %898 = vmatprep.mubr.bf16.mxu0 %v2107_v33 }
  0x32   : > { %1052 = vmatmul.mubr.bf16.gmra.mrb[4].mxu1 %v2106_v34 }
  0x33   : > { %1859 = vmatprep.mubr.msk.bf16.mxu1 %vm801_vm0, %v2110_v35 }
  0x37   : > { %899 = vmatmul.mubr.bf16.gmra.mrb[8].mxu0 %v2109_v36 }
  0x38   : > { %906 = vmatprep.mubr.bf16.mxu0 %v2113_v37 }
  0x3a   : > { %1060 = vmatmul.mubr.bf16.gmra.mrb[8].mxu1 %v2112_v38 }
  0x3b   : > { %1860 = vmatprep.mubr.msk.bf16.mxu1 %vm801_vm0, %v2116_v39 }
  0x3f   : > { %907 = vmatmul.mubr.bf16.gmra.mrb[12].mxu0 %v2115_v40 }
  0x40   : > { %914 = vmatprep.mubr.bf16.mxu0 %v2119_v41 }
  0x42   : > { %1068 = vmatmul.mubr.bf16.gmra.mrb[12].mxu1 %v2118_v42 }
  0x43   : > { %1861 = vmatprep.mubr.msk.bf16.mxu1 %vm801_vm0, %v2122_v43 }
  0x47   : > { %915 = vmatmul.mubr.bf16.gmra.mrb[16].mxu0 %v2121_v44 }
  0x48   : > { %922 = vmatprep.mubr.bf16.mxu0 %v2125_v45 }
  0x4a   : > { %1076 = vmatmul.mubr.bf16.gmra.mrb[16].mxu1 %v2124_v46 }
  0x4b   : > { %1862 = vmatprep.mubr.msk.bf16.mxu1 %vm801_vm0, %v2128_v47 }
  0x4f   : > { %923 = vmatmul.mubr.bf16.gmra.mrb[20].mxu0 %v2127_v48 }
  0x50   : > { %930 = vmatprep.mubr.bf16.mxu0 %v2131_v49 }
  0x52   : > { %1084 = vmatmul.mubr.bf16.gmra.mrb[20].mxu1 %v2130_v50 }
  0x53   : > { %1863 = vmatprep.mubr.msk.bf16.mxu1 %vm801_vm0, %v2134_v51 }
  0x57   : > { %931 = vmatmul.mubr.bf16.gmra.mrb[24].mxu0 %v2133_v52 }
  0x58   : > { %938 = vmatprep.mubr.bf16.mxu0 %v2137_v53 }
  0x5a   : > { %1092 = vmatmul.mubr.bf16.gmra.mrb[24].mxu1 %v2136_v54 }
  0x5b   : > { %1864 = vmatprep.mubr.msk.bf16.mxu1 %vm801_vm0, %v2140_v55 }
  0x5f   : > { %939 = vmatmul.mubr.bf16.gmra.mrb[28].mxu0 %v2139_v56 }
  0x60   : > { %946 = vmatprep.mubr.bf16.mxu0 %v2143_v57 }
  0x62   : > { %1100 = vmatmul.mubr.bf16.gmra.mrb[28].mxu1 %v2142_v58 }
  0x63   : > { %1865 = vmatprep.mubr.msk.bf16.mxu1 %vm801_vm0, %v2146_v59 }
  0x67   : > { %947 = vmatmul.mubr.bf16.gmra.mrb[32].mxu0 %v2145_v60 }
  0x68   : > { %954 = vmatprep.mubr.bf16.mxu0 %v2149_v61 }
  0x6a   : > { %1108 = vmatmul.mubr.bf16.gmra.mrb[32].mxu1 %v2148_v62 }
  0x6b   : > { %1866 = vmatprep.mubr.msk.bf16.mxu1 %vm801_vm0, %v2152_v63 }
  0x6f   : > { %955 = vmatmul.mubr.bf16.gmra.mrb[36].mxu0 %v2151_v0 }
  0x70   : > { %962 = vmatprep.mubr.bf16.mxu0 %v2155_v1 }
  0x72   : > { %1116 = vmatmul.mubr.bf16.gmra.mrb[36].mxu1 %v2154_v2 }
  0x73   : > { %1867 = vmatprep.mubr.msk.bf16.mxu1 %vm801_vm0, %v2158_v3 }
  0x77   : > { %963 = vmatmul.mubr.bf16.gmra.mrb[40].mxu0 %v2157_v4 }
  0x78   : > { %970 = vmatprep.mubr.bf16.mxu0 %v2161_v5 }
  0x7a   : > { %1124 = vmatmul.mubr.bf16.gmra.mrb[40].mxu1 %v2160_v6 }
  0x7b   : > { %1868 = vmatprep.mubr.msk.bf16.mxu1 %vm801_vm0, %v2164_v7 }
  0x7f   : > { %971 = vmatmul.mubr.bf16.gmra.mrb[44].mxu0 %v2163_v8 }
  0x80   : > { %978 = vmatprep.mubr.bf16.mxu0 %v2167_v9 }
  0x82   : > { %1132 = vmatmul.mubr.bf16.gmra.mrb[44].mxu1 %v2166_v10 }
  0x83   : > { %1869 = vmatprep.mubr.msk.bf16.mxu1 %vm801_vm0, %v2170_v11 }
  0x87   : > { %979 = vmatmul.mubr.bf16.gmra.mrb[48].mxu0 %v2169_v12 }
  0x88   : > { %986 = vmatprep.mubr.bf16.mxu0 %v2173_v13 }
  0x8a   : > { %1140 = vmatmul.mubr.bf16.gmra.mrb[48].mxu1 %v2172_v14 }
  0x8b   : > { %1870 = vmatprep.mubr.msk.bf16.mxu1 %vm801_vm0, %v2176_v15 }
  0x8f   : > { %987 = vmatmul.mubr.bf16.gmra.mrb[52].mxu0 %v2175_v16 }
  0x90   : > { %994 = vmatprep.mubr.bf16.mxu0 %v2179_v17 }
  0x92   : > { %1148 = vmatmul.mubr.bf16.gmra.mrb[52].mxu1 %v2178_v18 }
  0x93   : > { %1871 = vmatprep.mubr.msk.bf16.mxu1 %vm801_vm0, %v2182_v19 }
  0x97   : > { %995 = vmatmul.mubr.bf16.gmra.mrb[56].mxu0 %v2181_v20 }
  0x98   : > { %1002 = vmatprep.mubr.bf16.mxu0 %v2185_v21 }
  0x9a   : > { %1156 = vmatmul.mubr.bf16.gmra.mrb[56].mxu1 %v2184_v22 }
  0x9b   : > { %1872 = vmatprep.mubr.msk.bf16.mxu1 %vm801_vm0, %v2188_v23 }
  0x9f   : > { %1003 = vmatmul.mubr.bf16.gmra.mrb[60].mxu0 %v2187_v24 }
  0xa2   : > { %1164 = vmatmul.mubr.bf16.gmra.mrb[60].mxu1 %v2190_v25 }
  0xfa   : > { %v1959_v26 = vpop.f32.mrb[0].mxu0 }
  0xfb   : > { %v1960_v27 = vpop.f32.mrb[1].mxu0 }
  0xfc   : > { %v1961_v29 = vadd.f32 %v1960_v27, %v1959_v26  ;;  %v1962_v30 = vpop.f32.mrb[2].mxu0 }
  0xfd   : > { %v1963_v31 = vpop.f32.mrb[3].mxu0  ;;  %v1045_v32 = vpop.f32.mrb[0].mxu1 }
  0xfe   : > { %v1964_v33 = vadd.f32 %v1963_v31, %v1962_v30  ;;  %v885_v34 = vadd.f32 %v1961_v29, %v2421_v28  ;;  %v1047_v35 = vpop.f32.mrb[1].mxu1 }
  0xff   : > { %v1048_v36 = vpop.f32.mrb[2].mxu1 }
 0x100   : > { %v2424_v37 = vadd.f32 %v1045_v32, %v885_v34  ;;  %v888_v38 = vadd.f32 %v1964_v33, %v2421_v28  ;;  %v1050_v39 = vpop.f32.mrb[3].mxu1 }
 0x102   : > { %v2427_v40 = vadd.f32 %v1048_v36, %v888_v38  ;;  %v1965_v41 = vpop.f32.mrb[4].mxu0  ;;  %v1173_v38 = vsel %vm1172_vm1, %v2424_v37, 0.0 }
 0x103   : > { %v1966_v42 = vpop.f32.mrb[5].mxu0 }
 0x104   : > { %v1967_v43 = vadd.f32 %v1966_v42, %v1965_v41  ;;  %v1968_v44 = vpop.f32.mrb[6].mxu0  ;;  %v1174_v33 = vsel %vm1172_vm1, %v2427_v40, 0.0 }
 0x105   : > { %v1969_v45 = vpop.f32.mrb[7].mxu0  ;;  %v1053_v46 = vpop.f32.mrb[4].mxu1 }
 0x106   : > { %v1970_v47 = vadd.f32 %v1969_v45, %v1968_v44  ;;  %v893_v48 = vadd.f32 %v1967_v43, %v2421_v28  ;;  %v1055_v49 = vpop.f32.mrb[5].mxu1  ;;  %v1175_v43 = vadd.f32 %v1174_v33, %v1173_v38 }
 0x107   : > { %v1056_v50 = vpop.f32.mrb[6].mxu1 }
 0x108   : > { %v2430_v51 = vadd.f32 %v1053_v46, %v893_v48  ;;  %v896_v52 = vadd.f32 %v1970_v47, %v2421_v28  ;;  %v1058_v53 = vpop.f32.mrb[7].mxu1 }
 0x10a   : > { %v2433_v54 = vadd.f32 %v1056_v50, %v896_v52  ;;  %v1971_v55 = vpop.f32.mrb[8].mxu0  ;;  %v1176_v39 = vsel %vm1172_vm1, %v2430_v51, 0.0 }
 0x10b   : > { %v1972_v56 = vpop.f32.mrb[9].mxu0  ;;  %v1177_v49 = vadd.f32 %v1176_v39, %v1175_v43 }
 0x10c   : > { %v1973_v57 = vadd.f32 %v1972_v56, %v1971_v55  ;;  %v1974_v58 = vpop.f32.mrb[10].mxu0  ;;  %v1178_v52 = vsel %vm1172_vm1, %v2433_v54, 0.0 }
 0x10d   : > { %v1975_v59 = vpop.f32.mrb[11].mxu0  ;;  %v1061_v60 = vpop.f32.mrb[8].mxu1 }
 0x10e   : > { %v1976_v61 = vadd.f32 %v1975_v59, %v1974_v58  ;;  %v901_v62 = vadd.f32 %v1973_v57, %v2421_v28  ;;  %v1063_v63 = vpop.f32.mrb[9].mxu1 }
 0x10f   : > { %v1064_v0 = vpop.f32.mrb[10].mxu1 }
 0x110   : > { %v2436_v1 = vadd.f32 %v1061_v60, %v901_v62  ;;  %v904_v2 = vadd.f32 %v1976_v61, %v2421_v28  ;;  %v1066_v3 = vpop.f32.mrb[11].mxu1  ;;  %v1179_v60 = vadd.f32 %v1178_v52, %v1177_v49 }
 0x112   : > { %v2439_v4 = vadd.f32 %v1064_v0, %v904_v2  ;;  %v1977_v5 = vpop.f32.mrb[12].mxu0  ;;  %v1180_v57 = vsel %vm1172_vm1, %v2436_v1, 0.0 }
 0x113   : > { %v1978_v6 = vpop.f32.mrb[13].mxu0  ;;  %v1181_v0 = vadd.f32 %v1180_v57, %v1179_v60 }
 0x114   : > { %v1979_v7 = vadd.f32 %v1978_v6, %v1977_v5  ;;  %v1980_v8 = vpop.f32.mrb[14].mxu0  ;;  %v1182_v5 = vsel %vm1172_vm1, %v2439_v4, 0.0 }
 0x115   : > { %v1981_v9 = vpop.f32.mrb[15].mxu0  ;;  %v1069_v10 = vpop.f32.mrb[12].mxu1 }
 0x116   : > { %v1982_v11 = vadd.f32 %v1981_v9, %v1980_v8  ;;  %v909_v12 = vadd.f32 %v1979_v7, %v2421_v28  ;;  %v1071_v13 = vpop.f32.mrb[13].mxu1 }
 0x117   : > { %v1072_v14 = vpop.f32.mrb[14].mxu1 }
 0x118   : > { %v2442_v15 = vadd.f32 %v1069_v10, %v909_v12  ;;  %v912_v16 = vadd.f32 %v1982_v11, %v2421_v28  ;;  %v1074_v17 = vpop.f32.mrb[15].mxu1 }
 0x11a   : > { %v2445_v18 = vadd.f32 %v1072_v14, %v912_v16  ;;  %v1983_v19 = vpop.f32.mrb[16].mxu0  ;;  %v1184_v10 = vsel %vm1172_vm1, %v2442_v15, 0.0  ;;  %v1183_v14 = vadd.f32 %v1182_v5, %v1181_v0 }
 0x11b   : > { %v1984_v20 = vpop.f32.mrb[17].mxu0 }
 0x11c   : > { %v1985_v21 = vadd.f32 %v1984_v20, %v1983_v19  ;;  %v1986_v22 = vpop.f32.mrb[18].mxu0  ;;  %v1185_v19 = vadd.f32 %v1184_v10, %v1183_v14 }
 0x11d   : > { %v1987_v23 = vpop.f32.mrb[19].mxu0  ;;  %v1077_v24 = vpop.f32.mrb[16].mxu1 }
 0x11e   : > { %v1988_v25 = vadd.f32 %v1987_v23, %v1986_v22  ;;  %v917_v26 = vadd.f32 %v1985_v21, %v2421_v28  ;;  %v1079_v27 = vpop.f32.mrb[17].mxu1  ;;  %v1186_v21 = vsel %vm1172_vm1, %v2445_v18, 0.0 }
 0x11f   : > { %v1080_v29 = vpop.f32.mrb[18].mxu1 }
 0x120   : > { %v2448_v30 = vadd.f32 %v1077_v24, %v917_v26  ;;  %v920_v31 = vadd.f32 %v1988_v25, %v2421_v28  ;;  %v1082_v32 = vpop.f32.mrb[19].mxu1 }
 0x121   : > { %v1187_v32 = vadd.f32 %v1186_v21, %v1185_v19 }
 0x122   : > { %v2453_v34 = vadd.f32 %v1080_v29, %v920_v31  ;;  %v1989_v35 = vpop.f32.mrb[20].mxu0  ;;  %v1188_v26 = vsel %vm1172_vm1, %v2448_v30, 0.0 }
 0x123   : > { %v1990_v36 = vpop.f32.mrb[21].mxu0  ;;  %v1189_v39 = vadd.f32 %v1188_v26, %v1187_v32 }
 0x124   : > { %v1991_v41 = vadd.f32 %v1990_v36, %v1989_v35  ;;  %v1992_v42 = vpop.f32.mrb[22].mxu0 }
 0x125   : > { %v1993_v44 = vpop.f32.mrb[23].mxu0  ;;  %v1085_v45 = vpop.f32.mrb[20].mxu1 }
 0x126   : > { %v1994_v46 = vadd.f32 %v1993_v44, %v1992_v42  ;;  %v925_v47 = vadd.f32 %v1991_v41, %v2421_v28  ;;  %v1087_v48 = vpop.f32.mrb[21].mxu1  ;;  %v1190_v41 = vsel %vm1172_vm1, %v2453_v34, 0.0 }
 0x127   : > { %v1088_v50 = vpop.f32.mrb[22].mxu1  ;;  %v1191_v48 = vadd.f32 %v1190_v41, %v1189_v39 }
 0x128   : > { %v2462_v53 = vadd.f32 %v1085_v45, %v925_v47  ;;  %v928_v55 = vadd.f32 %v1994_v46, %v2421_v28  ;;  %v1090_v56 = vpop.f32.mrb[23].mxu1 }
 0x12a   : > { %v2467_v58 = vadd.f32 %v1088_v50, %v928_v55  ;;  %v1995_v59 = vpop.f32.mrb[24].mxu0  ;;  %v1192_v45 = vsel %vm1172_vm1, %v2462_v53, 0.0 }
 0x12b   : > { %v1996_v61 = vpop.f32.mrb[25].mxu0  ;;  %v1193_v57 = vadd.f32 %v1192_v45, %v1191_v48 }
 0x12c   : > { %v1997_v62 = vadd.f32 %v1996_v61, %v1995_v59  ;;  %v1998_v63 = vpop.f32.mrb[26].mxu0  ;;  %v1194_v60 = vsel %vm1172_vm1, %v2467_v58, 0.0 }
 0x12d   : > { %v1999_v2 = vpop.f32.mrb[27].mxu0  ;;  %v1093_v3 = vpop.f32.mrb[24].mxu1  ;;  %v1195_v5 = vadd.f32 %v1194_v60, %v1193_v57 }
 0x12e   : > { %v2000_v6 = vadd.f32 %v1999_v2, %v1998_v63  ;;  %v933_v7 = vadd.f32 %v1997_v62, %v2421_v28  ;;  %v1095_v8 = vpop.f32.mrb[25].mxu1 }
 0x12f   : > { %v1096_v9 = vpop.f32.mrb[26].mxu1 }
 0x130   : > { %v2474_v11 = vadd.f32 %v1093_v3, %v933_v7  ;;  %v936_v12 = vadd.f32 %v2000_v6, %v2421_v28  ;;  %v1098_v13 = vpop.f32.mrb[27].mxu1 }
 0x132   : > { %v2477_v16 = vadd.f32 %v1096_v9, %v936_v12  ;;  %v2001_v17 = vpop.f32.mrb[28].mxu0  ;;  %v1196_v0 = vsel %vm1172_vm1, %v2474_v11, 0.0 }
 0x133   : > { %v2002_v20 = vpop.f32.mrb[29].mxu0  ;;  %v1197_v9 = vadd.f32 %v1196_v0, %v1195_v5 }
 0x134   : > { %v2003_v22 = vadd.f32 %v2002_v20, %v2001_v17  ;;  %v2004_v23 = vpop.f32.mrb[30].mxu0  ;;  %v1198_v13 = vsel %vm1172_vm1, %v2477_v16, 0.0 }
 0x135   : > { %v2005_v24 = vpop.f32.mrb[31].mxu0  ;;  %v1101_v25 = vpop.f32.mrb[28].mxu1 }
 0x136   : > { %v2006_v27 = vadd.f32 %v2005_v24, %v2004_v23  ;;  %v941_v29 = vadd.f32 %v2003_v22, %v2421_v28  ;;  %v1103_v31 = vpop.f32.mrb[29].mxu1 }
 0x137   : > { %v1104_v33 = vpop.f32.mrb[30].mxu1 }
 0x138   : > { %v2484_v35 = vadd.f32 %v1101_v25, %v941_v29  ;;  %v944_v36 = vadd.f32 %v2006_v27, %v2421_v28  ;;  %v1106_v38 = vpop.f32.mrb[31].mxu1  ;;  %v1199_v25 = vadd.f32 %v1198_v13, %v1197_v9 }
 0x13a   : > { %v2489_v42 = vadd.f32 %v1104_v33, %v944_v36  ;;  %v2007_v43 = vpop.f32.mrb[32].mxu0  ;;  %v1200_v21 = vsel %vm1172_vm1, %v2484_v35, 0.0 }
 0x13b   : > { %v2008_v44 = vpop.f32.mrb[33].mxu0  ;;  %v1201_v29 = vadd.f32 %v1200_v21, %v1199_v25 }
 0x13c   : > { %v2009_v46 = vadd.f32 %v2008_v44, %v2007_v43  ;;  %v2010_v47 = vpop.f32.mrb[34].mxu0  ;;  %v1202_v32 = vsel %vm1172_vm1, %v2489_v42, 0.0 }
 0x13d   : > { %v2011_v49 = vpop.f32.mrb[35].mxu0  ;;  %v1109_v50 = vpop.f32.mrb[32].mxu1 }
 0x13e   : > { %v2012_v52 = vadd.f32 %v2011_v49, %v2010_v47  ;;  %v949_v55 = vadd.f32 %v2009_v46, %v2421_v28  ;;  %v1111_v56 = vpop.f32.mrb[33].mxu1  ;;  %v1203_v46 = vadd.f32 %v1202_v32, %v1201_v29 }
 0x13f   : > { %v1112_v59 = vpop.f32.mrb[34].mxu1 }
 0x140   : > { %v2496_v61 = vadd.f32 %v1109_v50, %v949_v55  ;;  %v952_v62 = vadd.f32 %v2012_v52, %v2421_v28  ;;  %v1114_v63 = vpop.f32.mrb[35].mxu1 }
 0x142   : > { %v2501_v2 = vadd.f32 %v1112_v59, %v952_v62  ;;  %v2013_v3 = vpop.f32.mrb[36].mxu0  ;;  %v1204_v41 = vsel %vm1172_vm1, %v2496_v61, 0.0 }
 0x143   : > { %v2014_v6 = vpop.f32.mrb[37].mxu0  ;;  %v1205_v52 = vadd.f32 %v1204_v41, %v1203_v46 }
 0x144   : > { %v2015_v7 = vadd.f32 %v2014_v6, %v2013_v3  ;;  %v2016_v8 = vpop.f32.mrb[38].mxu0  ;;  %v1206_v55 = vsel %vm1172_vm1, %v2501_v2, 0.0 }
 0x145   : > { %v2017_v10 = vpop.f32.mrb[39].mxu0  ;;  %v1117_v12 = vpop.f32.mrb[36].mxu1  ;;  %v1207_v0 = vadd.f32 %v1206_v55, %v1205_v52 }
 0x146   : > { %v2018_v14 = vadd.f32 %v2017_v10, %v2016_v8  ;;  %v957_v17 = vadd.f32 %v2015_v7, %v2421_v28  ;;  %v1119_v19 = vpop.f32.mrb[37].mxu1 }
 0x147   : > { %v1120_v20 = vpop.f32.mrb[38].mxu1 }
 0x148   : > { %v2508_v22 = vadd.f32 %v1117_v12, %v957_v17  ;;  %v960_v23 = vadd.f32 %v2018_v14, %v2421_v28  ;;  %v1122_v24 = vpop.f32.mrb[39].mxu1 }
 0x14a   : > { %v2511_v26 = vadd.f32 %v1120_v20, %v960_v23  ;;  %v2019_v27 = vpop.f32.mrb[40].mxu0  ;;  %v1208_v60 = vsel %vm1172_vm1, %v2508_v22, 0.0 }
 0x14b   : > { %v2020_v31 = vpop.f32.mrb[41].mxu0  ;;  %v1209_v9 = vadd.f32 %v1208_v60, %v1207_v0 }
 0x14c   : > { %v2021_v33 = vadd.f32 %v2020_v31, %v2019_v27  ;;  %v2022_v36 = vpop.f32.mrb[42].mxu0  ;;  %v1210_v12 = vsel %vm1172_vm1, %v2511_v26, 0.0 }
 0x14d   : > { %v2023_v38 = vpop.f32.mrb[43].mxu0  ;;  %v1125_v39 = vpop.f32.mrb[40].mxu1  ;;  %v1211_v23 = vadd.f32 %v1210_v12, %v1209_v9 }
 0x14e   : > { %v2024_v43 = vadd.f32 %v2023_v38, %v2022_v36  ;;  %v965_v44 = vadd.f32 %v2021_v33, %v2421_v28  ;;  %v1127_v45 = vpop.f32.mrb[41].mxu1 }
 0x14f   : > { %v1128_v47 = vpop.f32.mrb[42].mxu1 }
 0x150   : > { %v2518_v48 = vadd.f32 %v1125_v39, %v965_v44  ;;  %v968_v49 = vadd.f32 %v2024_v43, %v2421_v28  ;;  %v1130_v50 = vpop.f32.mrb[43].mxu1 }
 0x152   : > { %v2523_v56 = vadd.f32 %v1128_v47, %v968_v49  ;;  %v2025_v57 = vpop.f32.mrb[44].mxu0  ;;  %v1212_v19 = vsel %vm1172_vm1, %v2518_v48, 0.0 }
 0x153   : > { %v2026_v59 = vpop.f32.mrb[45].mxu0  ;;  %v1213_v29 = vadd.f32 %v1212_v19, %v1211_v23 }
 0x154   : > { %v2027_v62 = vadd.f32 %v2026_v59, %v2025_v57  ;;  %v2028_v63 = vpop.f32.mrb[46].mxu0  ;;  %v1214_v33 = vsel %vm1172_vm1, %v2523_v56, 0.0 }
 0x155   : > { %v2029_v3 = vpop.f32.mrb[47].mxu0  ;;  %v1133_v5 = vpop.f32.mrb[44].mxu1  ;;  %v1215_v47 = vadd.f32 %v1214_v33, %v1213_v29 }
 0x156   : > { %v2030_v6 = vadd.f32 %v2029_v3, %v2028_v63  ;;  %v973_v7 = vadd.f32 %v2027_v62, %v2421_v28  ;;  %v1135_v8 = vpop.f32.mrb[45].mxu1 }
 0x157   : > { %v1136_v10 = vpop.f32.mrb[46].mxu1 }
 0x158   : > { %v2530_v13 = vadd.f32 %v1133_v5, %v973_v7  ;;  %v976_v14 = vadd.f32 %v2030_v6, %v2421_v28  ;;  %v1138_v17 = vpop.f32.mrb[47].mxu1 }
 0x15a   : > { %v2535_v20 = vadd.f32 %v1136_v10, %v976_v14  ;;  %v2031_v21 = vpop.f32.mrb[48].mxu0  ;;  %v1216_v43 = vsel %vm1172_vm1, %v2530_v13, 0.0 }
 0x15b   : > { %v2032_v24 = vpop.f32.mrb[49].mxu0  ;;  %v1217_v52 = vadd.f32 %v1216_v43, %v1215_v47 }
 0x15c   : > { %v2033_v25 = vadd.f32 %v2032_v24, %v2031_v21  ;;  %v2034_v27 = vpop.f32.mrb[50].mxu0  ;;  %v1218_v57 = vsel %vm1172_vm1, %v2535_v20, 0.0 }
 0x15d   : > { %v2035_v31 = vpop.f32.mrb[51].mxu0  ;;  %v1141_v32 = vpop.f32.mrb[48].mxu1  ;;  %v1219_v7 = vadd.f32 %v1218_v57, %v1217_v52 }
 0x15e   : > { %v2036_v36 = vadd.f32 %v2035_v31, %v2034_v27  ;;  %v981_v38 = vadd.f32 %v2033_v25, %v2421_v28  ;;  %v1143_v39 = vpop.f32.mrb[49].mxu1 }
 0x15f   : > { %v1144_v41 = vpop.f32.mrb[50].mxu1 }
 0x160   : > { %v2542_v44 = vadd.f32 %v1141_v32, %v981_v38  ;;  %v984_v45 = vadd.f32 %v2036_v36, %v2421_v28  ;;  %v1146_v46 = vpop.f32.mrb[51].mxu1 }
 0x162   : > { %v2545_v49 = vadd.f32 %v1144_v41, %v984_v45  ;;  %v2037_v50 = vpop.f32.mrb[52].mxu0  ;;  %v1220_v0 = vsel %vm1172_vm1, %v2542_v44, 0.0 }
 0x163   : > { %v2038_v55 = vpop.f32.mrb[53].mxu0  ;;  %v1221_v14 = vadd.f32 %v1220_v0, %v1219_v7 }
 0x164   : > { %v2039_v59 = vadd.f32 %v2038_v55, %v2037_v50  ;;  %v2040_v60 = vpop.f32.mrb[54].mxu0  ;;  %v1222_v17 = vsel %vm1172_vm1, %v2545_v49, 0.0 }
 0x165   : > { %v2041_v62 = vpop.f32.mrb[55].mxu0  ;;  %v1149_v63 = vpop.f32.mrb[52].mxu1  ;;  %v1223_v29 = vadd.f32 %v1222_v17, %v1221_v14 }
 0x166   : > { %v2042_v3 = vadd.f32 %v2041_v62, %v2040_v60  ;;  %v989_v5 = vadd.f32 %v2039_v59, %v2421_v28  ;;  %v1151_v6 = vpop.f32.mrb[53].mxu1 }
 0x167   : > { %v1152_v8 = vpop.f32.mrb[54].mxu1 }
 0x168   : > { %v2552_v9 = vadd.f32 %v1149_v63, %v989_v5  ;;  %v992_v10 = vadd.f32 %v2042_v3, %v2421_v28  ;;  %v1154_v12 = vpop.f32.mrb[55].mxu1 }
 0x16a   : > { %v2557_v19 = vadd.f32 %v1152_v8, %v992_v10  ;;  %v2043_v21 = vpop.f32.mrb[56].mxu0  ;;  %v1224_v24 = vsel %vm1172_vm1, %v2552_v9, 0.0 }
 0x16b   : > { %v2044_v23 = vpop.f32.mrb[57].mxu0  ;;  %v1225_v39 = vadd.f32 %v1224_v24, %v1223_v29 }
 0x16c   : > { %v2045_v25 = vadd.f32 %v2044_v23, %v2043_v21  ;;  %v2046_v27 = vpop.f32.mrb[58].mxu0  ;;  %v1226_v43 = vsel %vm1172_vm1, %v2557_v19, 0.0 }
 0x16d   : > { %v2047_v31 = vpop.f32.mrb[59].mxu0  ;;  %v1157_v32 = vpop.f32.mrb[56].mxu1  ;;  %v1227_v57 = vadd.f32 %v1226_v43, %v1225_v39 }
 0x16e   : > { %v2048_v33 = vadd.f32 %v2047_v31, %v2046_v27  ;;  %v997_v36 = vadd.f32 %v2045_v25, %v2421_v28  ;;  %v1159_v38 = vpop.f32.mrb[57].mxu1 }
 0x16f   : > { %v1160_v41 = vpop.f32.mrb[58].mxu1 }
 0x170   : > { %v2564_v45 = vadd.f32 %v1157_v32, %v997_v36  ;;  %v1000_v46 = vadd.f32 %v2048_v33, %v2421_v28  ;;  %v1162_v47 = vpop.f32.mrb[59].mxu1 }
 0x172   : > { %v1228_v50 = vsel %vm1172_vm1, %v2564_v45, 0.0  ;;  %v2569_v52 = vadd.f32 %v1160_v41, %v1000_v46  ;;  %v2049_v55 = vpop.f32.mrb[60].mxu0 }
 0x173   : > { %v2050_v59 = vpop.f32.mrb[61].mxu0  ;;  %v1229_v63 = vadd.f32 %v1228_v50, %v1227_v57 }
 0x174   : > { %v2051_v60 = vadd.f32 %v2050_v59, %v2049_v55  ;;  %v2052_v62 = vpop.f32.mrb[62].mxu0  ;;  %v1230_v5 = vsel %vm1172_vm1, %v2569_v52, 0.0 }
 0x175   : > { %v2053_v0 = vpop.f32.mrb[63].mxu0  ;;  %v1165_v3 = vpop.f32.mrb[60].mxu1  ;;  %v1231_v21 = vadd.f32 %v1230_v5, %v1229_v63 }
 0x176   : > { %v2054_v6 = vadd.f32 %v2053_v0, %v2052_v62  ;;  %v1005_v7 = vadd.f32 %v2051_v60, %v2421_v28  ;;  %v1167_v8 = vpop.f32.mrb[61].mxu1 }
 0x177   : > { %v1168_v10 = vpop.f32.mrb[62].mxu1 }
 0x178   : > { %v2574_v12 = vadd.f32 %v1165_v3, %v1005_v7  ;;  %v1008_v14 = vadd.f32 %v2054_v6, %v2421_v28  ;;  %v1170_v17 = vpop.f32.mrb[63].mxu1 }
 0x17a   : > { %v1232_v23 = vsel %vm1172_vm1, %v2574_v12, 0.0  ;;  %v2579_v24 = vadd.f32 %v1168_v10, %v1008_v14 }
 0x17b   : > { %v1233_v25 = vadd.f32 %v1232_v23, %v1231_v21 }
 0x17c   : > { %v1234_v27 = vsel %vm1172_vm1, %v2579_v24, 0.0 }
 0x17d   : > { %v1235_v29 = vadd.f32 %v1234_v27, %v1233_v25 }
 0x17f   : > { %1236 = vadd.xlane.f32.xlu0 %v1235_v29 }
 0x20c   : > { %v1237_v31 = vpop.xlane.xlu0 %1236 }
 0x20d   : > { %v1238_v32 = vrot.slane %v1237_v31, 4 }
 0x20f   : > { %v1239_v33 = vadd.f32 %v1238_v32, %v1237_v31 }
 0x211   : > { %v1240_v36 = vrot.slane %v1239_v33, 2 }
 0x213   : > { %v1241_v38 = vadd.f32 %v1240_v36, %v1239_v33 }
 0x215   : > { %v1242_v39 = vrot.slane %v1241_v38, 1 }
 0x217   : > { %v1243_v28 = vadd.f32 %v1242_v39, %v1241_v38 }
 0x219   : > { %2055 = vpush %v1243_v28 }
 0x24a   : > { %s2056_s30 = spop %2055 }
 0x24b   : > { %s1247_s6 = smul.f32 0.00048828125, %s2056_s30 }
 0x24d   : > { %v2583_v41 = vstv %s1247_s6 }
 0x24e   : > { %v2587_v43 = vsub.f32 %v2424_v37, %v2583_v41  ;;  %v2591_v46 = vsub.f32 %v2427_v40, %v2583_v41  ;;  %v2595_v47 = vsub.f32 %v2430_v51, %v2583_v41  ;;  %v2599_v50 = vsub.f32 %v2433_v54, %v2583_v41 }
 0x24f   : > { %v2607_v37 = vsub.f32 %v2436_v1, %v2583_v41  ;;  %v2613_v51 = vsub.f32 %v2439_v4, %v2583_v41  ;;  %v2621_v63 = vsub.f32 %v2442_v15, %v2583_v41  ;;  %v2628_v4 = vsub.f32 %v2445_v18, %v2583_v41 }
 0x250   : > { %v1281_v55 = vmul.f32 %v2587_v43, %v2587_v43  ;;  %v1282_v57 = vmul.f32 %v2591_v46, %v2591_v46  ;;  %v1283_v40 = vmul.f32 %v2595_v47, %v2595_v47  ;;  %v1284_v54 = vmul.f32 %v2599_v50, %v2599_v50 }
 0x251   : > { %v1285_v1 = vmul.f32 %v2607_v37, %v2607_v37  ;;  %v1286_v5 = vmul.f32 %v2613_v51, %v2613_v51  ;;  %v2635_v15 = vsub.f32 %v2448_v30, %v2583_v41  ;;  %v1287_v8 = vmul.f32 %v2621_v63, %v2621_v63 }
 0x252   : > { %v1313_v59 = vsel %vm1172_vm1, %v1281_v55, 0.0  ;;  %v1314_v60 = vsel %vm1172_vm1, %v1282_v57, 0.0  ;;  %v1316_v0 = vsel %vm1172_vm1, %v1283_v40, 0.0  ;;  %v1318_v6 = vsel %vm1172_vm1, %v1284_v54, 0.0 }
 0x253   : > { %v1315_v62 = vadd.f32 %v1314_v60, %v1313_v59  ;;  %v1320_v10 = vsel %vm1172_vm1, %v1285_v1, 0.0  ;;  %v2642_v18 = vsub.f32 %v2453_v34, %v2583_v41  ;;  %v1288_v17 = vmul.f32 %v2628_v4, %v2628_v4 }
 0x254   : > { %v1322_v21 = vsel %vm1172_vm1, %v1286_v5, 0.0  ;;  %v2649_v30 = vsub.f32 %v2462_v53, %v2583_v41  ;;  %v1289_v25 = vmul.f32 %v2635_v15, %v2635_v15  ;;  %v1324_v27 = vsel %vm1172_vm1, %v1287_v8, 0.0 }
 0x255   : > { %v1317_v3 = vadd.f32 %v1316_v0, %v1315_v62  ;;  %v2656_v34 = vsub.f32 %v2467_v58, %v2583_v41  ;;  %v1290_v31 = vmul.f32 %v2642_v18, %v2642_v18  ;;  %v1326_v32 = vsel %vm1172_vm1, %v1288_v17, 0.0 }
 0x256   : > { %v2663_v53 = vsub.f32 %v2474_v11, %v2583_v41  ;;  %v1291_v36 = vmul.f32 %v2649_v30, %v2649_v30  ;;  %v1328_v38 = vsel %vm1172_vm1, %v1289_v25, 0.0  ;;  %v2670_v58 = vsub.f32 %v2477_v16, %v2583_v41 }
 0x257   : > { %v1319_v7 = vadd.f32 %v1318_v6, %v1317_v3  ;;  %v1292_v28 = vmul.f32 %v2656_v34, %v2656_v34  ;;  %v1330_v55 = vsel %vm1172_vm1, %v1290_v31, 0.0  ;;  %v2677_v11 = vsub.f32 %v2484_v35, %v2583_v41 }
 0x258   : > { %v1293_v40 = vmul.f32 %v2663_v53, %v2663_v53  ;;  %v1332_v54 = vsel %vm1172_vm1, %v1291_v36, 0.0  ;;  %v2684_v16 = vsub.f32 %v2489_v42, %v2583_v41  ;;  %v1294_v60 = vmul.f32 %v2670_v58, %v2670_v58 }
 0x259   : > { %v1321_v14 = vadd.f32 %v1320_v10, %v1319_v7  ;;  %v1334_v62 = vsel %vm1172_vm1, %v1292_v28, 0.0  ;;  %v2691_v35 = vsub.f32 %v2496_v61, %v2583_v41  ;;  %v1295_v0 = vmul.f32 %v2677_v11, %v2677_v11 }
 0x25a   : > { %v1336_v3 = vsel %vm1172_vm1, %v1293_v40, 0.0  ;;  %v2698_v42 = vsub.f32 %v2501_v2, %v2583_v41  ;;  %v1296_v6 = vmul.f32 %v2684_v16, %v2684_v16  ;;  %v1338_v7 = vsel %vm1172_vm1, %v1294_v60, 0.0 }
 0x25b   : > { %v1323_v23 = vadd.f32 %v1322_v21, %v1321_v14  ;;  %v2705_v61 = vsub.f32 %v2508_v22, %v2583_v41  ;;  %v1297_v10 = vmul.f32 %v2691_v35, %v2691_v35  ;;  %v1340_v14 = vsel %vm1172_vm1, %v1295_v0, 0.0 }
 0x25c   : > { %v2712_v2 = vsub.f32 %v2511_v26, %v2583_v41  ;;  %v1298_v21 = vmul.f32 %v2698_v42, %v2698_v42  ;;  %v2719_v22 = vsub.f32 %v2518_v48, %v2583_v41  ;;  %v2726_v26 = vsub.f32 %v2523_v56, %v2583_v41 }
 0x25d   : > { %v1325_v29 = vadd.f32 %v1324_v27, %v1323_v23  ;;  %v1342_v23 = vsel %vm1172_vm1, %v1296_v6, 0.0  ;;  %v1299_v27 = vmul.f32 %v2705_v61, %v2705_v61  ;;  %v2733_v48 = vsub.f32 %v2530_v13, %v2583_v41 }
 0x25e   : > { %v2740_v56 = vsub.f32 %v2535_v20, %v2583_v41  ;;  %v2747_v13 = vsub.f32 %v2542_v44, %v2583_v41  ;;  %v2754_v20 = vsub.f32 %v2545_v49, %v2583_v41  ;;  %v2761_v44 = vsub.f32 %v2552_v9, %v2583_v41 }
 0x25f   : > { %v1327_v33 = vadd.f32 %v1326_v32, %v1325_v29  ;;  %v1344_v29 = vsel %vm1172_vm1, %v1297_v10, 0.0  ;;  %v1300_v32 = vmul.f32 %v2712_v2, %v2712_v2  ;;  %v2768_v49 = vsub.f32 %v2557_v19, %v2583_v41 }
 0x260   : > { %v2775_v9 = vsub.f32 %v2564_v45, %v2583_v41  ;;  %v2782_v19 = vsub.f32 %v2569_v52, %v2583_v41  ;;  %v2789_v45 = vsub.f32 %v2574_v12, %v2583_v41  ;;  %v2796_v52 = vsub.f32 %v2579_v24, %v2583_v41 }
 0x261   : > { %v1329_v39 = vadd.f32 %v1328_v38, %v1327_v33  ;;  %v1346_v33 = vsel %vm1172_vm1, %v1298_v21, 0.0  ;;  %v1301_v38 = vmul.f32 %v2719_v22, %v2719_v22 }
 0x262   : > { %v1311_v12 = vmul.f32 %v2789_v45, %v2789_v45 }
 0x263   : > { %v1331_v57 = vadd.f32 %v1330_v55, %v1329_v39  ;;  %v1348_v39 = vsel %vm1172_vm1, %v1299_v27, 0.0  ;;  %v1302_v55 = vmul.f32 %v2726_v26, %v2726_v26 }
 0x264   : > { %v1372_v24 = vsel %vm1172_vm1, %v1311_v12, 0.0 }
 0x265   : > { %v1333_v59 = vadd.f32 %v1332_v54, %v1331_v57  ;;  %v1350_v57 = vsel %vm1172_vm1, %v1300_v32, 0.0  ;;  %v1303_v54 = vmul.f32 %v2733_v48, %v2733_v48 }
 0x267   : > { %v1335_v1 = vadd.f32 %v1334_v62, %v1333_v59  ;;  %v1352_v59 = vsel %vm1172_vm1, %v1301_v38, 0.0  ;;  %v1304_v62 = vmul.f32 %v2740_v56, %v2740_v56 }
 0x269   : > { %v1337_v5 = vadd.f32 %v1336_v3, %v1335_v1  ;;  %v1354_v1 = vsel %vm1172_vm1, %v1302_v55, 0.0  ;;  %v1305_v3 = vmul.f32 %v2747_v13, %v2747_v13  ;;  %v1312_v55 = vmul.f32 %v2796_v52, %v2796_v52 }
 0x26b   : > { %v1339_v8 = vadd.f32 %v1338_v7, %v1337_v5  ;;  %v1356_v5 = vsel %vm1172_vm1, %v1303_v54, 0.0  ;;  %v1306_v7 = vmul.f32 %v2754_v20, %v2754_v20  ;;  %v1374_v54 = vsel %vm1172_vm1, %v1312_v55, 0.0 }
 0x26d   : > { %v1341_v17 = vadd.f32 %v1340_v14, %v1339_v8  ;;  %v1358_v8 = vsel %vm1172_vm1, %v1304_v62, 0.0  ;;  %v1307_v14 = vmul.f32 %v2761_v44, %v2761_v44 }
 0x26f   : > { %v1343_v25 = vadd.f32 %v1342_v23, %v1341_v17  ;;  %v1360_v17 = vsel %vm1172_vm1, %v1305_v3, 0.0  ;;  %v1308_v23 = vmul.f32 %v2768_v49, %v2768_v49 }
 0x271   : > { %v1345_v31 = vadd.f32 %v1344_v29, %v1343_v25  ;;  %v1362_v25 = vsel %vm1172_vm1, %v1306_v7, 0.0  ;;  %v1309_v29 = vmul.f32 %v2775_v9, %v2775_v9 }
 0x273   : > { %v1347_v36 = vadd.f32 %v1346_v33, %v1345_v31  ;;  %v1364_v31 = vsel %vm1172_vm1, %v1307_v14, 0.0  ;;  %v1310_v33 = vmul.f32 %v2782_v19, %v2782_v19 }
 0x275   : > { %v1349_v28 = vadd.f32 %v1348_v39, %v1347_v36  ;;  %v1366_v36 = vsel %vm1172_vm1, %v1308_v23, 0.0  ;;  %v1368_v39 = vsel %vm1172_vm1, %v1309_v29, 0.0 }
 0x277   : > { %v1351_v40 = vadd.f32 %v1350_v57, %v1349_v28  ;;  %v1370_v57 = vsel %vm1172_vm1, %v1310_v33, 0.0 }
 0x279   : > { %v1353_v60 = vadd.f32 %v1352_v59, %v1351_v40 }
 0x27b   : > { %v1355_v0 = vadd.f32 %v1354_v1, %v1353_v60 }
 0x27d   : > { %v1357_v6 = vadd.f32 %v1356_v5, %v1355_v0 }
 0x27f   : > { %v1359_v10 = vadd.f32 %v1358_v8, %v1357_v6 }
 0x281   : > { %v1361_v21 = vadd.f32 %v1360_v17, %v1359_v10 }
 0x283   : > { %v1363_v27 = vadd.f32 %v1362_v25, %v1361_v21 }
 0x285   : > { %v1365_v32 = vadd.f32 %v1364_v31, %v1363_v27 }
 0x287   : > { %v1367_v38 = vadd.f32 %v1366_v36, %v1365_v32 }
 0x289   : > { %v1369_v28 = vadd.f32 %v1368_v39, %v1367_v38 }
 0x28b   : > { %v1371_v40 = vadd.f32 %v1370_v57, %v1369_v28 }
 0x28d   : > { %v1373_v41 = vadd.f32 %v1372_v24, %v1371_v40 }
 0x28f   : > { %v1375_v59 = vadd.f32 %v1374_v54, %v1373_v41 }
 0x291   : > { %1376 = vadd.xlane.f32.xlu0 %v1375_v59 }
 0x31e   : > { %v1377_v60 = vpop.xlane.xlu0 %1376 }
 0x31f   : > { %v1378_v62 = vrot.slane %v1377_v60, 4 }
 0x321   : > { %v1379_v1 = vadd.f32 %v1378_v62, %v1377_v60 }
 0x323   : > { %v1380_v0 = vrot.slane %v1379_v1, 2 }
 0x325   : > { %v1381_v3 = vadd.f32 %v1380_v0, %v1379_v1 }
 0x327   : > { %v1382_v5 = vrot.slane %v1381_v3, 1 }
 0x329   : > { %v1383_v6 = vadd.f32 %v1382_v5, %v1381_v3 }
 0x32b   : > { %2057 = vpush %v1383_v6 }
 0x35c   : > { %s2058_s7 = spop %2057 }
 0x35d   : > { %s1387_s8 = smul.f32 0.0004885198, %s2058_s7 }
 0x35f   : > { %v1388_v7 = vstv %s1387_s8 }
 0x360   : > { %2191 = vrsqrt.f32 %v1388_v7  ;;  %vm1391_vm2 = vcmp.eq.f32.partialorder %v1388_v7, inf  ;;  %v1394_v14 = vand.u32 2147483648, %v1388_v7  ;;  %vm1393_vm3 = vcmp.eq.f32.partialorder %v1388_v7, 0.0 }
 0x36a   : > { %v2192_v8 = vpop.eup %2191 }
 0x36b   : > { %v1390_v10 = vmul.f32 %v2192_v8, %v1388_v7  ;;  %v1874_v8 = vld [vmem:[%s3020_s4] ss:$0 sm:$0xff] }
 0x36d   : > { %v1392_v17 = vsel %vm1391_vm2, %v1388_v7, %v1390_v10 }
 0x36e   : > { %v1395_v21 = vsel %vm1393_vm3, %v1394_v14, %v1392_v17 }
 0x36f   : > { %2059 = vpush %v1395_v21 }
 0x3a0   : > { %s2060_s9 = spop %2059 }
 0x3a1   : > { %s1397_s10 = sadd.f32 1e-05, %s2060_s9 }
 0x3a3   : > { %v1398_v23 = vstv %s1397_s10 }
 0x3a4   : > { %2193 = vrcp.f32 %v1398_v23 }
 0x3ae   : > { %v2194_v25 = vpop.eup %2193 }
 0x3af   : > { %v1400_v27 = vmul.f32 %v2194_v25, %v2587_v43  ;;  %v1401_v29 = vmul.f32 %v2194_v25, %v2591_v46  ;;  %v1402_v31 = vmul.f32 %v2194_v25, %v2595_v47  ;;  %v1403_v32 = vmul.f32 %v2194_v25, %v2599_v50 }
 0x3b0   : > { %v1404_v33 = vmul.f32 %v2194_v25, %v2607_v37  ;;  %v1405_v36 = vmul.f32 %v2194_v25, %v2613_v51  ;;  %v1406_v38 = vmul.f32 %v2194_v25, %v2621_v63  ;;  %v1407_v12 = vmul.f32 %v2194_v25, %v2628_v4 }
 0x3b1   : > { %v1408_v39 = vmul.f32 %v2194_v25, %v2635_v15  ;;  %v1409_v28 = vmul.f32 %v2194_v25, %v2642_v18  ;;  %v1410_v43 = vmul.f32 %v2194_v25, %v2649_v30  ;;  %v1411_v46 = vmul.f32 %v2194_v25, %v2656_v34 }
 0x3b2   : > { %v1412_v47 = vmul.f32 %v2194_v25, %v2663_v53  ;;  %v1413_v50 = vmul.f32 %v2194_v25, %v2670_v58  ;;  %v1414_v37 = vmul.f32 %v2194_v25, %v2677_v11  ;;  %v1415_v51 = vmul.f32 %v2194_v25, %v2684_v16  ;;  %v1873_v11 = vld [vmem:[%s3019_s3] ss:$0 sm:$0xff] }
 0x3b3   : > { %v1416_v63 = vmul.f32 %v2194_v25, %v2691_v35  ;;  %v1417_v4 = vmul.f32 %v2194_v25, %v2698_v42  ;;  %v1418_v15 = vmul.f32 %v2194_v25, %v2705_v61  ;;  %v1419_v18 = vmul.f32 %v2194_v25, %v2712_v2 }
 0x3b4   : > { %v1420_v30 = vmul.f32 %v2194_v25, %v2719_v22  ;;  %v1421_v34 = vmul.f32 %v2194_v25, %v2726_v26  ;;  %v1422_v53 = vmul.f32 %v2194_v25, %v2733_v48  ;;  %v1423_v58 = vmul.f32 %v2194_v25, %v2740_v56 }
 0x3b5   : > { %v1424_v16 = vmul.f32 %v2194_v25, %v2747_v13  ;;  %v1425_v35 = vmul.f32 %v2194_v25, %v2754_v20  ;;  %v1426_v42 = vmul.f32 %v2194_v25, %v2761_v44  ;;  %v1427_v61 = vmul.f32 %v2194_v25, %v2768_v49 }
 0x3b6   : > { %v1428_v2 = vmul.f32 %v2194_v25, %v2775_v9  ;;  %v1429_v22 = vmul.f32 %v2194_v25, %v2782_v19  ;;  %v1430_v26 = vmul.f32 %v2194_v25, %v2789_v45  ;;  %v1431_v48 = vmul.f32 %v2194_v25, %v2796_v52 }
 0x3b7   : > { %v1439_v56 = vmul.f32 %v1873_v11, %v1400_v27  ;;  %v1440_v55 = vmul.f32 %v1873_v11, %v1401_v29  ;;  %v1441_v57 = vmul.f32 %v1873_v11, %v1402_v31  ;;  %v1442_v40 = vmul.f32 %v1873_v11, %v1403_v32 }
 0x3b8   : > { %v1443_v24 = vmul.f32 %v1873_v11, %v1404_v33  ;;  %v1444_v13 = vmul.f32 %v1873_v11, %v1405_v36  ;;  %v1445_v41 = vmul.f32 %v1873_v11, %v1406_v38  ;;  %v1446_v20 = vmul.f32 %v1873_v11, %v1407_v12 }
 0x3b9   : > { %v1447_v54 = vmul.f32 %v1873_v11, %v1408_v39  ;;  %v1448_v44 = vmul.f32 %v1873_v11, %v1409_v28  ;;  %v1449_v59 = vmul.f32 %v1873_v11, %v1410_v43  ;;  %v1450_v49 = vmul.f32 %v1873_v11, %v1411_v46 }
 0x3ba   : > { %v1451_v60 = vmul.f32 %v1873_v11, %v1412_v47  ;;  %v1452_v9 = vmul.f32 %v1873_v11, %v1413_v50  ;;  %v1453_v62 = vmul.f32 %v1873_v11, %v1414_v37  ;;  %v1454_v19 = vmul.f32 %v1873_v11, %v1415_v51 }
 0x3bb   : > { %v1455_v1 = vmul.f32 %v1873_v11, %v1416_v63  ;;  %v1456_v45 = vmul.f32 %v1873_v11, %v1417_v4  ;;  %v1457_v0 = vmul.f32 %v1873_v11, %v1418_v15  ;;  %v1458_v52 = vmul.f32 %v1873_v11, %v1419_v18 }
 0x3bc   : > { %v1459_v3 = vmul.f32 %v1873_v11, %v1420_v30  ;;  %v1460_v5 = vmul.f32 %v1873_v11, %v1421_v34  ;;  %v1461_v6 = vmul.f32 %v1873_v11, %v1422_v53  ;;  %v1462_v7 = vmul.f32 %v1873_v11, %v1423_v58 }
 0x3bd   : > { %v1463_v10 = vmul.f32 %v1873_v11, %v1424_v16  ;;  %v1464_v14 = vmul.f32 %v1873_v11, %v1425_v35  ;;  %v1465_v17 = vmul.f32 %v1873_v11, %v1426_v42  ;;  %v1466_v21 = vmul.f32 %v1873_v11, %v1427_v61 }
 0x3be   : > { %v1467_v23 = vmul.f32 %v1873_v11, %v1428_v2  ;;  %v1468_v25 = vmul.f32 %v1873_v11, %v1429_v22  ;;  %v1469_v27 = vmul.f32 %v1873_v11, %v1430_v26  ;;  %v1470_v29 = vmul.f32 %v1873_v11, %v1431_v48 }
 0x3bf   : > { %v2847_v31 = vadd.f32 %v1874_v8, %v1439_v56  ;;  %v2849_v32 = vadd.f32 %v1874_v8, %v1440_v55  ;;  %v2851_v33 = vadd.f32 %v1874_v8, %v1441_v57  ;;  %v2853_v36 = vadd.f32 %v1874_v8, %v1442_v40 }
 0x3c0   : > { %v2855_v38 = vadd.f32 %v1874_v8, %v1443_v24  ;;  %v2857_v12 = vadd.f32 %v1874_v8, %v1444_v13  ;;  %v2859_v39 = vadd.f32 %v1874_v8, %v1445_v41  ;;  %v2861_v28 = vadd.f32 %v1874_v8, %v1446_v20 }
 0x3c1   : > { %v2863_v43 = vadd.f32 %v1874_v8, %v1447_v54  ;;  %v2865_v46 = vadd.f32 %v1874_v8, %v1448_v44  ;;  %v2867_v47 = vadd.f32 %v1874_v8, %v1449_v59  ;;  %v2869_v50 = vadd.f32 %v1874_v8, %v1450_v49 }
 0x3c2   : > { %v2871_v37 = vadd.f32 %v1874_v8, %v1451_v60  ;;  %v2873_v51 = vadd.f32 %v1874_v8, %v1452_v9  ;;  %v2875_v63 = vadd.f32 %v1874_v8, %v1453_v62  ;;  %v2877_v4 = vadd.f32 %v1874_v8, %v1454_v19 }
 0x3c3   : > { %v2879_v15 = vadd.f32 %v1874_v8, %v1455_v1  ;;  %v2881_v18 = vadd.f32 %v1874_v8, %v1456_v45  ;;  %v2883_v30 = vadd.f32 %v1874_v8, %v1457_v0  ;;  %v2885_v34 = vadd.f32 %v1874_v8, %v1458_v52 }
 0x3c4   : > { %v2887_v53 = vadd.f32 %v1874_v8, %v1459_v3  ;;  %v2889_v58 = vadd.f32 %v1874_v8, %v1460_v5  ;;  %v2891_v11 = vadd.f32 %v1874_v8, %v1461_v6  ;;  %v2893_v16 = vadd.f32 %v1874_v8, %v1462_v7 }
 0x3c5   : > { %v2895_v35 = vadd.f32 %v1874_v8, %v1463_v10  ;;  %v2897_v42 = vadd.f32 %v1874_v8, %v1464_v14  ;;  %v2899_v61 = vadd.f32 %v1874_v8, %v1465_v17  ;;  %v2901_v2 = vadd.f32 %v1874_v8, %v1466_v21 }
 0x3c6   : > { %v2903_v22 = vadd.f32 %v1874_v8, %v1467_v23  ;;  %v2905_v26 = vadd.f32 %v1874_v8, %v1468_v25  ;;  %v2907_v48 = vadd.f32 %v1874_v8, %v1469_v27  ;;  %v2909_v56 = vadd.f32 %v1874_v8, %v1470_v29 }
 0x3c7   : > { %v1510_v55 = vmax.f32 %v2847_v31, 0.0  ;;  %v1511_v57 = vmax.f32 %v2849_v32, 0.0  ;;  %v1512_v40 = vmax.f32 %v2851_v33, 0.0  ;;  %v1513_v24 = vmax.f32 %v2853_v36, 0.0 }
 0x3c8   : > { %v1514_v13 = vmax.f32 %v2855_v38, 0.0  ;;  %v1515_v41 = vmax.f32 %v2857_v12, 0.0  ;;  %v1516_v20 = vmax.f32 %v2859_v39, 0.0  ;;  %v1517_v54 = vmax.f32 %v2861_v28, 0.0 }
 0x3c9   : > { %v1518_v44 = vmax.f32 %v2863_v43, 0.0  ;;  %v1519_v59 = vmax.f32 %v2865_v46, 0.0  ;;  %v1520_v49 = vmax.f32 %v2867_v47, 0.0  ;;  %v1521_v60 = vmax.f32 %v2869_v50, 0.0 }
 0x3ca   : > { %v1522_v9 = vmax.f32 %v2871_v37, 0.0  ;;  %v1523_v62 = vmax.f32 %v2873_v51, 0.0  ;;  %v1524_v19 = vmax.f32 %v2875_v63, 0.0  ;;  %v1525_v1 = vmax.f32 %v2877_v4, 0.0 }
 0x3cb   : > { %v1526_v45 = vmax.f32 %v2879_v15, 0.0  ;;  %v1527_v0 = vmax.f32 %v2881_v18, 0.0  ;;  %v1528_v52 = vmax.f32 %v2883_v30, 0.0  ;;  %v1529_v3 = vmax.f32 %v2885_v34, 0.0 }
 0x3cc   : > { %v1530_v5 = vmax.f32 %v2887_v53, 0.0  ;;  %v1531_v6 = vmax.f32 %v2889_v58, 0.0  ;;  %v1532_v7 = vmax.f32 %v2891_v11, 0.0  ;;  %v1533_v8 = vmax.f32 %v2893_v16, 0.0 }
 0x3cd   : > { %v1534_v10 = vmax.f32 %v2895_v35, 0.0  ;;  %v1535_v14 = vmax.f32 %v2897_v42, 0.0  ;;  %v1536_v17 = vmax.f32 %v2899_v61, 0.0  ;;  %v1537_v21 = vmax.f32 %v2901_v2, 0.0 }
 0x3ce   : > { %v1538_v23 = vmax.f32 %v2903_v22, 0.0  ;;  %v1539_v25 = vmax.f32 %v2905_v26, 0.0  ;;  %v1540_v27 = vmax.f32 %v2907_v48, 0.0  ;;  %v1541_v29 = vmax.f32 %v2909_v56, 0.0 }
 0x3cf   : > { %v1911_v31 = vpack.c.bf16 %v1510_v55, %v1510_v55  ;;  %v1912_v32 = vpack.c.bf16 %v1511_v57, %v1511_v57  ;;  %v1913_v33 = vpack.c.bf16 %v1512_v40, %v1512_v40  ;;  %v1914_v36 = vpack.c.bf16 %v1513_v24, %v1513_v24 }
 0x3d0   : > { %v1915_v38 = vpack.c.bf16 %v1514_v13, %v1514_v13  ;;  %v1916_v12 = vpack.c.bf16 %v1515_v41, %v1515_v41  ;;  %v1917_v39 = vpack.c.bf16 %v1516_v20, %v1516_v20  ;;  %v1918_v28 = vpack.c.bf16 %v1517_v54, %v1517_v54 }
 0x3d1   : > { %v1919_v43 = vpack.c.bf16 %v1518_v44, %v1518_v44  ;;  %v1920_v46 = vpack.c.bf16 %v1519_v59, %v1519_v59  ;;  %v1921_v47 = vpack.c.bf16 %v1520_v49, %v1520_v49  ;;  %v1922_v50 = vpack.c.bf16 %v1521_v60, %v1521_v60  ;;  %1671 = vst.msk [vmem:[%s2943_s17] sm:$0xf] %vm1670_vm4, %v1911_v31 }
 0x3d2   : > { %1672 = vst.msk [vmem:[%s2943_s17 + $0x4] sm:$0xf] %vm1670_vm4, %v1912_v32  ;;  %1673 = vst.msk [vmem:[%s2943_s17 + $0x8] sm:$0xf] %vm1670_vm4, %v1913_v33  ;;  %v1923_v37 = vpack.c.bf16 %v1522_v9, %v1522_v9  ;;  %v1924_v51 = vpack.c.bf16 %v1523_v62, %v1523_v62  ;;  %v1925_v63 = vpack.c.bf16 %v1524_v19, %v1524_v19 }
 0x3d3   : > { %1674 = vst.msk [vmem:[%s2943_s17 + $0xc] sm:$0xf] %vm1670_vm4, %v1914_v36  ;;  %v1926_v4 = vpack.c.bf16 %v1525_v1, %v1525_v1  ;;  %1675 = vst.msk [vmem:[%s2943_s17 + $0x10] sm:$0xf] %vm1670_vm4, %v1915_v38  ;;  %v1927_v15 = vpack.c.bf16 %v1526_v45, %v1526_v45  ;;  %v1928_v18 = vpack.c.bf16 %v1527_v0, %v1527_v0 }
 0x3d4   : > { %1676 = vst.msk [vmem:[%s2943_s17 + $0x14] sm:$0xf] %vm1670_vm4, %v1916_v12  ;;  %1677 = vst.msk [vmem:[%s2943_s17 + $0x18] sm:$0xf] %vm1670_vm4, %v1917_v39  ;;  %v1929_v30 = vpack.c.bf16 %v1528_v52, %v1528_v52  ;;  %v1930_v34 = vpack.c.bf16 %v1529_v3, %v1529_v3  ;;  %v1931_v53 = vpack.c.bf16 %v1530_v5, %v1530_v5 }
 0x3d5   : > { %1678 = vst.msk [vmem:[%s2943_s17 + $0x1c] sm:$0xf] %vm1670_vm4, %v1918_v28  ;;  %1679 = vst.msk [vmem:[%s2943_s17 + $0x20] sm:$0xf] %vm1670_vm4, %v1919_v43  ;;  %v1932_v58 = vpack.c.bf16 %v1531_v6, %v1531_v6  ;;  %v1933_v11 = vpack.c.bf16 %v1532_v7, %v1532_v7  ;;  %v1934_v16 = vpack.c.bf16 %v1533_v8, %v1533_v8 }
 0x3d6   : > { %1680 = vst.msk [vmem:[%s2943_s17 + $0x24] sm:$0xf] %vm1670_vm4, %v1920_v46  ;;  %1681 = vst.msk [vmem:[%s2943_s17 + $0x28] sm:$0xf] %vm1670_vm4, %v1921_v47  ;;  %v1935_v35 = vpack.c.bf16 %v1534_v10, %v1534_v10  ;;  %v1936_v42 = vpack.c.bf16 %v1535_v14, %v1535_v14  ;;  %v1937_v61 = vpack.c.bf16 %v1536_v17, %v1536_v17 }
 0x3d7   : > { %1682 = vst.msk [vmem:[%s2943_s17 + $0x2c] sm:$0xf] %vm1670_vm4, %v1922_v50  ;;  %1683 = vst.msk [vmem:[%s2943_s17 + $0x30] sm:$0xf] %vm1670_vm4, %v1923_v37  ;;  %v1938_v2 = vpack.c.bf16 %v1537_v21, %v1537_v21  ;;  %v1939_v22 = vpack.c.bf16 %v1538_v23, %v1538_v23  ;;  %v1940_v26 = vpack.c.bf16 %v1539_v25, %v1539_v25 }
 0x3d8   : > { %1684 = vst.msk [vmem:[%s2943_s17 + $0x34] sm:$0xf] %vm1670_vm4, %v1924_v51  ;;  %1685 = vst.msk [vmem:[%s2943_s17 + $0x38] sm:$0xf] %vm1670_vm4, %v1925_v63  ;;  %v1941_v48 = vpack.c.bf16 %v1540_v27, %v1540_v27  ;;  %v1942_v56 = vpack.c.bf16 %v1541_v29, %v1541_v29 }
 0x3d9   : > { %1686 = vst.msk [vmem:[%s2943_s17 + $0x3c] sm:$0xf] %vm1670_vm4, %v1926_v4  ;;  %1687 = vst.msk [vmem:[%s2943_s17 + $0x40] sm:$0xf] %vm1670_vm4, %v1927_v15 }
 0x3da   : > { %1688 = vst.msk [vmem:[%s2943_s17 + $0x44] sm:$0xf] %vm1670_vm4, %v1928_v18  ;;  %1689 = vst.msk [vmem:[%s2943_s17 + $0x48] sm:$0xf] %vm1670_vm4, %v1929_v30 }
 0x3db   : > { %1690 = vst.msk [vmem:[%s2943_s17 + $0x4c] sm:$0xf] %vm1670_vm4, %v1930_v34  ;;  %1691 = vst.msk [vmem:[%s2943_s17 + $0x50] sm:$0xf] %vm1670_vm4, %v1931_v53 }
 0x3dc   : > { %1692 = vst.msk [vmem:[%s2943_s17 + $0x54] sm:$0xf] %vm1670_vm4, %v1932_v58  ;;  %1693 = vst.msk [vmem:[%s2943_s17 + $0x58] sm:$0xf] %vm1670_vm4, %v1933_v11 }
 0x3dd   : > { %1694 = vst.msk [vmem:[%s2943_s17 + $0x5c] sm:$0xf] %vm1670_vm4, %v1934_v16  ;;  %1695 = vst.msk [vmem:[%s2943_s17 + $0x60] sm:$0xf] %vm1670_vm4, %v1935_v35 }
 0x3de   : > { %1696 = vst.msk [vmem:[%s2943_s17 + $0x64] sm:$0xf] %vm1670_vm4, %v1936_v42  ;;  %1697 = vst.msk [vmem:[%s2943_s17 + $0x68] sm:$0xf] %vm1670_vm4, %v1937_v61 }
 0x3df   : > { %1698 = vst.msk [vmem:[%s2943_s17 + $0x6c] sm:$0xf] %vm1670_vm4, %v1938_v2  ;;  %1699 = vst.msk [vmem:[%s2943_s17 + $0x70] sm:$0xf] %vm1670_vm4, %v1939_v22 }
 0x3e0   : > { %1700 = vst.msk [vmem:[%s2943_s17 + $0x74] sm:$0xf] %vm1670_vm4, %v1940_v26  ;;  %1701 = vst.msk [vmem:[%s2943_s17 + $0x78] sm:$0xf] %vm1670_vm4, %v1941_v48 }
 0x3e1   : > { %1702 = vst.msk [vmem:[%s2943_s17 + $0x7c] sm:$0xf] %vm1670_vm4, %v1942_v56 }
 0x3e2 PF: > { %s15_s18 = sadd.s32 1, %s2201_s18  }
 0x3e3   : > { %p12_p4 = scmp.ge.s32.totalorder %s15_s18, 4  }
 0x3e5   :  { %14 = sbr.rel (!%p12_p4) target bundleno = 1 (0x1), region = 70 }

// kernel: style_transfer_forward.17
= control target key start
LH: loop header
LB: loop body
LE: loop exit
PB: predicated region body
PF: predicated region fallthrough
CT: control target
= control target key end

     0   :  { %s1884_s12 = smov 0   ;;  %s2178_s0 = inlined_call_operand.vmem [shape: bf16[2,256,392], index: 0, kind: input, shape index: {}]   ;;  %s2179_s1 = inlined_call_operand.vmem [shape: bf16[392,3], index: 1, kind: input, shape index: {}]   ;;  %s2180_s2 = inlined_call_operand.vmem [shape: f32[1,3], index: 2, kind: input, shape index: {}]   ;;  %s2181_s3 = inlined_call_operand.vmem [shape: bf16[2,256,3], index: 3, kind: output, shape index: {}]  }
   0x1 LB: > { %s1366_s13 = sadd.s32 4294967295, %s1861_s12   ;;  %p1370_p0 = scmp.ge.s32.totalorder %s1861_s12, 1  ;;  %s1861_s12 = sphi %s1884_s12, %s13_s12  }
   0x2   : > { %p137_p1 = scmp.lt.s32.totalorder %s1861_s12, 3 }
   0x4   : > { %p138_p2 = pnand %p1370_p0, %p137_p1 }
   0x5   : > { %v1670_v0 = vld [vmem:[%s2179_s1 + $0x40] sm:$0xff] (!%p138_p2)   ;;  %v1863_v1 = vmov (!%p138_p2), 0   ;;  %v1673_v4 = vld [vmem:[%s2179_s1 + $0x48] sm:$0xff] (!%p138_p2)   ;;  %v1676_v7 = vld [vmem:[%s2179_s1 + $0x50] sm:$0xff] (!%p138_p2)   ;;  %p161_p3 = scmp.lt.s32.totalorder (!%p138_p2), %s1366_s13, 1  ;;  %vm743_vm0 = vcmask (!%p138_p2), 64512  }
   0x6   : > { %141 = sbr.rel (%p138_p2) target bundleno = 394 (0x18a), region = 32  ;;  %957 = vmatprep.subr.bf16.mxu1 (!%p138_p2), %v1863_v1  ;;  %v1671_v2 = vld [vmem:[%s2179_s1 + $0x80] sm:$0xff] (!%p138_p2)   ;;  %1549 = vmatprep.subr.bf16.mxu0 (!%p138_p2), %v1670_v0  ;;  %v1674_v5 = vld [vmem:[%s2179_s1 + $0x88] sm:$0xff] (!%p138_p2)   ;;  %v1677_v8 = vld [vmem:[%s2179_s1 + $0x90] sm:$0xff] (!%p138_p2)   ;;  %vm792_vm1 = vcmask (!%p138_p2), 1043456   ;;  %vm1278_vm2 = vcmask (!%p138_p2), 19456  }
   0x7   : > { %v1672_v3 = vld [vmem:[%s2179_s1] sm:$0xff] (!%p138_p2)   ;;  %958 = vmatpush1.bf16.msra.mxu1 (!%p138_p2), %v1671_v2  ;;  %v1675_v6 = vld [vmem:[%s2179_s1 + $0x8] sm:$0xff] (!%p138_p2)   ;;  %v1678_v9 = vld [vmem:[%s2179_s1 + $0x10] sm:$0xff] (!%p138_p2)  }
   0x8   : > { %1550 = vmatpush3.bf16.msra.mxu0 (!%p138_p2), %v1672_v3  ;;  %959 = vmatprep.subr.bf16.mxu1 (!%p138_p2), %v1863_v1  ;;  %v1679_v10 = vld [vmem:[%s2179_s1 + $0x58] sm:$0xff] (!%p138_p2)   ;;  %v1682_v13 = vld [vmem:[%s2179_s1 + $0x60] sm:$0xff] (!%p138_p2)   ;;  %v1685_v16 = vld [vmem:[%s2179_s1 + $0x68] sm:$0xff] (!%p138_p2)  }
   0x9   : > { %1551 = vmatprep.subr.bf16.mxu0 (!%p138_p2), %v1673_v4  ;;  %v1680_v11 = vld [vmem:[%s2179_s1 + $0x98] sm:$0xff] (!%p138_p2)   ;;  %v1683_v14 = vld [vmem:[%s2179_s1 + $0xa0] sm:$0xff] (!%p138_p2)   ;;  %v1686_v17 = vld [vmem:[%s2179_s1 + $0xa8] sm:$0xff] (!%p138_p2)  }
   0xa   : > { %v1681_v12 = vld [vmem:[%s2179_s1 + $0x18] sm:$0xff] (!%p138_p2)   ;;  %v1684_v15 = vld [vmem:[%s2179_s1 + $0x20] sm:$0xff] (!%p138_p2)   ;;  %v1687_v18 = vld [vmem:[%s2179_s1 + $0x28] sm:$0xff] (!%p138_p2)  }
   0xb   : > { %960 = vmatpush1.bf16.msra.mxu1 (!%p138_p2), %v1674_v5  ;;  %v1688_v19 = vld [vmem:[%s2179_s1 + $0x70] sm:$0xff] (!%p138_p2)   ;;  %v1691_v22 = vld [vmem:[%s2179_s1 + $0x78] sm:$0xff] (!%p138_p2)   ;;  %v1697_v27 = vld [vmem:[%s2179_s1 + $0xc0] ss:$0 sps:$4 sm:$0xff] (!%p138_p2)  }
   0xc   : > { %1552 = vmatpush3.bf16.msra.mxu0 (!%p138_p2), %v1675_v6  ;;  %961 = vmatprep.subr.bf16.mxu1 (!%p138_p2), %v1863_v1  ;;  %v1689_v20 = vld [vmem:[%s2179_s1 + $0xb0] sm:$0xff] (!%p138_p2)   ;;  %v1692_v24 = vld [vmem:[%s2179_s1 + $0xb8] sm:$0xff] (!%p138_p2)   ;;  %v794_v29 = vsel (!%p138_p2), %vm792_vm1, %v1697_v27, 0 }
   0xd   : > { %1553 = vmatprep.subr.bf16.mxu0 %v1676_v7  ;;  %s2183_s13 = smov (!%p161_p3, %s1366_s13), 1  ;;  %v1690_v21 = vld [vmem:[%s2179_s1 + $0x30] sm:$0xff]   ;;  %v1693_v26 = vld [vmem:[%s2179_s1 + $0x38] sm:$0xff]  }
   0xe   : > { %s1515_s23 = sshll.u32 %s2183_s13, 9  ;;  %s1516_s20 = sshll.u32 %s2183_s13, 7 }
   0xf   : > { %962 = vmatpush1.bf16.msra.mxu1 %v1677_v8  ;;  %s1965_s30 = scalar_lea.vmem %s2178_s0, %s1515_s23  ;;  %s2081_s23 = scalar_lea.vmem %s2181_s3, %s1516_s20 }
  0x10   : > { %1554 = vmatpush3.bf16.msra.mxu0 %v1678_v9  ;;  %963 = vmatprep.subr.bf16.mxu1 %v1863_v1  ;;  %v1696_v23 = vld [vmem:[%s1965_s30 + $0x4] ss:$16 sps:$4 sm:$0xff]   ;;  %v1700_v25 = vld [vmem:[%s1965_s30 + $0xc] ss:$16 sps:$4 sm:$0xff]   ;;  %v1694_v28 = vld [vmem:[%s1965_s30] ss:$16 sps:$4 sm:$0xff]  }
  0x11   : > { %1555 = vmatprep.subr.bf16.mxu0 %v1679_v10  ;;  %828 = vmatprep.mubr.bf16.mxu0 %v1696_v23  ;;  %v1701_v30 = vld [vmem:[%s1965_s30 + $0x24] ss:$16 sps:$4 sm:$0xff]   ;;  %v1698_v31 = vld [vmem:[%s1965_s30 + $0x8] ss:$16 sps:$4 sm:$0xff]   ;;  %v1704_v32 = vld [vmem:[%s1965_s30 + $0x2c] ss:$16 sps:$4 sm:$0xff]  }
  0x12   : > { %1465 = vmatprep.mubr.msk.bf16.mxu1 %vm743_vm0, %v1700_v25  ;;  %v1703_v33 = vld [vmem:[%s1965_s30 + $0x20] ss:$16 sps:$4 sm:$0xff]   ;;  %v1707_v34 = vld [vmem:[%s1965_s30 + $0x44] ss:$16 sps:$4 sm:$0xff]   ;;  %v1706_v35 = vld [vmem:[%s1965_s30 + $0x28] ss:$16 sps:$4 sm:$0xff]  }
  0x13   : > { %964 = vmatpush1.bf16.msra.mxu1 %v1680_v11  ;;  %v1710_v36 = vld [vmem:[%s1965_s30 + $0x4c] ss:$16 sps:$4 sm:$0xff]   ;;  %v1709_v37 = vld [vmem:[%s1965_s30 + $0x40] ss:$16 sps:$4 sm:$0xff]   ;;  %v1713_v38 = vld [vmem:[%s1965_s30 + $0x64] ss:$16 sps:$4 sm:$0xff]  }
  0x14   : > { %1556 = vmatpush3.bf16.msra.mxu0 %v1681_v12  ;;  %965 = vmatprep.subr.bf16.mxu1 %v1863_v1  ;;  %v1712_v39 = vld [vmem:[%s1965_s30 + $0x48] ss:$16 sps:$4 sm:$0xff]   ;;  %v1716_v40 = vld [vmem:[%s1965_s30 + $0x6c] ss:$16 sps:$4 sm:$0xff]   ;;  %v1715_v41 = vld [vmem:[%s1965_s30 + $0x60] ss:$16 sps:$4 sm:$0xff]  }
  0x15   : > { %1557 = vmatprep.subr.bf16.mxu0 %v1682_v13  ;;  %v1719_v42 = vld [vmem:[%s1965_s30 + $0x84] ss:$16 sps:$4 sm:$0xff]   ;;  %v1718_v43 = vld [vmem:[%s1965_s30 + $0x68] ss:$16 sps:$4 sm:$0xff]   ;;  %v1722_v44 = vld [vmem:[%s1965_s30 + $0x8c] ss:$16 sps:$4 sm:$0xff]  }
  0x16   : > { %v1721_v45 = vld [vmem:[%s1965_s30 + $0x80] ss:$16 sps:$4 sm:$0xff]   ;;  %v1725_v46 = vld [vmem:[%s1965_s30 + $0xa4] ss:$16 sps:$4 sm:$0xff]   ;;  %v1724_v47 = vld [vmem:[%s1965_s30 + $0x88] ss:$16 sps:$4 sm:$0xff]  }
  0x17   : > { %966 = vmatpush1.bf16.msra.mxu1 %v1683_v14  ;;  %v1728_v48 = vld [vmem:[%s1965_s30 + $0xac] ss:$16 sps:$4 sm:$0xff]   ;;  %v1727_v49 = vld [vmem:[%s1965_s30 + $0xa0] ss:$16 sps:$4 sm:$0xff]   ;;  %v1731_v50 = vld [vmem:[%s1965_s30 + $0xc4] ss:$16 sps:$4 sm:$0xff]  }
  0x18   : > { %1558 = vmatpush3.bf16.msra.mxu0 %v1684_v15  ;;  %967 = vmatprep.subr.bf16.mxu1 %v1863_v1  ;;  %v1730_v51 = vld [vmem:[%s1965_s30 + $0xa8] ss:$16 sps:$4 sm:$0xff]   ;;  %v1734_v52 = vld [vmem:[%s1965_s30 + $0xcc] ss:$16 sps:$4 sm:$0xff]   ;;  %v1733_v53 = vld [vmem:[%s1965_s30 + $0xc0] ss:$16 sps:$4 sm:$0xff]  }
  0x19   : > { %1559 = vmatprep.subr.bf16.mxu0 %v1685_v16  ;;  %v1737_v54 = vld [vmem:[%s1965_s30 + $0xe4] ss:$16 sps:$4 sm:$0xff]   ;;  %v1736_v55 = vld [vmem:[%s1965_s30 + $0xc8] ss:$16 sps:$4 sm:$0xff]   ;;  %v1740_v56 = vld [vmem:[%s1965_s30 + $0xec] ss:$16 sps:$4 sm:$0xff]  }
  0x1a   : > { %v1739_v57 = vld [vmem:[%s1965_s30 + $0xe0] ss:$16 sps:$4 sm:$0xff]   ;;  %v1743_v58 = vld [vmem:[%s1965_s30 + $0x104] ss:$16 sps:$4 sm:$0xff]   ;;  %v1742_v59 = vld [vmem:[%s1965_s30 + $0xe8] ss:$16 sps:$4 sm:$0xff]  }
  0x1b   : > { %968 = vmatpush1.bf16.msra.mxu1 %v1686_v17  ;;  %v1746_v60 = vld [vmem:[%s1965_s30 + $0x10c] ss:$16 sps:$4 sm:$0xff]   ;;  %v1745_v61 = vld [vmem:[%s1965_s30 + $0x100] ss:$16 sps:$4 sm:$0xff]   ;;  %v1749_v62 = vld [vmem:[%s1965_s30 + $0x124] ss:$16 sps:$4 sm:$0xff]  }
  0x1c   : > { %1560 = vmatpush3.bf16.msra.mxu0 %v1687_v18  ;;  %969 = vmatprep.subr.bf16.mxu1 %v1863_v1  ;;  %v1748_v63 = vld [vmem:[%s1965_s30 + $0x108] ss:$16 sps:$4 sm:$0xff]   ;;  %v1752_v0 = vld [vmem:[%s1965_s30 + $0x12c] ss:$16 sps:$4 sm:$0xff]   ;;  %v1755_v2 = vld [vmem:[%s1965_s30 + $0x144] ss:$16 sps:$4 sm:$0xff]  }
  0x1d   : > { %1561 = vmatprep.subr.bf16.mxu0 %v1688_v19  ;;  %v1754_v3 = vld [vmem:[%s1965_s30 + $0x128] ss:$16 sps:$4 sm:$0xff]   ;;  %v1758_v4 = vld [vmem:[%s1965_s30 + $0x14c] ss:$16 sps:$4 sm:$0xff]   ;;  %v1757_v5 = vld [vmem:[%s1965_s30 + $0x140] ss:$16 sps:$4 sm:$0xff]  }
  0x1e   : > { %v1761_v6 = vld [vmem:[%s1965_s30 + $0x164] ss:$16 sps:$4 sm:$0xff]   ;;  %v1760_v7 = vld [vmem:[%s1965_s30 + $0x148] ss:$16 sps:$4 sm:$0xff]   ;;  %v1764_v8 = vld [vmem:[%s1965_s30 + $0x16c] ss:$16 sps:$4 sm:$0xff]  }
  0x1f   : > { %970 = vmatpush1.bf16.msra.mxu1 %v1689_v20  ;;  %v1763_v9 = vld [vmem:[%s1965_s30 + $0x160] ss:$16 sps:$4 sm:$0xff]   ;;  %v1767_v10 = vld [vmem:[%s1965_s30 + $0x184] ss:$16 sps:$4 sm:$0xff]   ;;  %v1766_v11 = vld [vmem:[%s1965_s30 + $0x168] ss:$16 sps:$4 sm:$0xff]  }
  0x20   : > { %1562 = vmatpush3.bf16.msra.mxu0 %v1690_v21  ;;  %971 = vmatprep.subr.bf16.mxu1 %v1863_v1  ;;  %v1770_v12 = vld [vmem:[%s1965_s30 + $0x18c] ss:$16 sps:$4 sm:$0xff]   ;;  %v1769_v13 = vld [vmem:[%s1965_s30 + $0x180] ss:$16 sps:$4 sm:$0xff]   ;;  %v1773_v14 = vld [vmem:[%s1965_s30 + $0x1a4] ss:$16 sps:$4 sm:$0xff]  }
  0x21   : > { %1563 = vmatprep.subr.bf16.mxu0 %v1691_v22  ;;  %v1772_v15 = vld [vmem:[%s1965_s30 + $0x188] ss:$16 sps:$4 sm:$0xff]   ;;  %v1776_v16 = vld [vmem:[%s1965_s30 + $0x1ac] ss:$16 sps:$4 sm:$0xff]   ;;  %v1775_v17 = vld [vmem:[%s1965_s30 + $0x1a0] ss:$16 sps:$4 sm:$0xff]  }
  0x22   : > { %v1779_v18 = vld [vmem:[%s1965_s30 + $0x1c4] ss:$16 sps:$4 sm:$0xff]   ;;  %v1778_v19 = vld [vmem:[%s1965_s30 + $0x1a8] ss:$16 sps:$4 sm:$0xff]   ;;  %v1782_v20 = vld [vmem:[%s1965_s30 + $0x1cc] ss:$16 sps:$4 sm:$0xff]  }
  0x23   : > { %972 = vmatpush1.bf16.msra.mxu1 %v1692_v24  ;;  %v1781_v21 = vld [vmem:[%s1965_s30 + $0x1c0] ss:$16 sps:$4 sm:$0xff]   ;;  %v1785_v22 = vld [vmem:[%s1965_s30 + $0x1e4] ss:$16 sps:$4 sm:$0xff]   ;;  %v1784_v23 = vld [vmem:[%s1965_s30 + $0x1c8] ss:$16 sps:$4 sm:$0xff]  }
  0x24   : > { %1564 = vmatpush3.bf16.msra.mxu0 %v1693_v26  ;;  %973 = vmatprep.subr.bf16.mxu1 %v1863_v1  ;;  %v1751_v1 = vld [vmem:[%s1965_s30 + $0x120] ss:$16 sps:$4 sm:$0xff]   ;;  %v1788_v24 = vld [vmem:[%s1965_s30 + $0x1ec] ss:$16 sps:$4 sm:$0xff]   ;;  %v1790_v26 = vld [vmem:[%s1965_s30 + $0x1e8] ss:$16 sps:$4 sm:$0xff]  }
  0x25   : > { %v1787_v25 = vld [vmem:[%s1965_s30 + $0x1e0] ss:$16 sps:$4 sm:$0xff]  }
  0x27   : > { %829 = vmatmul.mubr.bf16.vlgmr.msra.gmra.mrb[0].mxu0 %v1694_v28  ;;  %974 = vmatpush1.bf16.msra.mxu1 %v794_v29  ;;  %v2071_v29 = vld [vmem:[%s2180_s2] ss:$0 sm:$0xff] }
  0x28   : > { %836 = vmatprep.mubr.bf16.mxu0 %v1701_v30 }
  0x2a   : > { %990 = vmatmul.mubr.bf16.vlgmr.msra.gmra.mrb[0].mxu1 %v1698_v31 }
  0x2b   : > { %1466 = vmatprep.mubr.msk.bf16.mxu1 %vm743_vm0, %v1704_v32 }
  0x2f   : > { %837 = vmatmul.mubr.bf16.gmra.mrb[4].mxu0 %v1703_v33 }
  0x30   : > { %844 = vmatprep.mubr.bf16.mxu0 %v1707_v34 }
  0x32   : > { %998 = vmatmul.mubr.bf16.gmra.mrb[4].mxu1 %v1706_v35 }
  0x33   : > { %1467 = vmatprep.mubr.msk.bf16.mxu1 %vm743_vm0, %v1710_v36 }
  0x37   : > { %845 = vmatmul.mubr.bf16.gmra.mrb[8].mxu0 %v1709_v37 }
  0x38   : > { %852 = vmatprep.mubr.bf16.mxu0 %v1713_v38 }
  0x3a   : > { %1006 = vmatmul.mubr.bf16.gmra.mrb[8].mxu1 %v1712_v39 }
  0x3b   : > { %1468 = vmatprep.mubr.msk.bf16.mxu1 %vm743_vm0, %v1716_v40 }
  0x3f   : > { %853 = vmatmul.mubr.bf16.gmra.mrb[12].mxu0 %v1715_v41 }
  0x40   : > { %860 = vmatprep.mubr.bf16.mxu0 %v1719_v42 }
  0x42   : > { %1014 = vmatmul.mubr.bf16.gmra.mrb[12].mxu1 %v1718_v43 }
  0x43   : > { %1469 = vmatprep.mubr.msk.bf16.mxu1 %vm743_vm0, %v1722_v44 }
  0x47   : > { %861 = vmatmul.mubr.bf16.gmra.mrb[16].mxu0 %v1721_v45 }
  0x48   : > { %868 = vmatprep.mubr.bf16.mxu0 %v1725_v46 }
  0x4a   : > { %1022 = vmatmul.mubr.bf16.gmra.mrb[16].mxu1 %v1724_v47 }
  0x4b   : > { %1470 = vmatprep.mubr.msk.bf16.mxu1 %vm743_vm0, %v1728_v48 }
  0x4f   : > { %869 = vmatmul.mubr.bf16.gmra.mrb[20].mxu0 %v1727_v49 }
  0x50   : > { %876 = vmatprep.mubr.bf16.mxu0 %v1731_v50 }
  0x52   : > { %1030 = vmatmul.mubr.bf16.gmra.mrb[20].mxu1 %v1730_v51 }
  0x53   : > { %1471 = vmatprep.mubr.msk.bf16.mxu1 %vm743_vm0, %v1734_v52 }
  0x57   : > { %877 = vmatmul.mubr.bf16.gmra.mrb[24].mxu0 %v1733_v53 }
  0x58   : > { %884 = vmatprep.mubr.bf16.mxu0 %v1737_v54 }
  0x5a   : > { %1038 = vmatmul.mubr.bf16.gmra.mrb[24].mxu1 %v1736_v55 }
  0x5b   : > { %1472 = vmatprep.mubr.msk.bf16.mxu1 %vm743_vm0, %v1740_v56 }
  0x5f   : > { %885 = vmatmul.mubr.bf16.gmra.mrb[28].mxu0 %v1739_v57 }
  0x60   : > { %892 = vmatprep.mubr.bf16.mxu0 %v1743_v58 }
  0x62   : > { %1046 = vmatmul.mubr.bf16.gmra.mrb[28].mxu1 %v1742_v59 }
  0x63   : > { %1473 = vmatprep.mubr.msk.bf16.mxu1 %vm743_vm0, %v1746_v60 }
  0x67   : > { %893 = vmatmul.mubr.bf16.gmra.mrb[32].mxu0 %v1745_v61 }
  0x68   : > { %900 = vmatprep.mubr.bf16.mxu0 %v1749_v62 }
  0x6a   : > { %1054 = vmatmul.mubr.bf16.gmra.mrb[32].mxu1 %v1748_v63 }
  0x6b   : > { %1474 = vmatprep.mubr.msk.bf16.mxu1 %vm743_vm0, %v1752_v0 }
  0x6f   : > { %901 = vmatmul.mubr.bf16.gmra.mrb[36].mxu0 %v1751_v1 }
  0x70   : > { %908 = vmatprep.mubr.bf16.mxu0 %v1755_v2 }
  0x72   : > { %1062 = vmatmul.mubr.bf16.gmra.mrb[36].mxu1 %v1754_v3 }
  0x73   : > { %1475 = vmatprep.mubr.msk.bf16.mxu1 %vm743_vm0, %v1758_v4 }
  0x77   : > { %909 = vmatmul.mubr.bf16.gmra.mrb[40].mxu0 %v1757_v5 }
  0x78   : > { %916 = vmatprep.mubr.bf16.mxu0 %v1761_v6 }
  0x7a   : > { %1070 = vmatmul.mubr.bf16.gmra.mrb[40].mxu1 %v1760_v7 }
  0x7b   : > { %1476 = vmatprep.mubr.msk.bf16.mxu1 %vm743_vm0, %v1764_v8 }
  0x7f   : > { %917 = vmatmul.mubr.bf16.gmra.mrb[44].mxu0 %v1763_v9 }
  0x80   : > { %924 = vmatprep.mubr.bf16.mxu0 %v1767_v10 }
  0x82   : > { %1078 = vmatmul.mubr.bf16.gmra.mrb[44].mxu1 %v1766_v11 }
  0x83   : > { %1477 = vmatprep.mubr.msk.bf16.mxu1 %vm743_vm0, %v1770_v12 }
  0x87   : > { %925 = vmatmul.mubr.bf16.gmra.mrb[48].mxu0 %v1769_v13 }
  0x88   : > { %932 = vmatprep.mubr.bf16.mxu0 %v1773_v14 }
  0x8a   : > { %1086 = vmatmul.mubr.bf16.gmra.mrb[48].mxu1 %v1772_v15 }
  0x8b   : > { %1478 = vmatprep.mubr.msk.bf16.mxu1 %vm743_vm0, %v1776_v16 }
  0x8f   : > { %933 = vmatmul.mubr.bf16.gmra.mrb[52].mxu0 %v1775_v17 }
  0x90   : > { %940 = vmatprep.mubr.bf16.mxu0 %v1779_v18 }
  0x92   : > { %1094 = vmatmul.mubr.bf16.gmra.mrb[52].mxu1 %v1778_v19 }
  0x93   : > { %1479 = vmatprep.mubr.msk.bf16.mxu1 %vm743_vm0, %v1782_v20 }
  0x97   : > { %941 = vmatmul.mubr.bf16.gmra.mrb[56].mxu0 %v1781_v21 }
  0x98   : > { %948 = vmatprep.mubr.bf16.mxu0 %v1785_v22 }
  0x9a   : > { %1102 = vmatmul.mubr.bf16.gmra.mrb[56].mxu1 %v1784_v23 }
  0x9b   : > { %1480 = vmatprep.mubr.msk.bf16.mxu1 %vm743_vm0, %v1788_v24 }
  0x9f   : > { %949 = vmatmul.mubr.bf16.gmra.mrb[60].mxu0 %v1787_v25 }
  0xa2   : > { %1110 = vmatmul.mubr.bf16.gmra.mrb[60].mxu1 %v1790_v26 }
  0xfa   : > { %v1565_v27 = vpop.f32.mrb[0].mxu0 }
  0xfb   : > { %v1566_v28 = vpop.f32.mrb[1].mxu0 }
  0xfc   : > { %v1567_v30 = vadd.f32 %v1566_v28, %v1565_v27  ;;  %v1568_v31 = vpop.f32.mrb[2].mxu0 }
  0xfd   : > { %v1569_v32 = vpop.f32.mrb[3].mxu0  ;;  %v991_v33 = vpop.f32.mrb[0].mxu1 }
  0xfe   : > { %v1570_v34 = vadd.f32 %v1569_v32, %v1568_v31  ;;  %v831_v35 = vadd.f32 %v1567_v30, %v2071_v29  ;;  %v993_v36 = vpop.f32.mrb[1].mxu1 }
  0xff   : > { %v994_v37 = vpop.f32.mrb[2].mxu1 }
 0x100   : > { %v992_v38 = vadd.f32 %v991_v33, %v831_v35  ;;  %v834_v39 = vadd.f32 %v1570_v34, %v2071_v29  ;;  %v996_v40 = vpop.f32.mrb[3].mxu1 }
 0x102   : > { %1791 = vtanh.f32 %v992_v38  ;;  %v995_v41 = vadd.f32 %v994_v37, %v834_v39  ;;  %v1571_v42 = vpop.f32.mrb[4].mxu0 }
 0x103   : > { %v1572_v43 = vpop.f32.mrb[5].mxu0 }
 0x104   : > { %1793 = vtanh.f32 %v995_v41  ;;  %v1573_v44 = vadd.f32 %v1572_v43, %v1571_v42  ;;  %v1574_v45 = vpop.f32.mrb[6].mxu0 }
 0x105   : > { %v1575_v46 = vpop.f32.mrb[7].mxu0  ;;  %v999_v47 = vpop.f32.mrb[4].mxu1 }
 0x106   : > { %v1576_v48 = vadd.f32 %v1575_v46, %v1574_v45  ;;  %v839_v49 = vadd.f32 %v1573_v44, %v2071_v29  ;;  %v1001_v50 = vpop.f32.mrb[5].mxu1 }
 0x107   : > { %v1002_v51 = vpop.f32.mrb[6].mxu1 }
 0x108   : > { %v1000_v52 = vadd.f32 %v999_v47, %v839_v49  ;;  %v842_v53 = vadd.f32 %v1576_v48, %v2071_v29  ;;  %v1004_v54 = vpop.f32.mrb[7].mxu1 }
 0x10a   : > { %1795 = vtanh.f32 %v1000_v52  ;;  %v1003_v55 = vadd.f32 %v1002_v51, %v842_v53  ;;  %v1577_v56 = vpop.f32.mrb[8].mxu0 }
 0x10b   : > { %v1578_v57 = vpop.f32.mrb[9].mxu0 }
 0x10c   : > { %v1792_v58 = vpop.eup %1791  ;;  %1797 = vtanh.f32 %v1003_v55  ;;  %v1579_v59 = vadd.f32 %v1578_v57, %v1577_v56  ;;  %v1580_v60 = vpop.f32.mrb[10].mxu0 }
 0x10d   : > { %v1517_v61 = vpack.c.bf16 %v1792_v58, %v1792_v58  ;;  %v1581_v62 = vpop.f32.mrb[11].mxu0  ;;  %v1007_v63 = vpop.f32.mrb[8].mxu1 }
 0x10e   : > { %v1794_v0 = vpop.eup %1793  ;;  %v1582_v1 = vadd.f32 %v1581_v62, %v1580_v60  ;;  %v847_v2 = vadd.f32 %v1579_v59, %v2071_v29  ;;  %v1009_v3 = vpop.f32.mrb[9].mxu1 }
 0x10f   : > { %1279 = vst.msk [vmem:[%s2081_s23] sm:$0xf] %vm1278_vm2, %v1517_v61  ;;  %v1518_v4 = vpack.c.bf16 %v1794_v0, %v1794_v0  ;;  %v1010_v5 = vpop.f32.mrb[10].mxu1 }
 0x110   : > { %v1008_v6 = vadd.f32 %v1007_v63, %v847_v2  ;;  %v850_v7 = vadd.f32 %v1582_v1, %v2071_v29  ;;  %v1012_v8 = vpop.f32.mrb[11].mxu1 }
 0x111   : > { %1280 = vst.msk [vmem:[%s2081_s23 + $0x4] sm:$0xf] %vm1278_vm2, %v1518_v4 }
 0x112   : > { %1799 = vtanh.f32 %v1008_v6  ;;  %v1011_v9 = vadd.f32 %v1010_v5, %v850_v7  ;;  %v1583_v10 = vpop.f32.mrb[12].mxu0 }
 0x113   : > { %v1584_v11 = vpop.f32.mrb[13].mxu0 }
 0x114   : > { %v1796_v12 = vpop.eup %1795  ;;  %1801 = vtanh.f32 %v1011_v9  ;;  %v1585_v13 = vadd.f32 %v1584_v11, %v1583_v10  ;;  %v1586_v14 = vpop.f32.mrb[14].mxu0 }
 0x115   : > { %v1519_v15 = vpack.c.bf16 %v1796_v12, %v1796_v12  ;;  %v1587_v16 = vpop.f32.mrb[15].mxu0  ;;  %v1015_v17 = vpop.f32.mrb[12].mxu1 }
 0x116   : > { %v1798_v18 = vpop.eup %1797  ;;  %v1588_v19 = vadd.f32 %v1587_v16, %v1586_v14  ;;  %v855_v20 = vadd.f32 %v1585_v13, %v2071_v29  ;;  %v1017_v21 = vpop.f32.mrb[13].mxu1 }
 0x117   : > { %1281 = vst.msk [vmem:[%s2081_s23 + $0x8] sm:$0xf] %vm1278_vm2, %v1519_v15  ;;  %v1520_v22 = vpack.c.bf16 %v1798_v18, %v1798_v18  ;;  %v1018_v23 = vpop.f32.mrb[14].mxu1 }
 0x118   : > { %v1016_v24 = vadd.f32 %v1015_v17, %v855_v20  ;;  %v858_v25 = vadd.f32 %v1588_v19, %v2071_v29  ;;  %v1020_v26 = vpop.f32.mrb[15].mxu1 }
 0x119   : > { %1282 = vst.msk [vmem:[%s2081_s23 + $0xc] sm:$0xf] %vm1278_vm2, %v1520_v22 }
 0x11a   : > { %1803 = vtanh.f32 %v1016_v24  ;;  %v1019_v27 = vadd.f32 %v1018_v23, %v858_v25  ;;  %v1589_v28 = vpop.f32.mrb[16].mxu0 }
 0x11b   : > { %v1590_v30 = vpop.f32.mrb[17].mxu0 }
 0x11c   : > { %v1800_v31 = vpop.eup %1799  ;;  %1805 = vtanh.f32 %v1019_v27  ;;  %v1591_v32 = vadd.f32 %v1590_v30, %v1589_v28  ;;  %v1592_v33 = vpop.f32.mrb[18].mxu0 }
 0x11d   : > { %v1521_v34 = vpack.c.bf16 %v1800_v31, %v1800_v31  ;;  %v1593_v35 = vpop.f32.mrb[19].mxu0  ;;  %v1023_v36 = vpop.f32.mrb[16].mxu1 }
 0x11e   : > { %v1802_v37 = vpop.eup %1801  ;;  %v1594_v38 = vadd.f32 %v1593_v35, %v1592_v33  ;;  %v863_v39 = vadd.f32 %v1591_v32, %v2071_v29  ;;  %v1025_v40 = vpop.f32.mrb[17].mxu1 }
 0x11f   : > { %1283 = vst.msk [vmem:[%s2081_s23 + $0x10] sm:$0xf] %vm1278_vm2, %v1521_v34  ;;  %v1522_v41 = vpack.c.bf16 %v1802_v37, %v1802_v37  ;;  %v1026_v42 = vpop.f32.mrb[18].mxu1 }
 0x120   : > { %v1024_v43 = vadd.f32 %v1023_v36, %v863_v39  ;;  %v866_v44 = vadd.f32 %v1594_v38, %v2071_v29  ;;  %v1028_v45 = vpop.f32.mrb[19].mxu1 }
 0x121   : > { %1284 = vst.msk [vmem:[%s2081_s23 + $0x14] sm:$0xf] %vm1278_vm2, %v1522_v41 }
 0x122   : > { %1807 = vtanh.f32 %v1024_v43  ;;  %v1027_v46 = vadd.f32 %v1026_v42, %v866_v44  ;;  %v1595_v47 = vpop.f32.mrb[20].mxu0 }
 0x123   : > { %v1596_v48 = vpop.f32.mrb[21].mxu0 }
 0x124   : > { %v1804_v49 = vpop.eup %1803  ;;  %1809 = vtanh.f32 %v1027_v46  ;;  %v1597_v50 = vadd.f32 %v1596_v48, %v1595_v47  ;;  %v1598_v51 = vpop.f32.mrb[22].mxu0 }
 0x125   : > { %v1523_v52 = vpack.c.bf16 %v1804_v49, %v1804_v49  ;;  %v1599_v53 = vpop.f32.mrb[23].mxu0  ;;  %v1031_v54 = vpop.f32.mrb[20].mxu1 }
 0x126   : > { %v1806_v55 = vpop.eup %1805  ;;  %v1600_v56 = vadd.f32 %v1599_v53, %v1598_v51  ;;  %v871_v57 = vadd.f32 %v1597_v50, %v2071_v29  ;;  %v1033_v58 = vpop.f32.mrb[21].mxu1 }
 0x127   : > { %1285 = vst.msk [vmem:[%s2081_s23 + $0x18] sm:$0xf] %vm1278_vm2, %v1523_v52  ;;  %v1524_v59 = vpack.c.bf16 %v1806_v55, %v1806_v55  ;;  %v1034_v60 = vpop.f32.mrb[22].mxu1 }
 0x128   : > { %v1032_v61 = vadd.f32 %v1031_v54, %v871_v57  ;;  %v874_v62 = vadd.f32 %v1600_v56, %v2071_v29  ;;  %v1036_v63 = vpop.f32.mrb[23].mxu1 }
 0x129   : > { %1286 = vst.msk [vmem:[%s2081_s23 + $0x1c] sm:$0xf] %vm1278_vm2, %v1524_v59 }
 0x12a   : > { %1811 = vtanh.f32 %v1032_v61  ;;  %v1035_v0 = vadd.f32 %v1034_v60, %v874_v62  ;;  %v1601_v1 = vpop.f32.mrb[24].mxu0 }
 0x12b   : > { %v1602_v2 = vpop.f32.mrb[25].mxu0 }
 0x12c   : > { %v1808_v3 = vpop.eup %1807  ;;  %1813 = vtanh.f32 %v1035_v0  ;;  %v1603_v4 = vadd.f32 %v1602_v2, %v1601_v1  ;;  %v1604_v5 = vpop.f32.mrb[26].mxu0 }
 0x12d   : > { %v1525_v6 = vpack.c.bf16 %v1808_v3, %v1808_v3  ;;  %v1605_v7 = vpop.f32.mrb[27].mxu0  ;;  %v1039_v8 = vpop.f32.mrb[24].mxu1 }
 0x12e   : > { %v1810_v9 = vpop.eup %1809  ;;  %v1606_v10 = vadd.f32 %v1605_v7, %v1604_v5  ;;  %v879_v11 = vadd.f32 %v1603_v4, %v2071_v29  ;;  %v1041_v12 = vpop.f32.mrb[25].mxu1 }
 0x12f   : > { %1287 = vst.msk [vmem:[%s2081_s23 + $0x20] sm:$0xf] %vm1278_vm2, %v1525_v6  ;;  %v1526_v13 = vpack.c.bf16 %v1810_v9, %v1810_v9  ;;  %v1042_v14 = vpop.f32.mrb[26].mxu1 }
 0x130   : > { %v1040_v15 = vadd.f32 %v1039_v8, %v879_v11  ;;  %v882_v16 = vadd.f32 %v1606_v10, %v2071_v29  ;;  %v1044_v17 = vpop.f32.mrb[27].mxu1 }
 0x131   : > { %1288 = vst.msk [vmem:[%s2081_s23 + $0x24] sm:$0xf] %vm1278_vm2, %v1526_v13 }
 0x132   : > { %1815 = vtanh.f32 %v1040_v15  ;;  %v1043_v18 = vadd.f32 %v1042_v14, %v882_v16  ;;  %v1607_v19 = vpop.f32.mrb[28].mxu0 }
 0x133   : > { %v1608_v20 = vpop.f32.mrb[29].mxu0 }
 0x134   : > { %v1812_v21 = vpop.eup %1811  ;;  %1817 = vtanh.f32 %v1043_v18  ;;  %v1609_v22 = vadd.f32 %v1608_v20, %v1607_v19  ;;  %v1610_v23 = vpop.f32.mrb[30].mxu0 }
 0x135   : > { %v1527_v24 = vpack.c.bf16 %v1812_v21, %v1812_v21  ;;  %v1611_v25 = vpop.f32.mrb[31].mxu0  ;;  %v1047_v26 = vpop.f32.mrb[28].mxu1 }
 0x136   : > { %v1814_v27 = vpop.eup %1813  ;;  %v1612_v28 = vadd.f32 %v1611_v25, %v1610_v23  ;;  %v887_v30 = vadd.f32 %v1609_v22, %v2071_v29  ;;  %v1049_v31 = vpop.f32.mrb[29].mxu1 }
 0x137   : > { %1289 = vst.msk [vmem:[%s2081_s23 + $0x28] sm:$0xf] %vm1278_vm2, %v1527_v24  ;;  %v1528_v32 = vpack.c.bf16 %v1814_v27, %v1814_v27  ;;  %v1050_v33 = vpop.f32.mrb[30].mxu1 }
 0x138   : > { %v1048_v34 = vadd.f32 %v1047_v26, %v887_v30  ;;  %v890_v35 = vadd.f32 %v1612_v28, %v2071_v29  ;;  %v1052_v36 = vpop.f32.mrb[31].mxu1 }
 0x139   : > { %1290 = vst.msk [vmem:[%s2081_s23 + $0x2c] sm:$0xf] %vm1278_vm2, %v1528_v32 }
 0x13a   : > { %1819 = vtanh.f32 %v1048_v34  ;;  %v1051_v37 = vadd.f32 %v1050_v33, %v890_v35  ;;  %v1613_v38 = vpop.f32.mrb[32].mxu0 }
 0x13b   : > { %v1614_v39 = vpop.f32.mrb[33].mxu0 }
 0x13c   : > { %v1816_v40 = vpop.eup %1815  ;;  %1821 = vtanh.f32 %v1051_v37  ;;  %v1615_v41 = vadd.f32 %v1614_v39, %v1613_v38  ;;  %v1616_v42 = vpop.f32.mrb[34].mxu0 }
 0x13d   : > { %v1529_v43 = vpack.c.bf16 %v1816_v40, %v1816_v40  ;;  %v1617_v44 = vpop.f32.mrb[35].mxu0  ;;  %v1055_v45 = vpop.f32.mrb[32].mxu1 }
 0x13e   : > { %v1818_v46 = vpop.eup %1817  ;;  %v1618_v47 = vadd.f32 %v1617_v44, %v1616_v42  ;;  %v895_v48 = vadd.f32 %v1615_v41, %v2071_v29  ;;  %v1057_v49 = vpop.f32.mrb[33].mxu1 }
 0x13f   : > { %1291 = vst.msk [vmem:[%s2081_s23 + $0x30] sm:$0xf] %vm1278_vm2, %v1529_v43  ;;  %v1530_v50 = vpack.c.bf16 %v1818_v46, %v1818_v46  ;;  %v1058_v51 = vpop.f32.mrb[34].mxu1 }
 0x140   : > { %v1056_v52 = vadd.f32 %v1055_v45, %v895_v48  ;;  %v898_v53 = vadd.f32 %v1618_v47, %v2071_v29  ;;  %v1060_v54 = vpop.f32.mrb[35].mxu1 }
 0x141   : > { %1292 = vst.msk [vmem:[%s2081_s23 + $0x34] sm:$0xf] %vm1278_vm2, %v1530_v50 }
 0x142   : > { %1823 = vtanh.f32 %v1056_v52  ;;  %v1059_v55 = vadd.f32 %v1058_v51, %v898_v53  ;;  %v1619_v56 = vpop.f32.mrb[36].mxu0 }
 0x143   : > { %v1620_v57 = vpop.f32.mrb[37].mxu0 }
 0x144   : > { %v1820_v58 = vpop.eup %1819  ;;  %1825 = vtanh.f32 %v1059_v55  ;;  %v1621_v59 = vadd.f32 %v1620_v57, %v1619_v56  ;;  %v1622_v60 = vpop.f32.mrb[38].mxu0 }
 0x145   : > { %v1531_v61 = vpack.c.bf16 %v1820_v58, %v1820_v58  ;;  %v1623_v62 = vpop.f32.mrb[39].mxu0  ;;  %v1063_v63 = vpop.f32.mrb[36].mxu1 }
 0x146   : > { %v1822_v0 = vpop.eup %1821  ;;  %v1624_v1 = vadd.f32 %v1623_v62, %v1622_v60  ;;  %v903_v2 = vadd.f32 %v1621_v59, %v2071_v29  ;;  %v1065_v3 = vpop.f32.mrb[37].mxu1 }
 0x147   : > { %1293 = vst.msk [vmem:[%s2081_s23 + $0x38] sm:$0xf] %vm1278_vm2, %v1531_v61  ;;  %v1532_v4 = vpack.c.bf16 %v1822_v0, %v1822_v0  ;;  %v1066_v5 = vpop.f32.mrb[38].mxu1 }
 0x148   : > { %v1064_v6 = vadd.f32 %v1063_v63, %v903_v2  ;;  %v906_v7 = vadd.f32 %v1624_v1, %v2071_v29  ;;  %v1068_v8 = vpop.f32.mrb[39].mxu1 }
 0x149   : > { %1294 = vst.msk [vmem:[%s2081_s23 + $0x3c] sm:$0xf] %vm1278_vm2, %v1532_v4 }
 0x14a   : > { %1827 = vtanh.f32 %v1064_v6  ;;  %v1067_v9 = vadd.f32 %v1066_v5, %v906_v7  ;;  %v1625_v10 = vpop.f32.mrb[40].mxu0 }
 0x14b   : > { %v1626_v11 = vpop.f32.mrb[41].mxu0 }
 0x14c   : > { %v1824_v12 = vpop.eup %1823  ;;  %1829 = vtanh.f32 %v1067_v9  ;;  %v1627_v13 = vadd.f32 %v1626_v11, %v1625_v10  ;;  %v1628_v14 = vpop.f32.mrb[42].mxu0 }
 0x14d   : > { %v1533_v15 = vpack.c.bf16 %v1824_v12, %v1824_v12  ;;  %v1629_v16 = vpop.f32.mrb[43].mxu0  ;;  %v1071_v17 = vpop.f32.mrb[40].mxu1 }
 0x14e   : > { %v1826_v18 = vpop.eup %1825  ;;  %v1630_v19 = vadd.f32 %v1629_v16, %v1628_v14  ;;  %v911_v20 = vadd.f32 %v1627_v13, %v2071_v29  ;;  %v1073_v21 = vpop.f32.mrb[41].mxu1 }
 0x14f   : > { %1295 = vst.msk [vmem:[%s2081_s23 + $0x40] sm:$0xf] %vm1278_vm2, %v1533_v15  ;;  %v1534_v22 = vpack.c.bf16 %v1826_v18, %v1826_v18  ;;  %v1074_v23 = vpop.f32.mrb[42].mxu1 }
 0x150   : > { %v1072_v24 = vadd.f32 %v1071_v17, %v911_v20  ;;  %v914_v25 = vadd.f32 %v1630_v19, %v2071_v29  ;;  %v1076_v26 = vpop.f32.mrb[43].mxu1 }
 0x151   : > { %1296 = vst.msk [vmem:[%s2081_s23 + $0x44] sm:$0xf] %vm1278_vm2, %v1534_v22 }
 0x152   : > { %1831 = vtanh.f32 %v1072_v24  ;;  %v1075_v27 = vadd.f32 %v1074_v23, %v914_v25  ;;  %v1631_v28 = vpop.f32.mrb[44].mxu0 }
 0x153   : > { %v1632_v30 = vpop.f32.mrb[45].mxu0 }
 0x154   : > { %v1828_v31 = vpop.eup %1827  ;;  %1833 = vtanh.f32 %v1075_v27  ;;  %v1633_v32 = vadd.f32 %v1632_v30, %v1631_v28  ;;  %v1634_v33 = vpop.f32.mrb[46].mxu0 }
 0x155   : > { %v1535_v34 = vpack.c.bf16 %v1828_v31, %v1828_v31  ;;  %v1635_v35 = vpop.f32.mrb[47].mxu0  ;;  %v1079_v36 = vpop.f32.mrb[44].mxu1 }
 0x156   : > { %v1830_v37 = vpop.eup %1829  ;;  %v1636_v38 = vadd.f32 %v1635_v35, %v1634_v33  ;;  %v919_v39 = vadd.f32 %v1633_v32, %v2071_v29  ;;  %v1081_v40 = vpop.f32.mrb[45].mxu1 }
 0x157   : > { %1297 = vst.msk [vmem:[%s2081_s23 + $0x48] sm:$0xf] %vm1278_vm2, %v1535_v34  ;;  %v1536_v41 = vpack.c.bf16 %v1830_v37, %v1830_v37  ;;  %v1082_v42 = vpop.f32.mrb[46].mxu1 }
 0x158   : > { %v1080_v43 = vadd.f32 %v1079_v36, %v919_v39  ;;  %v922_v44 = vadd.f32 %v1636_v38, %v2071_v29  ;;  %v1084_v45 = vpop.f32.mrb[47].mxu1 }
 0x159   : > { %1298 = vst.msk [vmem:[%s2081_s23 + $0x4c] sm:$0xf] %vm1278_vm2, %v1536_v41 }
 0x15a   : > { %1835 = vtanh.f32 %v1080_v43  ;;  %v1083_v46 = vadd.f32 %v1082_v42, %v922_v44  ;;  %v1637_v47 = vpop.f32.mrb[48].mxu0 }
 0x15b   : > { %v1638_v48 = vpop.f32.mrb[49].mxu0 }
 0x15c   : > { %v1832_v49 = vpop.eup %1831  ;;  %1837 = vtanh.f32 %v1083_v46  ;;  %v1639_v50 = vadd.f32 %v1638_v48, %v1637_v47  ;;  %v1640_v51 = vpop.f32.mrb[50].mxu0 }
 0x15d   : > { %v1537_v52 = vpack.c.bf16 %v1832_v49, %v1832_v49  ;;  %v1641_v53 = vpop.f32.mrb[51].mxu0  ;;  %v1087_v54 = vpop.f32.mrb[48].mxu1 }
 0x15e   : > { %v1834_v55 = vpop.eup %1833  ;;  %v1642_v56 = vadd.f32 %v1641_v53, %v1640_v51  ;;  %v927_v57 = vadd.f32 %v1639_v50, %v2071_v29  ;;  %v1089_v58 = vpop.f32.mrb[49].mxu1 }
 0x15f   : > { %1299 = vst.msk [vmem:[%s2081_s23 + $0x50] sm:$0xf] %vm1278_vm2, %v1537_v52  ;;  %v1538_v59 = vpack.c.bf16 %v1834_v55, %v1834_v55  ;;  %v1090_v60 = vpop.f32.mrb[50].mxu1 }
 0x160   : > { %v1088_v61 = vadd.f32 %v1087_v54, %v927_v57  ;;  %v930_v62 = vadd.f32 %v1642_v56, %v2071_v29  ;;  %v1092_v63 = vpop.f32.mrb[51].mxu1 }
 0x161   : > { %1300 = vst.msk [vmem:[%s2081_s23 + $0x54] sm:$0xf] %vm1278_vm2, %v1538_v59 }
 0x162   : > { %1839 = vtanh.f32 %v1088_v61  ;;  %v1091_v0 = vadd.f32 %v1090_v60, %v930_v62  ;;  %v1643_v1 = vpop.f32.mrb[52].mxu0 }
 0x163   : > { %v1644_v2 = vpop.f32.mrb[53].mxu0 }
 0x164   : > { %v1836_v3 = vpop.eup %1835  ;;  %1841 = vtanh.f32 %v1091_v0  ;;  %v1645_v4 = vadd.f32 %v1644_v2, %v1643_v1  ;;  %v1646_v5 = vpop.f32.mrb[54].mxu0 }
 0x165   : > { %v1539_v6 = vpack.c.bf16 %v1836_v3, %v1836_v3  ;;  %v1647_v7 = vpop.f32.mrb[55].mxu0  ;;  %v1095_v8 = vpop.f32.mrb[52].mxu1 }
 0x166   : > { %v1838_v9 = vpop.eup %1837  ;;  %v1648_v10 = vadd.f32 %v1647_v7, %v1646_v5  ;;  %v935_v11 = vadd.f32 %v1645_v4, %v2071_v29  ;;  %v1097_v12 = vpop.f32.mrb[53].mxu1 }
 0x167   : > { %1301 = vst.msk [vmem:[%s2081_s23 + $0x58] sm:$0xf] %vm1278_vm2, %v1539_v6  ;;  %v1540_v13 = vpack.c.bf16 %v1838_v9, %v1838_v9  ;;  %v1098_v14 = vpop.f32.mrb[54].mxu1 }
 0x168   : > { %v1096_v15 = vadd.f32 %v1095_v8, %v935_v11  ;;  %v938_v16 = vadd.f32 %v1648_v10, %v2071_v29  ;;  %v1100_v17 = vpop.f32.mrb[55].mxu1 }
 0x169   : > { %1302 = vst.msk [vmem:[%s2081_s23 + $0x5c] sm:$0xf] %vm1278_vm2, %v1540_v13 }
 0x16a   : > { %1843 = vtanh.f32 %v1096_v15  ;;  %v1099_v18 = vadd.f32 %v1098_v14, %v938_v16  ;;  %v1649_v19 = vpop.f32.mrb[56].mxu0 }
 0x16b   : > { %v1650_v20 = vpop.f32.mrb[57].mxu0 }
 0x16c   : > { %v1840_v21 = vpop.eup %1839  ;;  %1845 = vtanh.f32 %v1099_v18  ;;  %v1651_v22 = vadd.f32 %v1650_v20, %v1649_v19  ;;  %v1652_v23 = vpop.f32.mrb[58].mxu0 }
 0x16d   : > { %v1541_v24 = vpack.c.bf16 %v1840_v21, %v1840_v21  ;;  %v1653_v25 = vpop.f32.mrb[59].mxu0  ;;  %v1103_v26 = vpop.f32.mrb[56].mxu1 }
 0x16e   : > { %v1842_v27 = vpop.eup %1841  ;;  %v1654_v28 = vadd.f32 %v1653_v25, %v1652_v23  ;;  %v943_v30 = vadd.f32 %v1651_v22, %v2071_v29  ;;  %v1105_v31 = vpop.f32.mrb[57].mxu1 }
 0x16f   : > { %1303 = vst.msk [vmem:[%s2081_s23 + $0x60] sm:$0xf] %vm1278_vm2, %v1541_v24  ;;  %v1542_v32 = vpack.c.bf16 %v1842_v27, %v1842_v27  ;;  %v1106_v33 = vpop.f32.mrb[58].mxu1 }
 0x170   : > { %v1104_v34 = vadd.f32 %v1103_v26, %v943_v30  ;;  %v946_v35 = vadd.f32 %v1654_v28, %v2071_v29  ;;  %v1108_v36 = vpop.f32.mrb[59].mxu1 }
 0x171   : > { %1304 = vst.msk [vmem:[%s2081_s23 + $0x64] sm:$0xf] %vm1278_vm2, %v1542_v32 }
 0x172   : > { %1847 = vtanh.f32 %v1104_v34  ;;  %v1107_v37 = vadd.f32 %v1106_v33, %v946_v35  ;;  %v1655_v38 = vpop.f32.mrb[60].mxu0 }
 0x173   : > { %v1656_v39 = vpop.f32.mrb[61].mxu0 }
 0x174   : > { %v1844_v40 = vpop.eup %1843  ;;  %1849 = vtanh.f32 %v1107_v37  ;;  %v1657_v41 = vadd.f32 %v1656_v39, %v1655_v38  ;;  %v1658_v42 = vpop.f32.mrb[62].mxu0 }
 0x175   : > { %v1543_v43 = vpack.c.bf16 %v1844_v40, %v1844_v40  ;;  %v1659_v44 = vpop.f32.mrb[63].mxu0  ;;  %v1111_v45 = vpop.f32.mrb[60].mxu1 }
 0x176   : > { %v1846_v46 = vpop.eup %1845  ;;  %v1660_v47 = vadd.f32 %v1659_v44, %v1658_v42  ;;  %v951_v48 = vadd.f32 %v1657_v41, %v2071_v29  ;;  %v1113_v49 = vpop.f32.mrb[61].mxu1 }
 0x177   : > { %1305 = vst.msk [vmem:[%s2081_s23 + $0x68] sm:$0xf] %vm1278_vm2, %v1543_v43  ;;  %v1544_v50 = vpack.c.bf16 %v1846_v46, %v1846_v46  ;;  %v1114_v51 = vpop.f32.mrb[62].mxu1 }
 0x178   : > { %v1112_v52 = vadd.f32 %v1111_v45, %v951_v48  ;;  %v954_v53 = vadd.f32 %v1660_v47, %v2071_v29  ;;  %v1116_v54 = vpop.f32.mrb[63].mxu1 }
 0x179   : > { %1306 = vst.msk [vmem:[%s2081_s23 + $0x6c] sm:$0xf] %vm1278_vm2, %v1544_v50 }
 0x17a   : > { %1851 = vtanh.f32 %v1112_v52  ;;  %v1115_v55 = vadd.f32 %v1114_v51, %v954_v53 }
 0x17c   : > { %v1848_v56 = vpop.eup %1847  ;;  %1853 = vtanh.f32 %v1115_v55 }
 0x17d   : > { %v1545_v57 = vpack.c.bf16 %v1848_v56, %v1848_v56 }
 0x17e   : > { %v1850_v58 = vpop.eup %1849 }
 0x17f   : > { %1307 = vst.msk [vmem:[%s2081_s23 + $0x70] sm:$0xf] %vm1278_vm2, %v1545_v57  ;;  %v1546_v59 = vpack.c.bf16 %v1850_v58, %v1850_v58 }
 0x181   : > { %1308 = vst.msk [vmem:[%s2081_s23 + $0x74] sm:$0xf] %vm1278_vm2, %v1546_v59 }
 0x184   : > { %v1852_v60 = vpop.eup %1851 }
 0x185   : > { %v1547_v61 = vpack.c.bf16 %v1852_v60, %v1852_v60 }
 0x186   : > { %v1854_v62 = vpop.eup %1853 }
 0x187   : > { %1309 = vst.msk [vmem:[%s2081_s23 + $0x78] sm:$0xf] %vm1278_vm2, %v1547_v61  ;;  %v1548_v29 = vpack.c.bf16 %v1854_v62, %v1854_v62 }
 0x189   : > { %1310 = vst.msk [vmem:[%s2081_s23 + $0x7c] sm:$0xf] %vm1278_vm2, %v1548_v29 }
 0x18a PF: > { %s13_s12 = sadd.s32 1, %s1861_s12  }
 0x18b   : > { %p10_p4 = scmp.ge.s32.totalorder %s13_s12, 4  }
 0x18d   :  { %12 = sbr.rel (!%p10_p4) target bundleno = 1 (0x1), region = 62 }

</bundles_post_ra>
